<compile_context>
chip_gen: v7x
topology: tpu7x:2x2x1
jax: 0.10.0
libtpu: 0.0.40
codegen_flags: <defaults>
</compile_context>

<pallas_src>
import numpy as np

import jax
import jax.numpy as jnp
from jax import lax
from jax.experimental import pallas as pl
from jax.experimental.pallas import tpu as pltpu


# ----------------------------------------------------------------------------
# Pallas kernel: entire StyleEncoder forward for B_TILE images per grid step.
# ----------------------------------------------------------------------------
def _style_encoder_kernel(x_ref, m1_ref, b1_ref, g2_ref, b2_ref,
                          g3_ref, b3_ref, wh_ref, bh_ref, o_ref):
    f32 = jnp.float32
    cdt = m1_ref.dtype                       # compute dtype of MXU operands
    B, Hp, _ = x_ref.shape                   # (B_TILE, H+6, W*Cin)
    H = Hp - 6

    x = x_ref[...]                           # already cast to cdt by wrapper

    # --- layer 1: ReflectionPad2d(3) + Conv2d(in_ch, nef, 7) + ReLU.
    # Column reflection is folded into m1; row reflection was applied by the
    # wrapper.  The 7 row taps are lane-concatenated -> ONE (B*H, 7*W*Cin) dot.
    xc = jnp.concatenate([x[:, i:i + H, :] for i in range(7)], axis=-1)
    y = jnp.dot(xc.reshape(B * H, xc.shape[-1]), m1_ref[...],
                preferred_element_type=f32)
    y = jnp.maximum(y + b1_ref[...], 0.0)                    # (B*H, W*nef)
    n1 = y.shape[-1]
    y = y.astype(cdt).reshape(B, H, n1)

    # --- down-stage 1: Conv2d(nef, 2nef, 4, 2, 1) + ReLU, computed row-DENSE.
    # Dense row r corresponds to input rows r-1..r+2; the true stride-2 output
    # rows are the even r (picked up implicitly by the next stage / pooling).
    # Column taps / column stride-2 / column pad are folded into g2.
    yp = jnp.concatenate(
        [jnp.zeros((B, 1, n1), cdt), y, jnp.zeros((B, 2, n1), cdt)], axis=1)
    c1 = jnp.concatenate([yp[:, i:i + H, :] for i in range(4)], axis=-1)
    a1 = jnp.dot(c1.reshape(B * H, c1.shape[-1]), g2_ref[...],
                 preferred_element_type=f32)
    a1 = jnp.maximum(a1 + b2_ref[...], 0.0)                  # (B*H, (W/2)*2nef)
    n2 = a1.shape[-1]
    a1 = a1.astype(cdt).reshape(B, H, n2)

    # --- down-stage 2: Conv2d(2nef, 4nef, 4, 2, 1) + ReLU, also row-dense.
    # Its taps read even dense rows of stage 1 (offsets -2,0,+2,+4), which are
    # exactly the true stage-1 outputs / zero pads; the true stage-2 outputs
    # live at dense rows r % 4 == 0.
    ap = jnp.concatenate(
        [jnp.zeros((B, 2, n2), cdt), a1, jnp.zeros((B, 4, n2), cdt)], axis=1)
    c2 = jnp.concatenate([ap[:, 2 * i:2 * i + H, :] for i in range(4)], axis=-1)
    a2 = jnp.dot(c2.reshape(B * H, c2.shape[-1]), g3_ref[...],
                 preferred_element_type=f32)
    a2 = jnp.maximum(a2 + b3_ref[...], 0.0)                  # (B*H, (W/4)*4nef)
    n3 = a2.shape[-1]
    a2 = a2.reshape(B, H, n3)

    # --- AdaptiveAvgPool2d(1) + Conv2d(4nef, style_dim, 1): keep only the true
    # rows (dense row % 4 == 0) via a 0/1 mask folded into the row reduction;
    # the 1/(Ho*Wo) pool scale is pre-folded into the tiled head weight.
    ridx = lax.broadcasted_iota(jnp.int32, (1, H, n3), 1)
    pooled = jnp.sum(jnp.where((ridx % 4) == 0, a2, 0.0), axis=1)   # (B, n3)
    out = jnp.dot(pooled, wh_ref[...], preferred_element_type=f32) + bh_ref[...]
    o_ref[...] = out.astype(o_ref.dtype)


# ----------------------------------------------------------------------------
# Host-side (one-time) construction of the constant matrices the kernel uses.
# ----------------------------------------------------------------------------
def _conv1_matrix(w1, W):
    """Fused (7*W*Cin, W*nef) matrix for ReflectionPad2d(3)+Conv2d(Cin,nef,7).

    Column reflection is folded in; the 7 kernel-row taps are stacked along K
    in the same order the kernel lane-concatenates its 7 row-shifted slices."""
    k, _, cin, cout = w1.shape
    place = np.zeros((k, W, W), np.float32)          # [kernel_col, src_col, out_col]
    for j in range(k):
        for wo in range(W):
            q = wo + j - 3                           # padded col - 3
            src = -q if q < 0 else (2 * (W - 1) - q if q > W - 1 else q)
            place[j, src, wo] += 1.0
    m = jnp.einsum("jpo,ijcd->ipcod", jnp.asarray(place), w1)   # (7,W,cin,W,cout)
    return m.reshape(k * W * cin, W * cout)


def _down_matrix(w, W_in):
    """Fused (4*W_in*Cin, (W_in/2)*Cout) matrix for Conv2d(Cin,Cout,4,2,1).

    Column taps, column stride-2 and the zero column pad are folded in; the 4
    kernel-row taps are stacked along K (row handling is done in-kernel)."""
    k, _, cin, cout = w.shape
    Wo = W_in // 2
    place = np.zeros((k, W_in, Wo), np.float32)
    for j in range(k):
        for wo in range(Wo):
            v = 2 * wo + j - 1                       # zero pad by omission
            if 0 <= v < W_in:
                place[j, v, wo] = 1.0
    g = jnp.einsum("jvo,ijcd->ivcod", jnp.asarray(place), w)    # (4,Win,cin,Wo,cout)
    return g.reshape(k * W_in * cin, Wo * cout)


def prepare_pallas_params(params, H, W, compute_dtype=jnp.float32):
    """Build the kernel constants.  compute_dtype=bfloat16 enables the v6e/v7x
    MXU-native path (f32 accumulation is kept inside the kernel)."""
    cdt = compute_dtype
    return dict(
        m1=_conv1_matrix(params["w1"], W).astype(cdt),
        b1=jnp.tile(params["b1"], W).reshape(1, -1).astype(jnp.float32),
        g2=_down_matrix(params["w2"], W).astype(cdt),
        b2=jnp.tile(params["b2"], W // 2).reshape(1, -1).astype(jnp.float32),
        g3=_down_matrix(params["w3"], W // 2).astype(cdt),
        b3=jnp.tile(params["b3"], W // 4).reshape(1, -1).astype(jnp.float32),
        wh=(jnp.tile(params["wh"], (W // 4, 1))
            / float((H // 4) * (W // 4))).astype(jnp.float32),
        bh=params["bh"].reshape(1, -1).astype(jnp.float32),
    )


# ----------------------------------------------------------------------------
# Forward wrapper (single pallas_call; only input-side layout glue in XLA).
# ----------------------------------------------------------------------------
def style_encoder_forward(x_nchw, prepped, b_tile=8):
    n, cin, H, W = x_nchw.shape
    assert H % 4 == 0 and W % 4 == 0
    cdt = prepped["m1"].dtype

    x = jnp.transpose(x_nchw, (0, 2, 3, 1))                        # NCHW->NHWC
    x = jnp.pad(x, ((0, 0), (3, 3), (0, 0), (0, 0)), mode="reflect")  # rows only
    x2d = x.reshape(n, H + 6, W * cin).astype(cdt)                 # lane-dense 2D rows

    bt = min(b_tile, n)
    n_pad = -(-n // bt) * bt
    if n_pad != n:
        x2d = jnp.concatenate(
            [x2d, jnp.zeros((n_pad - n, H + 6, W * cin), cdt)], axis=0)

    names = ("m1", "b1", "g2", "b2", "g3", "b3", "wh", "bh")
    consts = [prepped[k] for k in names]
    style_dim = prepped["bh"].shape[1]

    def const_spec(a):
        zeros = (0,) * a.ndim
        return pl.BlockSpec(a.shape, lambda i: zeros)

    out = pl.pallas_call(
        _style_encoder_kernel,
        out_shape=jax.ShapeDtypeStruct((n_pad, style_dim), jnp.float32),
        grid=(n_pad // bt,),
        in_specs=[pl.BlockSpec((bt, H + 6, W * cin), lambda i: (i, 0, 0))]
                 + [const_spec(a) for a in consts],
        out_specs=pl.BlockSpec((bt, style_dim), lambda i: (i, 0)),
        compiler_params=pltpu.CompilerParams(
            dimension_semantics=("parallel",)),
    )(x2d, *consts)
    return out[:n].reshape(n, style_dim, 1, 1)


# ----------------------------------------------------------------------------
# Parameters & pure-JAX reference (for validation only).
# ----------------------------------------------------------------------------
def init_params(key, in_ch, style_dim, nef=8, n_downsample=2):
    # TODO(synk): the reference default n_downsample=3 is internally
    # inconsistent (the 1x1 head expects nef*2**3 channels but receives
    # nef*2**2); n_downsample=2 is the channel-consistent configuration
    # implemented here, mirroring the StyleEncoder layer construction.
    assert n_downsample == 2
    ks = jax.random.split(key, 8)

    def winit(k, shape):
        fan_in = int(np.prod(shape[:-1]))
        return jax.random.normal(k, shape, jnp.float32) / np.sqrt(float(fan_in))

    def binit(k, c):
        return 0.1 * jax.random.normal(k, (c,), jnp.float32)

    return dict(
        w1=winit(ks[0], (7, 7, in_ch, nef)), b1=binit(ks[1], nef),
        w2=winit(ks[2], (4, 4, nef, 2 * nef)), b2=binit(ks[3], 2 * nef),
        w3=winit(ks[4], (4, 4, 2 * nef, 4 * nef)), b3=binit(ks[5], 4 * nef),
        wh=winit(ks[6], (4 * nef, style_dim)), bh=binit(ks[7], style_dim),
    )


def reference_forward(x_nchw, params):
    dn = ("NHWC", "HWIO", "NHWC")
    hp = lax.Precision.HIGHEST
    x = jnp.transpose(x_nchw, (0, 2, 3, 1))
    x = jnp.pad(x, ((0, 0), (3, 3), (3, 3), (0, 0)), mode="reflect")
    y = lax.conv_general_dilated(x, params["w1"], (1, 1), "VALID",
                                 dimension_numbers=dn, precision=hp)
    y = jnp.maximum(y + params["b1"], 0.0)
    y = lax.conv_general_dilated(y, params["w2"], (2, 2), [(1, 1), (1, 1)],
                                 dimension_numbers=dn, precision=hp)
    y = jnp.maximum(y + params["b2"], 0.0)
    y = lax.conv_general_dilated(y, params["w3"], (2, 2), [(1, 1), (1, 1)],
                                 dimension_numbers=dn, precision=hp)
    y = jnp.maximum(y + params["b3"], 0.0)
    pooled = jnp.mean(y, axis=(1, 2))
    out = jnp.dot(pooled, params["wh"], precision=hp) + params["bh"]
    return out.reshape(x_nchw.shape[0], -1, 1, 1)


# ----------------------------------------------------------------------------
if __name__ == "__main__":
    key = jax.random.PRNGKey(0)
    k_x, k_p = jax.random.split(key)

    in_ch, style_dim, nef, H, W, n = 4, 8, 8, 16, 16, 8
    x = jax.random.normal(k_x, (n, in_ch, H, W), jnp.float32)        # NCHW
    params = init_params(k_p, in_ch, style_dim, nef=nef, n_downsample=2)
    ref = reference_forward(x, params)

    fwd = jax.jit(style_encoder_forward)

    # float32 compute path (all generations): strict validation.
    prepped_f32 = prepare_pallas_params(params, H, W, jnp.float32)
    out_f32 = jax.block_until_ready(fwd(x, prepped_f32))
    assert out_f32.shape == (n, style_dim, 1, 1), out_f32.shape
    assert bool(jnp.all(jnp.isfinite(out_f32)))
    err_f32 = float(jnp.max(jnp.abs(out_f32 - ref)))
    assert err_f32 < 2e-3, f"f32 max abs err {err_f32}"

    # bf16 MXU-operand path (v6e/v7x recommendation): looser tolerance.
    prepped_bf16 = prepare_pallas_params(params, H, W, jnp.bfloat16)
    out_bf16 = jax.block_until_ready(fwd(x, prepped_bf16))
    assert bool(jnp.all(jnp.isfinite(out_bf16)))
    err_bf16 = float(jnp.max(jnp.abs(out_bf16 - ref)))
    assert err_bf16 < 5e-2, f"bf16 max abs err {err_bf16}"

    print("KERNEL_OK")
</pallas_src>

<mosaic_0001>
module attributes {stable_mosaic.version = 11 : i64} {
  func.func @_style_encoder_kernel(%arg0: i32, %arg1: memref<8x22x64xf32, #tpu.memory_space<vmem>>, %arg2: memref<448x128xf32, #tpu.memory_space<vmem>>, %arg3: memref<1x128xf32, #tpu.memory_space<vmem>>, %arg4: memref<512x128xf32, #tpu.memory_space<vmem>>, %arg5: memref<1x128xf32, #tpu.memory_space<vmem>>, %arg6: memref<512x128xf32, #tpu.memory_space<vmem>>, %arg7: memref<1x128xf32, #tpu.memory_space<vmem>>, %arg8: memref<128x8xf32, #tpu.memory_space<vmem>>, %arg9: memref<1x8xf32, #tpu.memory_space<vmem>>, %arg10: memref<8x8xf32, #tpu.memory_space<vmem>>) attributes {dimension_semantics = [#tpu.dimension_semantics<parallel>], iteration_bounds = array<i64: 1>, scalar_prefetch = 0 : i64, scratch_operands = 0 : i64, tpu.core_type = #tpu.core_type<tc>, window_params = [{transform_indices = @transform_0, window_bounds = array<i64: 8, 22, 64>}, {pipeline_mode = #tpu.pipeline_mode<synchronous>, transform_indices = @transform_1, window_bounds = array<i64: 448, 128>}, {pipeline_mode = #tpu.pipeline_mode<synchronous>, transform_indices = @transform_2, window_bounds = array<i64: 1, 128>}, {pipeline_mode = #tpu.pipeline_mode<synchronous>, transform_indices = @transform_3, window_bounds = array<i64: 512, 128>}, {pipeline_mode = #tpu.pipeline_mode<synchronous>, transform_indices = @transform_4, window_bounds = array<i64: 1, 128>}, {pipeline_mode = #tpu.pipeline_mode<synchronous>, transform_indices = @transform_5, window_bounds = array<i64: 512, 128>}, {pipeline_mode = #tpu.pipeline_mode<synchronous>, transform_indices = @transform_6, window_bounds = array<i64: 1, 128>}, {pipeline_mode = #tpu.pipeline_mode<synchronous>, transform_indices = @transform_7, window_bounds = array<i64: 128, 8>}, {pipeline_mode = #tpu.pipeline_mode<synchronous>, transform_indices = @transform_8, window_bounds = array<i64: 1, 8>}, {transform_indices = @transform_9, window_bounds = array<i64: 8, 8>}]} {
    %c0 = arith.constant 0 : index
    %c0_0 = arith.constant 0 : index
    %c0_1 = arith.constant 0 : index
    %0 = vector.load %arg1[%c0, %c0_0, %c0_1] : memref<8x22x64xf32, #tpu.memory_space<vmem>>, vector<8x22x64xf32>
    %1 = vector.extract_strided_slice %0 {offsets = [0, 0, 0], sizes = [8, 16, 64], strides = [1, 1, 1]} : vector<8x22x64xf32> to vector<8x16x64xf32>
    %2 = vector.extract_strided_slice %0 {offsets = [0, 1, 0], sizes = [8, 16, 64], strides = [1, 1, 1]} : vector<8x22x64xf32> to vector<8x16x64xf32>
    %3 = vector.extract_strided_slice %0 {offsets = [0, 2, 0], sizes = [8, 16, 64], strides = [1, 1, 1]} : vector<8x22x64xf32> to vector<8x16x64xf32>
    %4 = vector.extract_strided_slice %0 {offsets = [0, 3, 0], sizes = [8, 16, 64], strides = [1, 1, 1]} : vector<8x22x64xf32> to vector<8x16x64xf32>
    %5 = vector.extract_strided_slice %0 {offsets = [0, 4, 0], sizes = [8, 16, 64], strides = [1, 1, 1]} : vector<8x22x64xf32> to vector<8x16x64xf32>
    %6 = vector.extract_strided_slice %0 {offsets = [0, 5, 0], sizes = [8, 16, 64], strides = [1, 1, 1]} : vector<8x22x64xf32> to vector<8x16x64xf32>
    %7 = vector.extract_strided_slice %0 {offsets = [0, 6, 0], sizes = [8, 16, 64], strides = [1, 1, 1]} : vector<8x22x64xf32> to vector<8x16x64xf32>
    %8 = tpu.concatenate %1, %2, %3, %4, %5, %6, %7 in 2 : vector<8x16x64xf32>, vector<8x16x64xf32>, vector<8x16x64xf32>, vector<8x16x64xf32>, vector<8x16x64xf32>, vector<8x16x64xf32>, vector<8x16x64xf32> -> vector<8x16x448xf32>
    %9 = vector.shape_cast %8 : vector<8x16x448xf32> to vector<128x448xf32>
    %c0_2 = arith.constant 0 : index
    %c0_3 = arith.constant 0 : index
    %10 = vector.load %arg2[%c0_2, %c0_3] : memref<448x128xf32, #tpu.memory_space<vmem>>, vector<448x128xf32>
    %cst = arith.constant dense<0.000000e+00> : vector<128x128xf32>
    %11 = tpu.matmul %9, %10, %cst {dimension_numbers = #tpu.dot_dimension_numbers<[1], [0], [0], [1], [0, 0, 1, 1], [], []>} : vector<128x448xf32>, vector<448x128xf32>, vector<128x128xf32> -> vector<128x128xf32>
    %c0_4 = arith.constant 0 : index
    %c0_5 = arith.constant 0 : index
    %12 = vector.load %arg3[%c0_4, %c0_5] : memref<1x128xf32, #tpu.memory_space<vmem>>, vector<1x128xf32>
    %13 = vector.broadcast %12 : vector<1x128xf32> to vector<128x128xf32>
    %14 = arith.addf %11, %13 : vector<128x128xf32>
    %cst_6 = arith.constant 0.000000e+00 : f32
    %15 = vector.broadcast %cst_6 : f32 to vector<128x128xf32>
    %16 = arith.maximumf %14, %15 : vector<128x128xf32>
    %17 = vector.shape_cast %16 : vector<128x128xf32> to vector<8x16x128xf32>
    %cst_7 = arith.constant 0.000000e+00 : f32
    %18 = vector.broadcast %cst_7 : f32 to vector<8x1x128xf32>
    %cst_8 = arith.constant 0.000000e+00 : f32
    %19 = vector.broadcast %cst_8 : f32 to vector<8x2x128xf32>
    %20 = tpu.concatenate %18, %17, %19 in 1 : vector<8x1x128xf32>, vector<8x16x128xf32>, vector<8x2x128xf32> -> vector<8x19x128xf32>
    %21 = vector.extract_strided_slice %20 {offsets = [0, 0, 0], sizes = [8, 16, 128], strides = [1, 1, 1]} : vector<8x19x128xf32> to vector<8x16x128xf32>
    %22 = vector.extract_strided_slice %20 {offsets = [0, 1, 0], sizes = [8, 16, 128], strides = [1, 1, 1]} : vector<8x19x128xf32> to vector<8x16x128xf32>
    %23 = vector.extract_strided_slice %20 {offsets = [0, 2, 0], sizes = [8, 16, 128], strides = [1, 1, 1]} : vector<8x19x128xf32> to vector<8x16x128xf32>
    %24 = vector.extract_strided_slice %20 {offsets = [0, 3, 0], sizes = [8, 16, 128], strides = [1, 1, 1]} : vector<8x19x128xf32> to vector<8x16x128xf32>
    %25 = tpu.concatenate %21, %22, %23, %24 in 2 : vector<8x16x128xf32>, vector<8x16x128xf32>, vector<8x16x128xf32>, vector<8x16x128xf32> -> vector<8x16x512xf32>
    %26 = vector.shape_cast %25 : vector<8x16x512xf32> to vector<128x512xf32>
    %c0_9 = arith.constant 0 : index
    %c0_10 = arith.constant 0 : index
    %27 = vector.load %arg4[%c0_9, %c0_10] : memref<512x128xf32, #tpu.memory_space<vmem>>, vector<512x128xf32>
    %cst_11 = arith.constant dense<0.000000e+00> : vector<128x128xf32>
    %28 = tpu.matmul %26, %27, %cst_11 {dimension_numbers = #tpu.dot_dimension_numbers<[1], [0], [0], [1], [0, 0, 1, 1], [], []>} : vector<128x512xf32>, vector<512x128xf32>, vector<128x128xf32> -> vector<128x128xf32>
    %c0_12 = arith.constant 0 : index
    %c0_13 = arith.constant 0 : index
    %29 = vector.load %arg5[%c0_12, %c0_13] : memref<1x128xf32, #tpu.memory_space<vmem>>, vector<1x128xf32>
    %30 = vector.broadcast %29 : vector<1x128xf32> to vector<128x128xf32>
    %31 = arith.addf %28, %30 : vector<128x128xf32>
    %cst_14 = arith.constant 0.000000e+00 : f32
    %32 = vector.broadcast %cst_14 : f32 to vector<128x128xf32>
    %33 = arith.maximumf %31, %32 : vector<128x128xf32>
    %34 = vector.shape_cast %33 : vector<128x128xf32> to vector<8x16x128xf32>
    %cst_15 = arith.constant 0.000000e+00 : f32
    %35 = vector.broadcast %cst_15 : f32 to vector<8x2x128xf32>
    %cst_16 = arith.constant 0.000000e+00 : f32
    %36 = vector.broadcast %cst_16 : f32 to vector<8x4x128xf32>
    %37 = tpu.concatenate %35, %34, %36 in 1 : vector<8x2x128xf32>, vector<8x16x128xf32>, vector<8x4x128xf32> -> vector<8x22x128xf32>
    %38 = vector.extract_strided_slice %37 {offsets = [0, 0, 0], sizes = [8, 16, 128], strides = [1, 1, 1]} : vector<8x22x128xf32> to vector<8x16x128xf32>
    %39 = vector.extract_strided_slice %37 {offsets = [0, 2, 0], sizes = [8, 16, 128], strides = [1, 1, 1]} : vector<8x22x128xf32> to vector<8x16x128xf32>
    %40 = vector.extract_strided_slice %37 {offsets = [0, 4, 0], sizes = [8, 16, 128], strides = [1, 1, 1]} : vector<8x22x128xf32> to vector<8x16x128xf32>
    %41 = vector.extract_strided_slice %37 {offsets = [0, 6, 0], sizes = [8, 16, 128], strides = [1, 1, 1]} : vector<8x22x128xf32> to vector<8x16x128xf32>
    %42 = tpu.concatenate %38, %39, %40, %41 in 2 : vector<8x16x128xf32>, vector<8x16x128xf32>, vector<8x16x128xf32>, vector<8x16x128xf32> -> vector<8x16x512xf32>
    %43 = vector.shape_cast %42 : vector<8x16x512xf32> to vector<128x512xf32>
    %c0_17 = arith.constant 0 : index
    %c0_18 = arith.constant 0 : index
    %44 = vector.load %arg6[%c0_17, %c0_18] : memref<512x128xf32, #tpu.memory_space<vmem>>, vector<512x128xf32>
    %cst_19 = arith.constant dense<0.000000e+00> : vector<128x128xf32>
    %45 = tpu.matmul %43, %44, %cst_19 {dimension_numbers = #tpu.dot_dimension_numbers<[1], [0], [0], [1], [0, 0, 1, 1], [], []>} : vector<128x512xf32>, vector<512x128xf32>, vector<128x128xf32> -> vector<128x128xf32>
    %c0_20 = arith.constant 0 : index
    %c0_21 = arith.constant 0 : index
    %46 = vector.load %arg7[%c0_20, %c0_21] : memref<1x128xf32, #tpu.memory_space<vmem>>, vector<1x128xf32>
    %47 = vector.broadcast %46 : vector<1x128xf32> to vector<128x128xf32>
    %48 = arith.addf %45, %47 : vector<128x128xf32>
    %cst_22 = arith.constant 0.000000e+00 : f32
    %49 = vector.broadcast %cst_22 : f32 to vector<128x128xf32>
    %50 = arith.maximumf %48, %49 : vector<128x128xf32>
    %51 = vector.shape_cast %50 : vector<128x128xf32> to vector<8x16x128xf32>
    %52 = tpu.iota {dimensions = array<i32: 1>} : vector<1x16x128xi32>
    %c4_i32 = arith.constant 4 : i32
    %c0_i32 = arith.constant 0 : i32
    %53 = arith.cmpi eq, %c4_i32, %c0_i32 : i32
    %c1_i32 = arith.constant 1 : i32
    %54 = arith.select %53, %c1_i32, %c4_i32 : i32
    %55 = vector.broadcast %54 : i32 to vector<1x16x128xi32>
    %56 = arith.remsi %52, %55 : vector<1x16x128xi32>
    %c0_i32_23 = arith.constant 0 : i32
    %57 = vector.broadcast %c0_i32_23 : i32 to vector<1x16x128xi32>
    %58 = arith.cmpi ne, %56, %57 : vector<1x16x128xi32>
    %c0_i32_24 = arith.constant 0 : i32
    %59 = vector.broadcast %c0_i32_24 : i32 to vector<1x16x128xi32>
    %60 = arith.cmpi slt, %56, %59 : vector<1x16x128xi32>
    %c0_i32_25 = arith.constant 0 : i32
    %61 = arith.cmpi slt, %54, %c0_i32_25 : i32
    %62 = vector.broadcast %61 : i1 to vector<1x16x128xi1>
    %63 = vector.broadcast %62 : vector<1x16x128xi1> to vector<1x16x128xi1>
    %64 = arith.xori %60, %63 : vector<1x16x128xi1>
    %65 = arith.andi %64, %58 : vector<1x16x128xi1>
    %66 = vector.broadcast %54 : i32 to vector<1x16x128xi32>
    %67 = arith.addi %56, %66 : vector<1x16x128xi32>
    %68 = arith.select %65, %67, %56 : vector<1x16x128xi1>, vector<1x16x128xi32>
    %c0_i32_26 = arith.constant 0 : i32
    %69 = vector.broadcast %c0_i32_26 : i32 to vector<1x16x128xi32>
    %70 = arith.cmpi eq, %68, %69 : vector<1x16x128xi32>
    %cst_27 = arith.constant 0.000000e+00 : f32
    %71 = vector.shape_cast %70 : vector<1x16x128xi1> to vector<1x16x128xi1>
    %72 = vector.broadcast %71 : vector<1x16x128xi1> to vector<8x16x128xi1>
    %73 = vector.broadcast %cst_27 : f32 to vector<8x16x128xf32>
    %74 = arith.select %72, %51, %73 : vector<8x16x128xi1>, vector<8x16x128xf32>
    %cst_28 = arith.constant dense<0.000000e+00> : vector<8x128xf32>
    %75 = vector.multi_reduction <add>, %74, %cst_28 [1] : vector<8x16x128xf32> to vector<8x128xf32>
    %c0_29 = arith.constant 0 : index
    %c0_30 = arith.constant 0 : index
    %76 = vector.load %arg8[%c0_29, %c0_30] : memref<128x8xf32, #tpu.memory_space<vmem>>, vector<128x8xf32>
    %cst_31 = arith.constant dense<0.000000e+00> : vector<8x8xf32>
    %77 = tpu.matmul %75, %76, %cst_31 {dimension_numbers = #tpu.dot_dimension_numbers<[1], [0], [0], [1], [0, 0, 1, 1], [], []>} : vector<8x128xf32>, vector<128x8xf32>, vector<8x8xf32> -> vector<8x8xf32>
    %c0_32 = arith.constant 0 : index
    %c0_33 = arith.constant 0 : index
    %78 = vector.load %arg9[%c0_32, %c0_33] : memref<1x8xf32, #tpu.memory_space<vmem>>, vector<1x8xf32>
    %79 = vector.broadcast %78 : vector<1x8xf32> to vector<8x8xf32>
    %80 = arith.addf %77, %79 : vector<8x8xf32>
    %c0_34 = arith.constant 0 : index
    %c0_35 = arith.constant 0 : index
    %81 = vector.load %arg10[%c0_34, %c0_35] : memref<8x8xf32, #tpu.memory_space<vmem>>, vector<8x8xf32>
    tpu.vector_store %arg10[%c0_34, %c0_35], %80 {strides = array<i32>} : memref<8x8xf32, #tpu.memory_space<vmem>>, vector<8x8xf32>,
    return
  }
  func.func @transform_0(%arg0: i32) -> (i32, i32, i32) {
    %c0_i32 = arith.constant 0 : i32
    %c0_i32_0 = arith.constant 0 : i32
    %c0_i32_1 = arith.constant 0 : i32
    return %arg0, %c0_i32, %c0_i32_0 : i32, i32, i32
  }
  func.func @transform_1(%arg0: i32) -> (i32, i32) {
    %c0_i32 = arith.constant 0 : i32
    %c0_i32_0 = arith.constant 0 : i32
    %c0_i32_1 = arith.constant 0 : i32
    return %c0_i32, %c0_i32_0 : i32, i32
  }
  func.func @transform_2(%arg0: i32) -> (i32, i32) {
    %c0_i32 = arith.constant 0 : i32
    %c0_i32_0 = arith.constant 0 : i32
    %c0_i32_1 = arith.constant 0 : i32
    return %c0_i32, %c0_i32_0 : i32, i32
  }
  func.func @transform_3(%arg0: i32) -> (i32, i32) {
    %c0_i32 = arith.constant 0 : i32
    %c0_i32_0 = arith.constant 0 : i32
    %c0_i32_1 = arith.constant 0 : i32
    return %c0_i32, %c0_i32_0 : i32, i32
  }
  func.func @transform_4(%arg0: i32) -> (i32, i32) {
    %c0_i32 = arith.constant 0 : i32
    %c0_i32_0 = arith.constant 0 : i32
    %c0_i32_1 = arith.constant 0 : i32
    return %c0_i32, %c0_i32_0 : i32, i32
  }
  func.func @transform_5(%arg0: i32) -> (i32, i32) {
    %c0_i32 = arith.constant 0 : i32
    %c0_i32_0 = arith.constant 0 : i32
    %c0_i32_1 = arith.constant 0 : i32
    return %c0_i32, %c0_i32_0 : i32, i32
  }
  func.func @transform_6(%arg0: i32) -> (i32, i32) {
    %c0_i32 = arith.constant 0 : i32
    %c0_i32_0 = arith.constant 0 : i32
    %c0_i32_1 = arith.constant 0 : i32
    return %c0_i32, %c0_i32_0 : i32, i32
  }
  func.func @transform_7(%arg0: i32) -> (i32, i32) {
    %c0_i32 = arith.constant 0 : i32
    %c0_i32_0 = arith.constant 0 : i32
    %c0_i32_1 = arith.constant 0 : i32
    return %c0_i32, %c0_i32_0 : i32, i32
  }
  func.func @transform_8(%arg0: i32) -> (i32, i32) {
    %c0_i32 = arith.constant 0 : i32
    %c0_i32_0 = arith.constant 0 : i32
    %c0_i32_1 = arith.constant 0 : i32
    return %c0_i32, %c0_i32_0 : i32, i32
  }
  func.func @transform_9(%arg0: i32) -> (i32, i32) {
    %c0_i32 = arith.constant 0 : i32
    %c0_i32_0 = arith.constant 0 : i32
    return %arg0, %c0_i32 : i32, i32
  }
}

</mosaic_0001>

<bundles_post_ra>
// kernel: style_encoder_forward.1
= control target key start
LH: loop header
LB: loop body
LE: loop exit
PB: predicated region body
PF: predicated region fallthrough
CT: control target
= control target key end

     0   :  { %vm81_vm0 = vcmask 1046528   ;;  %vm227_vm1 = vcmask 1044480   ;;  %vm373_vm2 = vcmask 1042432   ;;  %s3354_s25 = smov 64   ;;  %s5186_s0 = inlined_call_operand.vmem [shape: f32[8,22,64], index: 0, kind: input, shape index: {}]   ;;  %s5187_s1 = inlined_call_operand.vmem [shape: f32[448,128], index: 1, kind: input, shape index: {}]   ;;  %s5188_s2 = inlined_call_operand.vmem [shape: f32[1,128], index: 2, kind: input, shape index: {}]   ;;  %s5189_s3 = inlined_call_operand.vmem [shape: f32[512,128], index: 3, kind: input, shape index: {}]   ;;  %s5190_s4 = inlined_call_operand.vmem [shape: f32[1,128], index: 4, kind: input, shape index: {}]   ;;  %s5191_s5 = inlined_call_operand.vmem [shape: f32[512,128], index: 5, kind: input, shape index: {}]   ;;  %s5192_s6 = inlined_call_operand.vmem [shape: f32[1,128], index: 6, kind: input, shape index: {}]   ;;  %s5193_s7 = inlined_call_operand.vmem [shape: f32[128,8], index: 7, kind: input, shape index: {}]   ;;  %s5194_s8 = inlined_call_operand.vmem [shape: f32[1,8], index: 8, kind: input, shape index: {}]   ;;  %s5195_s9 = inlined_call_operand.hbm [shape: f32[8,8], index: 9, kind: output, shape index: {}]  }
   0x1   :  { %v3412_v0 = vld [vmem:[%s5186_s0] sm:$0xff]  ;;  %v3417_v1 = vld [vmem:[%s5186_s0 + $0x8] sm:$0xff]  ;;  %v3422_v2 = vld [vmem:[%s5186_s0 + $0x18] sm:$0xff] }
   0x2   :  { %v82_v3 = vrot.slane %v3412_v0, 1  ;;  %v83_v4 = vrot.slane %v3417_v1, 1  ;;  %v228_v5 = vrot.slane %v3412_v0, 3  ;;  %v229_v6 = vrot.slane %v3417_v1, 3  ;;  %v3431_v7 = vld [vmem:[%s5186_s0 + $0x20] sm:$0xff]  ;;  %v3448_v16 = vld [vmem:[%s5186_s0 + $0x30] sm:$0xff] }
   0x3   :  { %v233_v8 = vrot.slane %v3422_v2, 3  ;;  %v234_v9 = vrot.slane %v3431_v7, 3  ;;  %v374_v10 = vrot.slane %v3412_v0, 5  ;;  %v3439_v11 = vld [vmem:[%s5186_s0 + $0x10] sm:$0x3f]  ;;  %v375_v14 = vrot.slane %v3417_v1, 5 }
   0x4   :  { %v84_v12 = vsel %vm81_vm0, %v82_v3, %v83_v4  ;;  %v230_v13 = vsel %vm227_vm1, %v228_v5, %v229_v6  ;;  %v85_v15 = vrot.slane %v3439_v11, 1  ;;  %v3453_v17 = vld [vmem:[%s5186_s0 + $0x38] sm:$0xff]  ;;  %v231_v20 = vrot.slane %v3439_v11, 3  ;;  %v3465_v26 = vld [vmem:[%s5186_s0 + $0x28] sm:$0x3f]  ;;  %v3500_v49 = vld [vmem:[%s5186_s0 + $0x50] sm:$0xff] }
   0x5   :  { %v3202_v18 = vpack.i.bf16 %v84_v12, %v230_v13  ;;  %v235_v19 = vsel %vm227_vm1, %v233_v8, %v234_v9  ;;  %v87_v21 = vrot.slane %v3422_v2, 1  ;;  %v376_v22 = vsel %vm373_vm2, %v374_v10, %v375_v14  ;;  %v3477_v35 = vld [vmem:[%s5186_s0 + $0x40] sm:$0x3f]  ;;  %v3495_v48 = vld [vmem:[%s5186_s0 + $0x48] sm:$0xff] }
   0x6   :  { %v86_v23 = vsel %vm81_vm0, %v83_v4, %v85_v15  ;;  %v88_v24 = vrot.slane %v3431_v7, 1  ;;  %v377_v25 = vrot.slane %v3439_v11, 5  ;;  %v3212_v27 = vpack.i.bf16 %v235_v19, %v376_v22  ;;  %v3514_v61 = vld [vmem:[%s5186_s0 + $0x60] sm:$0xff]  ;;  %v3519_v62 = vld [vmem:[%s5186_s0 + $0x68] sm:$0xff] }
   0x7   :  { %3203 = vrot.lane.b32.xlu0 %v3202_v18, %s3354_s25  ;;  %v232_v28 = vsel %vm227_vm1, %v229_v6, %v231_v20  ;;  %v238_v29 = vrot.slane %v3448_v16, 3  ;;  %v239_v30 = vrot.slane %v3453_v17, 3  ;;  %v379_v34 = vrot.slane %v3422_v2, 5  ;;  %v3529_v6 = vld [vmem:[%s5186_s0 + $0x58] sm:$0x3f] }
   0x8   :  { %v3207_v31 = vpack.i.bf16 %v86_v23, %v232_v28  ;;  %v89_v32 = vsel %vm81_vm0, %v87_v21, %v88_v24  ;;  %v378_v33 = vsel %vm373_vm2, %v375_v14, %v377_v25  ;;  %3213 = vrot.lane.b32.xlu1 %v3212_v27, %s3354_s25  ;;  %v380_v38 = vrot.slane %v3431_v7, 5  ;;  %v3546_v23 = vld [vmem:[%s5186_s0 + $0x70] sm:$0x3f] }
   0x9   :  { %v3217_v36 = vpack.i.bf16 %v378_v33, %v89_v32  ;;  %v240_v37 = vsel %vm227_vm1, %v238_v29, %v239_v30  ;;  %v90_v39 = vrot.slane %v3465_v26, 1  ;;  %v236_v40 = vrot.slane %v3465_v26, 3 }
   0xa   :  { %v92_v41 = vrot.slane %v3448_v16, 1  ;;  %v93_v42 = vrot.slane %v3453_v17, 1  ;;  %v382_v43 = vrot.slane %v3465_v26, 5  ;;  %v381_v44 = vsel %vm373_vm2, %v379_v34, %v380_v38 }
   0xb   :  { %3208 = vrot.lane.b32.xlu0 %v3207_v31, %s3354_s25  ;;  %v91_v45 = vsel %vm81_vm0, %v88_v24, %v90_v39  ;;  %v95_v46 = vrot.slane %v3477_v35, 1  ;;  %v241_v47 = vrot.slane %v3477_v35, 3  ;;  %v237_v50 = vsel %vm227_vm1, %v234_v9, %v236_v40  ;;  %v3551_v24 = vld [vmem:[%s5186_s0 + $0x78] sm:$0xff] }
   0xc   :  { %v94_v51 = vsel %vm81_vm0, %v92_v41, %v93_v42  ;;  %v383_v52 = vsel %vm373_vm2, %v380_v38, %v382_v43  ;;  %3218 = vrot.lane.b32.xlu1 %v3217_v36, %s3354_s25  ;;  %v3227_v53 = vpack.i.bf16 %v240_v37, %v381_v44  ;;  %v3222_v54 = vpack.i.bf16 %v91_v45, %v237_v50  ;;  %v3581_v50 = vld [vmem:[%s5186_s0 + $0x90] sm:$0xff] }
   0xd   :  { %v96_v55 = vsel %vm81_vm0, %v93_v42, %v95_v46  ;;  %v242_v56 = vsel %vm227_vm1, %v239_v30, %v241_v47  ;;  %v3232_v57 = vpack.i.bf16 %v383_v52, %v94_v51  ;;  %v243_v58 = vrot.slane %v3495_v48, 3  ;;  %v3560_v30 = vld [vmem:[%s5186_s0 + $0x80] sm:$0xff]  ;;  %v3586_v51 = vld [vmem:[%s5186_s0 + $0x98] sm:$0xff]  ;;  %v3591_v52 = vld [vmem:[%s5186_s0 + $0x88] sm:$0x3f] }
   0xe   :  { %v244_v59 = vrot.slane %v3500_v49, 3  ;;  %v384_v60 = vrot.slane %v3448_v16, 5  ;;  %v385_v63 = vrot.slane %v3453_v17, 5  ;;  %v97_v3 = vrot.slane %v3495_v48, 1 }
   0xf   :  { %3223 = vrot.lane.b32.xlu0 %v3222_v54, %s3354_s25  ;;  %v98_v4 = vrot.slane %v3500_v49, 1  ;;  %v387_v5 = vrot.slane %v3477_v35, 5  ;;  %v3237_v8 = vpack.i.bf16 %v96_v55, %v242_v56  ;;  %v248_v12 = vrot.slane %v3514_v61, 3 }
  0x10   :  { %v245_v9 = vsel %vm227_vm1, %v243_v58, %v244_v59  ;;  %3228 = vrot.lane.b32.xlu1 %v3227_v53, %s3354_s25  ;;  %v386_v10 = vsel %vm373_vm2, %v384_v60, %v385_v63  ;;  %v249_v13 = vrot.slane %v3519_v62, 3  ;;  %v389_v14 = vrot.slane %v3495_v48, 5 }
  0x11   :  { %v99_v15 = vsel %vm81_vm0, %v97_v3, %v98_v4  ;;  %v388_v18 = vsel %vm373_vm2, %v385_v63, %v387_v5  ;;  %v390_v19 = vrot.slane %v3500_v49, 5  ;;  %v100_v20 = vrot.slane %v3529_v6, 1 }
  0x12   :  { %v3242_v21 = vpack.i.bf16 %v245_v9, %v386_v10  ;;  %v246_v22 = vrot.slane %v3529_v6, 3  ;;  %v102_v27 = vrot.slane %v3514_v61, 1  ;;  %v103_v28 = vrot.slane %v3519_v62, 1 }
  0x13   :  { %3233 = vrot.lane.b32.xlu0 %v3232_v57, %s3354_s25  ;;  %v101_v25 = vsel %vm81_vm0, %v98_v4, %v100_v20  ;;  %v392_v29 = vrot.slane %v3529_v6, 5  ;;  %v3247_v31 = vpack.i.bf16 %v388_v18, %v99_v15  ;;  %v250_v32 = vsel %vm227_vm1, %v248_v12, %v249_v13 }
  0x14   :  { %3238 = vrot.lane.b32.xlu1 %v3237_v8, %s3354_s25  ;;  %v247_v33 = vsel %vm227_vm1, %v244_v59, %v246_v22  ;;  %v391_v34 = vsel %vm373_vm2, %v389_v14, %v390_v19  ;;  %v105_v36 = vrot.slane %v3546_v23, 1  ;;  %v251_v37 = vrot.slane %v3546_v23, 3 }
  0x15   :  { %v253_v38 = vrot.slane %v3551_v24, 3  ;;  %v3252_v39 = vpack.i.bf16 %v101_v25, %v247_v33  ;;  %v254_v40 = vrot.slane %v3560_v30, 3  ;;  %v394_v41 = vrot.slane %v3514_v61, 5 }
  0x16   :  { %v395_v42 = vrot.slane %v3519_v62, 5  ;;  %v104_v43 = vsel %vm81_vm0, %v102_v27, %v103_v28  ;;  %v393_v44 = vsel %vm373_vm2, %v390_v19, %v392_v29  ;;  %v3257_v45 = vpack.i.bf16 %v250_v32, %v391_v34 }
  0x17   :  { %3243 = vrot.lane.b32.xlu0 %v3242_v21, %s3354_s25  ;;  %v107_v46 = vrot.slane %v3551_v24, 1  ;;  %v108_v47 = vrot.slane %v3560_v30, 1  ;;  %v106_v53 = vsel %vm81_vm0, %v103_v28, %v105_v36  ;;  %v252_v54 = vsel %vm227_vm1, %v249_v13, %v251_v37 }
  0x18   :  { %3248 = vrot.lane.b32.xlu1 %v3247_v31, %s3354_s25  ;;  %v397_v55 = vrot.slane %v3546_v23, 5  ;;  %v3262_v56 = vpack.i.bf16 %v393_v44, %v104_v43  ;;  %v255_v57 = vsel %vm227_vm1, %v253_v38, %v254_v40  ;;  %v396_v58 = vsel %vm373_vm2, %v394_v41, %v395_v42 }
  0x19   :  { %v258_v59 = vrot.slane %v3581_v50, 3  ;;  %v259_v60 = vrot.slane %v3586_v51, 3  ;;  %v110_v63 = vrot.slane %v3591_v52, 1  ;;  %v256_v3 = vrot.slane %v3591_v52, 3 }
  0x1a   :  { %v3267_v4 = vpack.i.bf16 %v106_v53, %v252_v54  ;;  %v109_v5 = vsel %vm81_vm0, %v107_v46, %v108_v47  ;;  %v399_v8 = vrot.slane %v3551_v24, 5  ;;  %v400_v9 = vrot.slane %v3560_v30, 5 }
  0x1b   :  { %3253 = vrot.lane.b32.xlu0 %v3252_v39, %s3354_s25 }
  0x1c   :  { %3258 = vrot.lane.b32.xlu1 %v3257_v45, %s3354_s25 }
  0x1d   :  { %14 = vsyncpa [#allocation3], 0  ;;  %v398_v10 = vsel %vm373_vm2, %v395_v42, %v397_v55  ;;  %v112_v12 = vrot.slane %v3581_v50, 1  ;;  %v113_v13 = vrot.slane %v3586_v51, 1  ;;  %v402_v14 = vrot.slane %v3591_v52, 5  ;;  %v3623_v22 = vld [vmem:[%s5186_s0 + $0xa8] sm:$0xff] }
  0x1e   :  { %v3614_v15 = vld [vmem:[%s5186_s0 + $0xa0] sm:$0x3f]  ;;  %v3272_v18 = vpack.i.bf16 %v255_v57, %v396_v58  ;;  %v260_v19 = vsel %vm227_vm1, %v258_v59, %v259_v60  ;;  %v111_v20 = vsel %vm81_vm0, %v108_v47, %v110_v63  ;;  %v257_v21 = vsel %vm227_vm1, %v254_v40, %v256_v3  ;;  %v3628_v25 = vld [vmem:[%s5186_s0 + $0xb0] sm:$0xff]  ;;  %v3639_v34 = vld [vmem:[%s5186_s0 + $0xb8] sm:$0x3f]  ;;  %s3358_s14 = smov [#allocation2]  }
  0x1f   :  { %3263 = vrot.lane.b32.xlu0 %v3262_v56, %s3354_s25  ;;  %v3277_v27 = vpack.i.bf16 %v398_v10, %v109_v5  ;;  %v401_v28 = vsel %vm373_vm2, %v399_v8, %v400_v9  ;;  %v115_v29 = vrot.slane %v3614_v15, 1  ;;  %v261_v31 = vrot.slane %v3614_v15, 3  ;;  %v584_v36 = vld [vmem:[%s5187_s1 + $0x100] sm:$0xff]  ;;  %v585_v40 = vld [vmem:[%s5187_s1 + $0x108] sm:$0xff]  ;;  %v586_v41 = vld [vmem:[%s5187_s1 + $0x110] sm:$0xff]  ;;  %s2465_s15 = sshll.u32 %s3358_s14, 4  ;;  %s2466_s15 = int_to_ptr.vmem [resolvable:$true] %s2465_s15 }
  0x20   :  { %3268 = vrot.lane.b32.xlu1 %v3267_v4, %s3354_s25  ;;  %v114_v32 = vsel %vm81_vm0, %v112_v12, %v113_v13  ;;  %v403_v33 = vsel %vm373_vm2, %v400_v9, %v402_v14  ;;  %v3282_v37 = vpack.i.bf16 %v111_v20, %v257_v21  ;;  %v263_v38 = vrot.slane %v3623_v22, 3  ;;  %v568_v42 = vld [vmem:[%s5187_s1 + $0x80] sm:$0xff]  ;;  %v569_v46 = vld [vmem:[%s5187_s1 + $0x88] sm:$0xff]  ;;  %v587_v57 = vld [vmem:[%s5187_s1 + $0x118] sm:$0xff]  ;;  %p3335_p1 = scmp.lt.s32.totalorder %s2466_s15, %s2466_s15 }
  0x21   :  { %v264_v39 = vrot.slane %v3628_v25, 3  ;;  %v3287_v43 = vpack.i.bf16 %v260_v19, %v401_v28  ;;  %v404_v44 = vrot.slane %v3581_v50, 5  ;;  %v405_v45 = vrot.slane %v3586_v51, 5  ;;  %v552_v47 = vld [vmem:[%s5187_s1] sm:$0xff]  ;;  %v553_v53 = vld [vmem:[%s5187_s1 + $0x8] sm:$0xff]  ;;  %v570_v58 = vld [vmem:[%s5187_s1 + $0x90] sm:$0xff] }
  0x22   :  { %v3292_v54 = vpack.i.bf16 %v403_v33, %v114_v32  ;;  %v116_v55 = vsel %vm81_vm0, %v113_v13, %v115_v29  ;;  %v262_v56 = vsel %vm227_vm1, %v259_v60, %v261_v31  ;;  %v571_v59 = vld [vmem:[%s5187_s1 + $0x98] sm:$0xff]  ;;  %v117_v63 = vrot.slane %v3623_v22, 1  ;;  %v588_v19 = vld [vmem:[%s5187_s1 + $0x120] sm:$0xff]  ;;  %v554_v21 = vld [vmem:[%s5187_s1 + $0x10] sm:$0xff] }
  0x23   :  { %3273 = vrot.lane.b32.xlu0 %v3272_v18, %s3354_s25  ;;  %v118_v3 = vrot.slane %v3628_v25, 1  ;;  %v407_v4 = vrot.slane %v3614_v15, 5  ;;  %v5196_v5 = vmov 0.0|0.0   ;;  %v3010_v60 = vpack.c.bf16 %v585_v40, %v584_v36  ;;  %v589_v29 = vld [vmem:[%s5187_s1 + $0x128] sm:$0xff]  ;;  %v572_v31 = vld [vmem:[%s5187_s1 + $0xa0] sm:$0xff] }
  0x24   :  { %3278 = vrot.lane.b32.xlu1 %v3277_v27, %s3354_s25  ;;  %3009 = vmatprep.subr.bf16.mxu1 %v5196_v5  ;;  %v265_v8 = vsel %vm227_vm1, %v263_v38, %v264_v39  ;;  %v120_v9 = vrot.slane %v3639_v34, 1  ;;  %v2977_v10 = vpack.c.bf16 %v569_v46, %v568_v42  ;;  %v2979_v12 = vpack.c.bf16 %v553_v53, %v552_v47  ;;  %v555_v27 = vld [vmem:[%s5187_s1 + $0x18] sm:$0xff]  ;;  %v573_v32 = vld [vmem:[%s5187_s1 + $0xa8] sm:$0xff]  ;;  %v574_v53 = vld [vmem:[%s5187_s1 + $0xb0] sm:$0xff] }
  0x25   :  { %v406_v13 = vsel %vm373_vm2, %v404_v44, %v405_v45  ;;  %v266_v14 = vrot.slane %v3639_v34, 3  ;;  %3011 = vmatpush1.bf16.msra.mxu1 %v3010_v60  ;;  %v3013_v18 = vpack.c.bf16 %v587_v57, %v586_v41  ;;  %v2981_v20 = vpack.c.bf16 %v571_v59, %v570_v58  ;;  %v557_v46 = vld [vmem:[%s5187_s1 + $0x28] sm:$0xff]  ;;  %v592_v60 = vld [vmem:[%s5187_s1 + $0x140] sm:$0xff] }
  0x26   :  { %v3297_v28 = vpack.i.bf16 %v116_v55, %v262_v56  ;;  %3012 = vmatprep.subr.bf16.mxu1 %v5196_v5  ;;  %v119_v33 = vsel %vm81_vm0, %v117_v63, %v118_v3  ;;  %v408_v36 = vsel %vm373_vm2, %v405_v45, %v407_v4  ;;  %2978 = vmatprep.subr.bf16.mxu0 %v2977_v10  ;;  %v556_v45 = vld [vmem:[%s5187_s1 + $0x20] sm:$0xff]  ;;  %v409_v55 = vrot.slane %v3623_v22, 5 }
  0x27   :  { %3283 = vrot.lane.b32.xlu0 %v3282_v37, %s3354_s25  ;;  %v3302_v37 = vpack.i.bf16 %v265_v8, %v406_v13  ;;  %v121_v38 = vsel %vm81_vm0, %v118_v3, %v120_v9  ;;  %2980 = vmatpush3.bf16.msra.mxu0 %v2979_v12  ;;  %v2983_v40 = vpack.c.bf16 %v555_v27, %v554_v21  ;;  %v410_v56 = vrot.slane %v3628_v25, 5  ;;  %v558_v8 = vld [vmem:[%s5187_s1 + $0x30] sm:$0xff]  ;;  %v559_v9 = vld [vmem:[%s5187_s1 + $0x38] sm:$0xff]  ;;  %v576_v12 = vld [vmem:[%s5187_s1 + $0xc0] sm:$0xff] }
  0x28   :  { %3288 = vrot.lane.b32.xlu1 %v3287_v43, %s3354_s25  ;;  %v267_v41 = vsel %vm227_vm1, %v264_v39, %v266_v14  ;;  %v3016_v42 = vpack.c.bf16 %v589_v29, %v588_v19  ;;  %v590_v43 = vld [vmem:[%s5187_s1 + $0x130] sm:$0xff]  ;;  %2982 = vmatprep.subr.bf16.mxu0 %v2981_v20  ;;  %v2985_v44 = vpack.c.bf16 %v573_v32, %v572_v31  ;;  %v591_v39 = vld [vmem:[%s5187_s1 + $0x138] sm:$0xff]  ;;  %vm462_vm3 = vcmask 1041408   ;;  %v577_v13 = vld [vmem:[%s5187_s1 + $0xc8] sm:$0xff] }
  0x29   :  { %3014 = vmatpush1.bf16.msra.mxu1 %v3013_v18  ;;  %v3307_v47 = vpack.i.bf16 %v408_v36, %v119_v33  ;;  %v463_v57 = vrot.slane %v3412_v0, 6  ;;  %v3312_v58 = vpack.i.bf16 %v121_v38, %v267_v41  ;;  %v2987_v59 = vpack.c.bf16 %v557_v46, %v556_v45  ;;  %v560_v31 = vld [vmem:[%s5187_s1 + $0x40] sm:$0xff]  ;;  %v561_v32 = vld [vmem:[%s5187_s1 + $0x48] sm:$0xff]  ;;  %v595_v33 = vld [vmem:[%s5187_s1 + $0x158] sm:$0xff] }
  0x2a   :  { %3015 = vmatprep.subr.bf16.mxu1 %v5196_v5  ;;  %v464_v63 = vrot.slane %v3417_v1, 6  ;;  %v412_v3 = vrot.slane %v3639_v34, 5  ;;  %v3019_v4 = vpack.c.bf16 %v591_v39, %v590_v43  ;;  %v466_v10 = vrot.slane %v3439_v11, 6  ;;  %v593_v34 = vld [vmem:[%s5187_s1 + $0x148] sm:$0xff]  ;;  %v578_v36 = vld [vmem:[%s5187_s1 + $0xd0] sm:$0xff]  ;;  %v596_v41 = vld [vmem:[%s5187_s1 + $0x160] sm:$0xff] }
  0x2b   :  { %3293 = vrot.lane.b32.xlu0 %v3292_v54, %s3354_s25  ;;  %v575_v54 = vld [vmem:[%s5187_s1 + $0xb8] sm:$0xff]  ;;  %2984 = vmatpush3.bf16.msra.mxu0 %v2983_v40  ;;  %vm503_vm4 = vcmask 523264   ;;  %v411_v18 = vsel %vm373_vm2, %v409_v55, %v410_v56  ;;  %v2991_v20 = vpack.c.bf16 %v559_v9, %v558_v8  ;;  %v3022_v27 = vpack.c.bf16 %v593_v34, %v592_v60  ;;  %v562_v43 = vld [vmem:[%s5187_s1 + $0x50] sm:$0xff]  ;;  %v597_v45 = vld [vmem:[%s5187_s1 + $0x168] sm:$0xff] }
  0x2c   :  { %3298 = vrot.lane.b32.xlu1 %v3297_v28, %s3354_s25  ;;  %2986 = vmatprep.subr.bf16.mxu0 %v2985_v44  ;;  %v2989_v25 = vpack.c.bf16 %v575_v54, %v574_v53  ;;  %v465_v14 = vsel %vm462_vm3, %v463_v57, %v464_v63  ;;  %v3764_v19 = vsel %vm462_vm3, %v464_v63, %v466_v10  ;;  %v594_v28 = vld [vmem:[%s5187_s1 + $0x150] sm:$0xff]  ;;  %v563_v44 = vld [vmem:[%s5187_s1 + $0x58] sm:$0xff]  ;;  %v580_v46 = vld [vmem:[%s5187_s1 + $0xe0] sm:$0xff]  ;;  %vm170_vm5 = vcmask 1045504  }
  0x2d   :  { %3017 = vmatpush1.bf16.msra.mxu1 %v3016_v42  ;;  %2474 = vmatprep.mubr.msk.f32.mxu1 %vm503_vm4, %v465_v14  ;;  %v413_v21 = vsel %vm373_vm2, %v410_v56, %v412_v3  ;;  %v2993_v29 = vpack.c.bf16 %v577_v13, %v576_v12  ;;  %v2995_v38 = vpack.c.bf16 %v561_v32, %v560_v31  ;;  %v598_v54 = vld [vmem:[%s5187_s1 + $0x170] sm:$0xff]  ;;  %v564_v56 = vld [vmem:[%s5187_s1 + $0x60] sm:$0xff]  ;;  %v565_v57 = vld [vmem:[%s5187_s1 + $0x68] sm:$0xff]  ;;  %vm316_vm6 = vcmask 1043456  }
  0x2e   :  { %3018 = vmatprep.subr.bf16.mxu1 %v5196_v5  ;;  %v3025_v40 = vpack.c.bf16 %v595_v33, %v594_v28  ;;  %v2999_v39 = vpack.c.bf16 %v563_v44, %v562_v43  ;;  %v3028_v53 = vpack.c.bf16 %v597_v45, %v596_v41  ;;  %v583_v63 = vld [vmem:[%s5187_s1 + $0xf8] sm:$0xff]  ;;  %v3003_v3 = vpack.c.bf16 %v565_v57, %v564_v56  ;;  %v600_v9 = vld [vmem:[%s5187_s1 + $0x180] sm:$0xff]  ;;  %v601_v10 = vld [vmem:[%s5187_s1 + $0x188] sm:$0xff] }
  0x2f   :  { %3303 = vrot.lane.b32.xlu0 %v3302_v37, %s3354_s25  ;;  %2988 = vmatpush3.bf16.msra.mxu0 %v2987_v59  ;;  %v579_v37 = vld [vmem:[%s5187_s1 + $0xd8] sm:$0xff]  ;;  %v582_v59 = vld [vmem:[%s5187_s1 + $0xf0] sm:$0xff]  ;;  %v3034_v12 = vpack.c.bf16 %v601_v10, %v600_v9  ;;  %v605_v28 = vld [vmem:[%s5187_s1 + $0x1a8] sm:$0xff]  ;;  %v171_v41 = vrot.slane %v3412_v0, 2  ;;  %v174_v43 = vrot.slane %v3439_v11, 2  ;;  %v317_v44 = vrot.slane %v3412_v0, 4 }
  0x30   :  { %3308 = vrot.lane.b32.xlu1 %v3307_v47, %s3354_s25  ;;  %2990 = vmatprep.subr.bf16.mxu0 %v2989_v25  ;;  %v2997_v42 = vpack.c.bf16 %v579_v37, %v578_v36  ;;  %v581_v47 = vld [vmem:[%s5187_s1 + $0xe8] sm:$0xff]  ;;  %v3005_v60 = vpack.c.bf16 %v583_v63, %v582_v59  ;;  %v566_v25 = vld [vmem:[%s5187_s1 + $0x70] sm:$0xff]  ;;  %v567_v8 = vld [vmem:[%s5187_s1 + $0x78] sm:$0xff]  ;;  %v318_v45 = vrot.slane %v3417_v1, 4  ;;  %v323_v56 = vrot.slane %v3431_v7, 4 }
  0x31   :  { %3020 = vmatpush1.bf16.msra.mxu1 %v3019_v4  ;;  %v3001_v55 = vpack.c.bf16 %v581_v47, %v580_v46  ;;  %v3007_v34 = vpack.c.bf16 %v567_v8, %v566_v25  ;;  %v602_v13 = vld [vmem:[%s5187_s1 + $0x190] sm:$0xff]  ;;  %v603_v14 = vld [vmem:[%s5187_s1 + $0x198] sm:$0xff]  ;;  %v1266_v36 = vld [vmem:[%s5189_s3 + $0x180] sm:$0xff]  ;;  %v176_v46 = vrot.slane %v3422_v2, 2  ;;  %v177_v47 = vrot.slane %v3431_v7, 2 }
  0x32   :  { %3021 = vmatprep.subr.bf16.mxu1 %v5196_v5  ;;  %v606_v32 = vld [vmem:[%s5187_s1 + $0x1b0] sm:$0xff]  ;;  %v607_v33 = vld [vmem:[%s5187_s1 + $0x1b8] sm:$0xff]  ;;  %v1267_v37 = vld [vmem:[%s5189_s3 + $0x188] sm:$0xff]  ;;  %v179_v57 = vrot.slane %v3465_v26, 2  ;;  %vm969_vm7 = vcmask 1040384   ;;  %vm3356_vm10 = vmmov 0  }
  0x33   :  { %3313 = vrot.lane.b32.xlu0 %v3312_v58, %s3354_s25  ;;  %2992 = vmatpush3.bf16.msra.mxu0 %v2991_v20  ;;  %v599_v58 = vld [vmem:[%s5187_s1 + $0x178] sm:$0xff]  ;;  %v1234_v20 = vld [vmem:[%s5189_s3 + $0x80] sm:$0xff]  ;;  %v1251_v8 = vld [vmem:[%s5189_s3 + $0x108] sm:$0xff]  ;;  %vm2372_vm13 = vcmask 1041409   ;;  %vm2374_vm14 = vcmask 1042434   ;;  %vm2376_vm15 = vcmask 1043459  }
  0x34   :  { %442 = vrot.lane.b32.xlu1 %v411_v18, %s3354_s25  ;;  %2994 = vmatprep.subr.bf16.mxu0 %v2993_v29  ;;  %v3031_v4 = vpack.c.bf16 %v599_v58, %v598_v54  ;;  %v3037_v18 = vpack.c.bf16 %v603_v14, %v602_v13  ;;  %v469_v54 = vrot.slane %v3431_v7, 6  ;;  %v1218_v59 = vld [vmem:[%s5189_s3] sm:$0xff]  ;;  %v471_v13 = vrot.slane %v3465_v26, 6  ;;  %vm4536_vm8 = vmneg %vm969_vm7 }
  0x35   :  { %3023 = vmatpush1.bf16.msra.mxu1 %v3022_v27  ;;  %v604_v27 = vld [vmem:[%s5187_s1 + $0x1a0] sm:$0xff]  ;;  %vm4931_vm9 = vmneg %vm462_vm3  ;;  %vm2382_vm2 = vcmask 1046534  }
  0x36   :  { %3024 = vmatprep.subr.bf16.mxu1 %v5196_v5  ;;  %v3040_v31 = vpack.c.bf16 %v605_v28, %v604_v27  ;;  %v1250_v25 = vld [vmem:[%s5189_s3 + $0x100] sm:$0xff]  ;;  %v1236_v27 = vld [vmem:[%s5189_s3 + $0x90] sm:$0xff]  ;;  %v1237_v28 = vld [vmem:[%s5189_s3 + $0x98] sm:$0xff] }
  0x37   :  { %444 = vrot.lane.b32.xlu0 %v413_v21, %s3354_s25  ;;  %2996 = vmatpush3.bf16.msra.mxu0 %v2995_v38  ;;  %v1235_v21 = vld [vmem:[%s5189_s3 + $0x88] sm:$0xff]  ;;  %v3043_v38 = vpack.c.bf16 %v607_v33, %v606_v32  ;;  %v473_v32 = vrot.slane %v3448_v16, 6 }
  0x38   :  { %2998 = vmatprep.subr.bf16.mxu0 %v2997_v42  ;;  %v3045_v29 = vpack.c.bf16 %v1235_v21, %v1234_v20  ;;  %v172_v42 = vrot.slane %v3417_v1, 2  ;;  %v3916_v21 = vsel %vm170_vm5, %v177_v47, %v179_v57 }
  0x39   :  { %3026 = vmatpush1.bf16.msra.mxu1 %v3025_v40  ;;  %v3077_v40 = vpack.c.bf16 %v1267_v37, %v1266_v36  ;;  %v3079_v36 = vpack.c.bf16 %v1251_v8, %v1250_v25  ;;  %v1268_v37 = vld [vmem:[%s5189_s3 + $0x190] sm:$0xff]  ;;  %v1239_v25 = vld [vmem:[%s5189_s3 + $0xa8] sm:$0xff] }
  0x3a   :  { %3027 = vmatprep.subr.bf16.mxu1 %v5196_v5  ;;  %v173_v58 = vsel %vm170_vm5, %v171_v41, %v172_v42  ;;  %v175_v63 = vsel %vm170_vm5, %v172_v42, %v174_v43 }
  0x3b   :  { %3000 = vmatpush3.bf16.msra.mxu0 %v2999_v39  ;;  %v320_v39 = vrot.slane %v3439_v11, 4  ;;  %v319_v11 = vsel %vm316_vm6, %v317_v44, %v318_v45  ;;  %v3943_v44 = vld [vmem:[%s5189_s3 + $0x18] sm:$0xff] }
  0x3c   :  { %3002 = vmatprep.subr.bf16.mxu0 %v3001_v55  ;;  %v322_v55 = vrot.slane %v3422_v2, 4 }
  0x3d   :  { %3029 = vmatpush1.bf16.msra.mxu1 %v3028_v53  ;;  %v468_v53 = vrot.slane %v3422_v2, 6 }
  0x3e   :  { %3030 = vmatprep.subr.bf16.mxu1 %v5196_v5  ;;  %v3913_v20 = vsel %vm316_vm6, %v322_v55, %v323_v56 }
  0x3f   :  { %3004 = vmatpush3.bf16.msra.mxu0 %v3003_v3  ;;  %v178_v3 = vsel %vm170_vm5, %v176_v46, %v177_v47  ;;  %v3907_v10 = vsel %vm462_vm3, %v468_v53, %v469_v54  ;;  %v3951_v47 = vsel %vm462_vm3, %v469_v54, %v471_v13  ;;  %v1252_v53 = vld [vmem:[%s5189_s3 + $0x110] sm:$0xff]  ;;  %v1238_v54 = vld [vmem:[%s5189_s3 + $0xa0] sm:$0xff] }
  0x40   :  { %3006 = vmatprep.subr.bf16.mxu0 %v3005_v60  ;;  %v1219_v60 = vld [vmem:[%s5189_s3 + $0x8] sm:$0xff] }
  0x41   :  { %3032 = vmatpush1.bf16.msra.mxu1 %v3031_v4  ;;  %v3895_v4 = vsel %vm316_vm6, %v318_v45, %v320_v39  ;;  %v3047_v33 = vpack.c.bf16 %v1219_v60, %v1218_v59  ;;  %v3049_v39 = vpack.c.bf16 %v1237_v28, %v1236_v27  ;;  %v1253_v60 = vld [vmem:[%s5189_s3 + $0x118] sm:$0xff] }
  0x42   :  { %3033 = vmatprep.subr.bf16.mxu1 %v5196_v5 }
  0x43   :  { %3008 = vmatpush3.bf16.msra.mxu0 %v3007_v34  ;;  %v181_v34 = vrot.slane %v3448_v16, 2 }
  0x44   :  { %3046 = vmatprep.subr.bf16.mxu0 %v3045_v29 }
  0x45   :  { %3035 = vmatpush1.bf16.msra.mxu1 %v3034_v12  ;;  %v182_v12 = vrot.slane %v3453_v17, 2 }
  0x46   :  { %3036 = vmatprep.subr.bf16.mxu1 %v5196_v5 }
  0x47   :  { %v3948_v46 = vsel %vm170_vm5, %v181_v34, %v182_v12 }
  0x49   :  { %3038 = vmatpush1.bf16.msra.mxu1 %v3037_v18 }
  0x4a   :  { %3039 = vmatprep.subr.bf16.mxu1 %v5196_v5 }
  0x4d   :  { %3041 = vmatpush1.bf16.msra.mxu1 %v3040_v31  ;;  %v325_v31 = vrot.slane %v3465_v26, 4  ;;  %v3938_v26 = vld [vmem:[%s5189_s3 + $0x10] sm:$0xff] }
  0x4e   :  { %3042 = vmatprep.subr.bf16.mxu1 %v5196_v5  ;;  %v3051_v13 = vpack.c.bf16 %v3943_v44, %v3938_v26  ;;  %v1240_v26 = vld [vmem:[%s5189_s3 + $0xb0] sm:$0xff]  ;;  %v1241_v44 = vld [vmem:[%s5189_s3 + $0xb8] sm:$0xff]  ;;  %v4582_v5 = vld [vmem:[%s5191_s5 + $0x40] sm:$0xff] }
  0x4f   :  { %v3969_v34 = vsel %vm316_vm6, %v323_v56, %v325_v31  ;;  %v327_v31 = vrot.slane %v3448_v16, 4 }
  0x51   :  { %3044 = vmatpush1.bf16.msra.mxu1 %v3043_v38  ;;  %v1269_v38 = vld [vmem:[%s5189_s3 + $0x198] sm:$0xff] }
  0x52   :  { %3078 = vmatprep.subr.bf16.mxu1 %v3077_v40  ;;  %v3081_v59 = vpack.c.bf16 %v1269_v38, %v1268_v37  ;;  %v3083_v37 = vpack.c.bf16 %v1253_v60, %v1252_v53  ;;  %v3053_v38 = vpack.c.bf16 %v1239_v25, %v1238_v54  ;;  %v187_v54 = vrot.slane %v3500_v49, 2 }
  0x53   :  { %v476_v25 = vrot.slane %v3477_v35, 6 }
  0x79   :  { %v3204_v9 = vpop.permute.xlu0 %3203 }
  0x7a   :  { %v3206_v14 = vunpack.i.h.bf16 %v3204_v9  ;;  %v3205_v18 = vunpack.i.l.bf16 %v3204_v9  ;;  %v3214_v29 = vpop.permute.xlu1 %3213 }
  0x7b   :  { %v3216_v40 = vunpack.i.h.bf16 %v3214_v29  ;;  %v3215_v41 = vunpack.i.l.bf16 %v3214_v29 }
  0x7c   :  { %v520_v42 = vsel %vm503_vm4, %v173_v58, %v3205_v18  ;;  %v504_v43 = vsel %vm503_vm4, %v3412_v0, %v3206_v14  ;;  %v474_v0 = vrot.slane %v3453_v17, 6  ;;  %v1270_v14 = vld [vmem:[%s5189_s3 + $0x1a0] sm:$0xff]  ;;  %v1271_v18 = vld [vmem:[%s5189_s3 + $0x1a8] sm:$0xff] }
  0x7d   :  { %v3209_v45 = vpop.permute.xlu0 %3208  ;;  %711 = vmatprep.mubr.f32.mxu0 %v520_v42  ;;  %v536_v58 = vsel %vm503_vm4, %v319_v11, %v3215_v41  ;;  %v522_v9 = vsel %vm503_vm4, %v178_v3, %v3216_v40  ;;  %v184_v11 = vrot.slane %v3477_v35, 2  ;;  %v186_v41 = vrot.slane %v3495_v48, 2 }
  0x7e   :  { %v3211_v55 = vunpack.i.h.bf16 %v3209_v45  ;;  %v3210_v57 = vunpack.i.l.bf16 %v3209_v45  ;;  %712 = vmatmul.mubr.f32.vlgmr.msra.gmra.mrb[0].mxu0 %v504_v43  ;;  %v3219_v8 = vpop.permute.xlu1 %3218  ;;  %857 = vmatmul.mubr.f32.vlgmr.msra.gmra.mrb[0].mxu1 %v536_v58  ;;  %v3085_v42 = vpack.c.bf16 %v1271_v18, %v1270_v14  ;;  %v1255_v43 = vld [vmem:[%s5189_s3 + $0x128] sm:$0xff]  ;;  %v4017_v53 = vsel %vm462_vm3, %v473_v32, %v474_v0 }
  0x7f   :  { %3048 = vmatpush3.bf16.msra.mxu0 %v3047_v33  ;;  %v3221_v27 = vunpack.i.h.bf16 %v3219_v8  ;;  %v3220_v28 = vunpack.i.l.bf16 %v3219_v8  ;;  %2475 = vmatprep.mubr.msk.f32.mxu1 %vm503_vm4, %v3764_v19  ;;  %v328_v33 = vrot.slane %v3453_v17, 4  ;;  %v3996_v19 = vld [vmem:[%s5189_s3 + $0x120] sm:$0xff] }
  0x80   :  { %v521_v3 = vsel %vm503_vm4, %v175_v63, %v3210_v57  ;;  %v505_v56 = vsel %vm503_vm4, %v3417_v1, %v3211_v55  ;;  %3080 = vmatpush3.bf16.msra.mxu1 %v3079_v36  ;;  %3050 = vmatprep.subr.bf16.mxu0 %v3049_v39  ;;  %v1222_v63 = vld [vmem:[%s5189_s3 + $0x20] sm:$0xff]  ;;  %v1223_v1 = vld [vmem:[%s5189_s3 + $0x28] sm:$0xff]  ;;  %v4022_v55 = vsel %vm170_vm5, %v182_v12, %v184_v11  ;;  %v1272_v57 = vld [vmem:[%s5189_s3 + $0x1b0] sm:$0xff] }
  0x81   :  { %716 = vmatprep.mubr.f32.mxu0 %v521_v3  ;;  %v3224_v29 = vpop.permute.xlu0 %3223  ;;  %v537_v36 = vsel %vm503_vm4, %v3895_v4, %v3221_v27  ;;  %3082 = vmatprep.subr.bf16.mxu1 %v3081_v59  ;;  %v506_v39 = vsel %vm503_vm4, %v3422_v2, %v3220_v28  ;;  %v1273_v2 = vld [vmem:[%s5189_s3 + $0x1b8] sm:$0xff]  ;;  %v3055_v60 = vpack.c.bf16 %v1223_v1, %v1222_v63  ;;  %v1224_v11 = vld [vmem:[%s5189_s3 + $0x30] sm:$0xff]  ;;  %v1242_v3 = vld [vmem:[%s5189_s3 + $0xc0] sm:$0xff] }
  0x82   :  { %717 = vmatmul.mubr.f32.gmra.mrb[2].mxu0 %v505_v56  ;;  %v3225_v40 = vunpack.i.l.bf16 %v3224_v29  ;;  %v3229_v45 = vpop.permute.xlu1 %3228  ;;  %862 = vmatmul.mubr.f32.gmra.mrb[2].mxu1 %v537_v36  ;;  %v3226_v4 = vunpack.i.h.bf16 %v3224_v29  ;;  %v3087_v8 = vpack.c.bf16 %v1255_v43, %v3996_v19  ;;  %v329_v18 = vsel %vm316_vm6, %v327_v31, %v328_v33  ;;  %v1257_v28 = vld [vmem:[%s5189_s3 + $0x138] sm:$0xff]  ;;  %v1243_v56 = vld [vmem:[%s5189_s3 + $0xc8] sm:$0xff]  ;;  %v1274_v63 = vld [vmem:[%s5189_s3 + $0x1c0] sm:$0xff] }
  0x83   :  { %721 = vmatprep.mubr.f32.mxu0 %v522_v9  ;;  %v3231_v58 = vunpack.i.h.bf16 %v3229_v45  ;;  %v3230_v59 = vunpack.i.l.bf16 %v3229_v45  ;;  %2476 = vmatprep.mubr.msk.f32.mxu1 %vm503_vm4, %v3907_v10  ;;  %v3057_v9 = vpack.c.bf16 %v1241_v44, %v1240_v26  ;;  %v1225_v10 = vld [vmem:[%s5189_s3 + $0x38] sm:$0xff]  ;;  %v3089_v27 = vpack.c.bf16 %v1273_v2, %v1272_v57  ;;  %v1275_v1 = vld [vmem:[%s5189_s3 + $0x1c8] sm:$0xff]  ;;  %v1258_v44 = vld [vmem:[%s5189_s3 + $0x140] sm:$0xff] }
  0x84   :  { %v523_v32 = vsel %vm503_vm4, %v3916_v21, %v3225_v40  ;;  %3052 = vmatpush3.bf16.msra.mxu0 %v3051_v13  ;;  %3084 = vmatpush3.bf16.msra.mxu1 %v3083_v37  ;;  %v4046_v21 = vld [vmem:[%s5189_s3 + $0x130] sm:$0xff]  ;;  %v507_v29 = vsel %vm503_vm4, %v3431_v7, %v3226_v4  ;;  %v330_v37 = vrot.slane %v3477_v35, 4  ;;  %v3059_v36 = vpack.c.bf16 %v1225_v10, %v1224_v11  ;;  %v4084_v40 = vld [vmem:[%s5189_s3 + $0x40] sm:$0xff]  ;;  %v1259_v57 = vld [vmem:[%s5189_s3 + $0x148] sm:$0xff] }
  0x85   :  { %v3234_v12 = vpop.permute.xlu0 %3233  ;;  %3054 = vmatprep.subr.bf16.mxu0 %v3053_v38  ;;  %v538_v13 = vsel %vm503_vm4, %v3913_v20, %v3230_v59  ;;  %3086 = vmatprep.subr.bf16.mxu1 %v3085_v42  ;;  %v478_v38 = vrot.slane %v3495_v48, 6  ;;  %v524_v19 = vsel %vm503_vm4, %v3948_v46, %v3231_v58  ;;  %v4089_v42 = vld [vmem:[%s5189_s3 + $0x48] sm:$0xff]  ;;  %v479_v43 = vrot.slane %v3500_v49, 6  ;;  %v1244_v2 = vld [vmem:[%s5189_s3 + $0xd0] sm:$0xff]  ;;  %v1245_v58 = vld [vmem:[%s5189_s3 + $0xd8] sm:$0xff] }
  0x86   :  { %722 = vmatmul.mubr.f32.gmra.mrb[4].mxu0 %v506_v39  ;;  %v3236_v14 = vunpack.i.h.bf16 %v3234_v12  ;;  %867 = vmatmul.mubr.f32.gmra.mrb[4].mxu1 %v538_v13  ;;  %v3235_v20 = vunpack.i.l.bf16 %v3234_v12  ;;  %v4064_v31 = vpop.permute.xlu1 %3238  ;;  %v3061_v26 = vpack.c.bf16 %v1243_v56, %v1242_v3  ;;  %v477_v4 = vsel %vm462_vm3, %v474_v0, %v476_v25  ;;  %v1276_v25 = vld [vmem:[%s5189_s3 + $0x1d0] sm:$0xff]  ;;  %v1229_v13 = vld [vmem:[%s5189_s3 + $0x58] sm:$0xff] }
  0x87   :  { %726 = vmatprep.mubr.f32.mxu0 %v523_v32  ;;  %2477 = vmatprep.mubr.msk.f32.mxu1 %vm503_vm4, %v3951_v47  ;;  %v3240_v7 = vunpack.i.l.bf16 %v4064_v31  ;;  %v188_v47 = vsel %vm170_vm5, %v186_v41, %v187_v54  ;;  %v189_v39 = vrot.slane %v3529_v6, 2  ;;  %v3093_v41 = vpack.c.bf16 %v1275_v1, %v1274_v63 }
  0x88   :  { %v539_v35 = vsel %vm503_vm4, %v3969_v34, %v3236_v14  ;;  %3056 = vmatpush3.bf16.msra.mxu0 %v3055_v60  ;;  %3088 = vmatpush3.bf16.msra.mxu1 %v3087_v8  ;;  %v3091_v34 = vpack.c.bf16 %v1257_v28, %v4046_v21  ;;  %v3241_v59 = vunpack.i.h.bf16 %v4064_v31  ;;  %v508_v0 = vsel %vm503_vm4, %v3448_v16, %v3235_v20  ;;  %v1277_v8 = vld [vmem:[%s5189_s3 + $0x1d8] sm:$0xff]  ;;  %v1228_v21 = vld [vmem:[%s5189_s3 + $0x50] sm:$0xff] }
  0x89   :  { %v3244_v46 = vpop.permute.xlu0 %3243  ;;  %3058 = vmatprep.subr.bf16.mxu0 %v3057_v9  ;;  %3090 = vmatprep.subr.bf16.mxu1 %v3089_v27  ;;  %v332_v60 = vrot.slane %v3495_v48, 4  ;;  %v3063_v12 = vpack.c.bf16 %v4089_v42, %v4084_v40  ;;  %v525_v16 = vsel %vm503_vm4, %v4022_v55, %v3240_v7  ;;  %v333_v27 = vrot.slane %v3500_v49, 4  ;;  %v1261_v20 = vld [vmem:[%s5189_s3 + $0x158] sm:$0xff]  ;;  %v3318_v49 = vld [vmem:[%s5186_s0 + $0x50] sm:$0xff] }
  0x8a   :  { %727 = vmatmul.mubr.f32.gmra.mrb[6].mxu0 %v507_v29  ;;  %v3245_v45 = vunpack.i.l.bf16 %v3244_v46  ;;  %872 = vmatmul.mubr.f32.gmra.mrb[6].mxu1 %v539_v35  ;;  %v3249_v32 = vpop.permute.xlu1 %3248  ;;  %v3246_v9 = vunpack.i.h.bf16 %v3244_v46  ;;  %v3095_v55 = vpack.c.bf16 %v1259_v57, %v1258_v44  ;;  %v480_v28 = vsel %vm462_vm3, %v478_v38, %v479_v43  ;;  %v3317_v31 = vld [vmem:[%s5186_s0 + $0x38] sm:$0xff] }
  0x8b   :  { %731 = vmatprep.mubr.f32.mxu0 %v524_v19  ;;  %2478 = vmatprep.mubr.msk.f32.mxu1 %vm503_vm4, %v4017_v53  ;;  %v3251_v11 = vunpack.i.h.bf16 %v3249_v32  ;;  %v331_v53 = vsel %vm316_vm6, %v328_v33, %v330_v37  ;;  %v190_v3 = vsel %vm170_vm5, %v187_v54, %v189_v39  ;;  %v191_v56 = vrot.slane %v3514_v61, 2  ;;  %v1260_v33 = vld [vmem:[%s5189_s3 + $0x150] sm:$0xff] }
  0x8c   :  { %v540_v10 = vsel %vm503_vm4, %v329_v18, %v3245_v45  ;;  %3060 = vmatpush3.bf16.msra.mxu0 %v3059_v36  ;;  %3092 = vmatpush3.bf16.msra.mxu1 %v3091_v34  ;;  %v3065_v18 = vpack.c.bf16 %v1245_v58, %v1244_v2  ;;  %v3097_v17 = vpack.c.bf16 %v1277_v8, %v1276_v25  ;;  %v3250_v29 = vunpack.i.l.bf16 %v3249_v32 }
  0x8d   :  { %v4135_v14 = vpop.permute.xlu0 %3253  ;;  %3062 = vmatprep.subr.bf16.mxu0 %v3061_v26  ;;  %3094 = vmatprep.subr.bf16.mxu1 %v3093_v41  ;;  %v509_v54 = vsel %vm503_vm4, %v3317_v31, %v3241_v59  ;;  %v192_v38 = vrot.slane %v3519_v62, 2  ;;  %v3067_v63 = vpack.c.bf16 %v1229_v13, %v1228_v21  ;;  %v526_v1 = vsel %vm503_vm4, %v188_v47, %v3246_v9 }
  0x8e   :  { %732 = vmatmul.mubr.f32.gmra.mrb[8].mxu0 %v508_v0  ;;  %877 = vmatmul.mubr.f32.gmra.mrb[8].mxu1 %v540_v10  ;;  %v3259_v37 = vpop.permute.xlu1 %3258  ;;  %v3255_v7 = vunpack.i.l.bf16 %v4135_v14  ;;  %v541_v35 = vsel %vm503_vm4, %v331_v53, %v3251_v11  ;;  %v334_v40 = vsel %vm316_vm6, %v332_v60, %v333_v27  ;;  %v481_v42 = vrot.slane %v3529_v6, 6 }
  0x8f   :  { %736 = vmatprep.mubr.f32.mxu0 %v525_v16  ;;  %2479 = vmatprep.mubr.msk.f32.mxu1 %vm503_vm4, %v477_v4  ;;  %v3260_v19 = vunpack.i.l.bf16 %v3259_v37  ;;  %v335_v46 = vrot.slane %v3529_v6, 4  ;;  %v3099_v34 = vpack.c.bf16 %v1261_v20, %v1260_v33  ;;  %v483_v47 = vrot.slane %v3514_v61, 6 }
  0x90   :  { %3064 = vmatpush3.bf16.msra.mxu0 %v3063_v12  ;;  %3096 = vmatpush3.bf16.msra.mxu1 %v3095_v55  ;;  %v484_v26 = vrot.slane %v3519_v62, 6  ;;  %v3256_v44 = vunpack.i.h.bf16 %v4135_v14  ;;  %v510_v45 = vsel %vm503_vm4, %v3495_v48, %v3250_v29  ;;  %v193_v4 = vsel %vm170_vm5, %v191_v56, %v192_v38 }
  0x91   :  { %v3264_v36 = vpop.permute.xlu0 %3263  ;;  %3066 = vmatprep.subr.bf16.mxu0 %v3065_v18  ;;  %3098 = vmatprep.subr.bf16.mxu1 %v3097_v17  ;;  %v194_v6 = vrot.slane %v3546_v23, 2  ;;  %v3261_v41 = vunpack.i.h.bf16 %v3259_v37  ;;  %v527_v2 = vsel %vm503_vm4, %v190_v3, %v3255_v7  ;;  %v542_v58 = vsel %vm503_vm4, %v334_v40, %v3260_v19  ;;  %v3319_v3 = vld [vmem:[%s5186_s0 + $0x60] sm:$0xff] }
  0x92   :  { %737 = vmatmul.mubr.f32.gmra.mrb[10].mxu0 %v509_v54  ;;  %882 = vmatmul.mubr.f32.gmra.mrb[10].mxu1 %v541_v35  ;;  %v4172_v39 = vpop.permute.xlu1 %3268  ;;  %v3266_v57 = vunpack.i.h.bf16 %v3264_v36  ;;  %v482_v59 = vsel %vm462_vm3, %v479_v43, %v481_v42  ;;  %v336_v0 = vsel %vm316_vm6, %v333_v27, %v335_v46  ;;  %v337_v32 = vrot.slane %v3514_v61, 4  ;;  %v3322_v35 = vld [vmem:[%s5186_s0 + $0x68] sm:$0xff] }
  0x93   :  { %741 = vmatprep.mubr.f32.mxu0 %v526_v1  ;;  %2480 = vmatprep.mubr.msk.f32.mxu1 %vm503_vm4, %v480_v28  ;;  %v338_v60 = vrot.slane %v3519_v62, 4  ;;  %v485_v12 = vsel %vm462_vm3, %v483_v47, %v484_v26  ;;  %v3265_v25 = vunpack.i.l.bf16 %v3264_v36  ;;  %v511_v43 = vsel %vm503_vm4, %v3318_v49, %v3256_v44  ;;  %v3323_v44 = vld [vmem:[%s5186_s0 + $0x88] sm:$0x3f] }
  0x94   :  { %3068 = vmatpush3.bf16.msra.mxu0 %v3067_v63  ;;  %3100 = vmatpush3.bf16.msra.mxu1 %v3099_v34  ;;  %v195_v9 = vsel %vm170_vm5, %v192_v38, %v194_v6  ;;  %v196_v61 = vrot.slane %v3551_v24, 2  ;;  %v528_v62 = vsel %vm503_vm4, %v193_v4, %v3261_v41  ;;  %v3270_v11 = vunpack.i.l.bf16 %v4172_v39  ;;  %v3321_v38 = vld [vmem:[%s5186_s0 + $0x80] sm:$0xff]  ;;  %v3324_v6 = vld [vmem:[%s5186_s0 + $0x90] sm:$0xff] }
  0x95   :  { %v3274_v48 = vpop.permute.xlu0 %3273  ;;  %v543_v10 = vsel %vm503_vm4, %v336_v0, %v3266_v57  ;;  %v339_v21 = vsel %vm316_vm6, %v337_v32, %v338_v60  ;;  %v197_v13 = vrot.slane %v3560_v30, 2  ;;  %v486_v14 = vrot.slane %v3546_v23, 6 }
  0x96   :  { %742 = vmatmul.mubr.f32.gmra.mrb[12].mxu0 %v510_v45  ;;  %887 = vmatmul.mubr.f32.gmra.mrb[12].mxu1 %v542_v58  ;;  %v4189_v8 = vpop.permute.xlu1 %3278  ;;  %v3275_v16 = vunpack.i.l.bf16 %v3274_v48  ;;  %v340_v27 = vrot.slane %v3546_v23, 4  ;;  %v488_v55 = vrot.slane %v3551_v24, 6  ;;  %v489_v18 = vrot.slane %v3560_v30, 6  ;;  %v3320_v23 = vld [vmem:[%s5186_s0 + $0x78] sm:$0xff] }
  0x97   :  { %746 = vmatprep.mubr.f32.mxu0 %v527_v2  ;;  %2481 = vmatprep.mubr.msk.f32.mxu1 %vm503_vm4, %v482_v59  ;;  %v3271_v28 = vunpack.i.h.bf16 %v4172_v39  ;;  %v512_v56 = vsel %vm503_vm4, %v3319_v3, %v3265_v25  ;;  %v199_v17 = vrot.slane %v3591_v52, 2  ;;  %v342_v33 = vrot.slane %v3320_v23, 4  ;;  %v3325_v59 = vld [vmem:[%s5186_s0 + $0x98] sm:$0xff] }
  0x98   :  { %v3276_v24 = vunpack.i.h.bf16 %v3274_v48  ;;  %v3281_v30 = vunpack.i.h.bf16 %v4189_v8  ;;  %v529_v20 = vsel %vm503_vm4, %v195_v9, %v3270_v11  ;;  %v544_v29 = vsel %vm503_vm4, %v339_v21, %v3275_v16  ;;  %v4265_v16 = vld [vmem:[%s5186_s0 + $0xb0] sm:$0xff]  ;;  %v3327_v21 = vld [vmem:[%s5186_s0 + $0xa0] sm:$0x3f] }
  0x99   :  { %v4200_v53 = vpop.permute.xlu0 %3283  ;;  %v198_v31 = vsel %vm170_vm5, %v196_v61, %v197_v13  ;;  %v487_v54 = vsel %vm462_vm3, %v484_v26, %v486_v14  ;;  %v341_v52 = vsel %vm316_vm6, %v338_v60, %v340_v27  ;;  %v343_v63 = vrot.slane %v3321_v38, 4 }
  0x9a   :  { %747 = vmatmul.mubr.f32.gmra.mrb[14].mxu0 %v511_v43  ;;  %892 = vmatmul.mubr.f32.gmra.mrb[14].mxu1 %v543_v10  ;;  %v3289_v37 = vpop.permute.xlu1 %3288  ;;  %v201_v1 = vrot.slane %v3581_v50, 2  ;;  %v202_v19 = vrot.slane %v3586_v51, 2  ;;  %v3280_v7 = vunpack.i.l.bf16 %v4189_v8  ;;  %v513_v36 = vsel %vm503_vm4, %v3322_v35, %v3271_v28 }
  0x9b   :  { %751 = vmatprep.mubr.f32.mxu0 %v528_v62  ;;  %2482 = vmatprep.mubr.msk.f32.mxu1 %vm503_vm4, %v485_v12  ;;  %v490_v40 = vsel %vm462_vm3, %v488_v55, %v489_v18  ;;  %v530_v46 = vsel %vm503_vm4, %v198_v31, %v3276_v24  ;;  %v3290_v50 = vunpack.i.l.bf16 %v3289_v37  ;;  %v3285_v51 = vunpack.i.l.bf16 %v4200_v53 }
  0x9c   :  { %v545_v34 = vsel %vm503_vm4, %v341_v52, %v3281_v30  ;;  %v200_v47 = vsel %vm170_vm5, %v197_v13, %v199_v17  ;;  %v344_v26 = vsel %vm316_vm6, %v342_v33, %v343_v63  ;;  %v491_v45 = vrot.slane %v3323_v44, 6  ;;  %v3328_v17 = vld [vmem:[%s5186_s0 + $0xb8] sm:$0x3f]  ;;  %v3329_v33 = vld [vmem:[%s5186_s0 + $0xa8] sm:$0xff] }
  0x9d   :  { %v4232_v42 = vpop.permute.xlu0 %3293  ;;  %v345_v4 = vrot.slane %v3323_v44, 4  ;;  %v203_v39 = vsel %vm170_vm5, %v201_v1, %v202_v19  ;;  %v493_v41 = vrot.slane %v3324_v6, 6  ;;  %v3286_v57 = vunpack.i.h.bf16 %v4200_v53 }
  0x9e   :  { %752 = vmatmul.mubr.f32.gmra.mrb[16].mxu0 %v512_v56  ;;  %897 = vmatmul.mubr.f32.gmra.mrb[16].mxu1 %v544_v29  ;;  %v514_v2 = vsel %vm503_vm4, %v3320_v23, %v3280_v7  ;;  %v3299_v58 = vpop.permute.xlu1 %3298  ;;  %v494_v48 = vrot.slane %v3325_v59, 6  ;;  %v204_v0 = vrot.slane %v3614_v15, 2  ;;  %v3291_v32 = vunpack.i.h.bf16 %v3289_v37 }
  0x9f   :  { %756 = vmatprep.mubr.f32.mxu0 %v529_v20  ;;  %2483 = vmatprep.mubr.msk.f32.mxu1 %vm503_vm4, %v487_v54  ;;  %v3296_v60 = vunpack.i.h.bf16 %v4232_v42  ;;  %v531_v12 = vsel %vm503_vm4, %v200_v47, %v3285_v51  ;;  %v546_v25 = vsel %vm503_vm4, %v344_v26, %v3290_v50  ;;  %v492_v49 = vsel %vm462_vm3, %v489_v18, %v491_v45 }
  0xa0   :  { %v346_v8 = vsel %vm316_vm6, %v343_v63, %v345_v4  ;;  %v347_v9 = vrot.slane %v3324_v6, 4  ;;  %v348_v61 = vrot.slane %v3325_v59, 4  ;;  %v206_v62 = vrot.slane %v3623_v22, 2 }
  0xa1   :  { %v3304_v43 = vpop.permute.xlu0 %3303  ;;  %v3295_v15 = vunpack.i.l.bf16 %v4232_v42  ;;  %v515_v11 = vsel %vm503_vm4, %v3321_v38, %v3286_v57  ;;  %v207_v10 = vrot.slane %v4265_v16, 2  ;;  %v496_v13 = vrot.slane %v3327_v21, 6 }
  0xa2   :  { %757 = vmatmul.mubr.f32.gmra.mrb[18].mxu0 %v513_v36  ;;  %902 = vmatmul.mubr.f32.gmra.mrb[18].mxu1 %v545_v34  ;;  %v532_v22 = vsel %vm503_vm4, %v203_v39, %v3291_v32  ;;  %v3300_v14 = vunpack.i.l.bf16 %v3299_v58  ;;  %v3305_v53 = vunpack.i.l.bf16 %v3304_v43  ;;  %v547_v27 = vsel %vm503_vm4, %v346_v8, %v3296_v60  ;;  %v3309_v18 = vpop.permute.xlu1 %3308  ;;  %v1247_v32 = vld [vmem:[%s5189_s3 + $0xe8] sm:$0xff]  ;;  %v1278_v60 = vld [vmem:[%s5189_s3 + $0x1e0] sm:$0xff] }
  0xa3   :  { %761 = vmatprep.mubr.f32.mxu0 %v530_v46  ;;  %2484 = vmatprep.mubr.msk.f32.mxu1 %vm503_vm4, %v490_v40  ;;  %v495_v55 = vsel %vm462_vm3, %v493_v41, %v494_v48  ;;  %v205_v28 = vsel %vm170_vm5, %v202_v19, %v204_v0  ;;  %v349_v3 = vsel %vm316_vm6, %v347_v9, %v348_v61  ;;  %v350_v56 = vrot.slane %v3327_v21, 4  ;;  %v1246_v0 = vld [vmem:[%s5189_s3 + $0xe0] sm:$0xff] }
  0xa4   :  { %v209_v23 = vrot.slane %v3328_v17, 2  ;;  %v498_v24 = vrot.slane %v3329_v33, 6  ;;  %v3301_v30 = vunpack.i.h.bf16 %v3299_v58  ;;  %v516_v20 = vsel %vm503_vm4, %v3324_v6, %v3295_v15 }
  0xa5   :  { %v208_v29 = vsel %vm170_vm5, %v206_v62, %v207_v10  ;;  %v497_v31 = vsel %vm462_vm3, %v494_v48, %v496_v13  ;;  %v3306_v54 = vunpack.i.h.bf16 %v3304_v43  ;;  %v3311_v37 = vunpack.i.h.bf16 %v3309_v18  ;;  %v3314_v63 = vpop.permute.xlu0 %3313  ;;  %v1279_v43 = vld [vmem:[%s5189_s3 + $0x1e8] sm:$0xff]  ;;  %v1232_v13 = vld [vmem:[%s5189_s3 + $0x70] sm:$0xff] }
  0xa6   :  { %762 = vmatmul.mubr.f32.gmra.mrb[20].mxu0 %v514_v2  ;;  %907 = vmatmul.mubr.f32.gmra.mrb[20].mxu1 %v546_v25  ;;  %v533_v52 = vsel %vm503_vm4, %v205_v28, %v3300_v14  ;;  %v548_v38 = vsel %vm503_vm4, %v349_v3, %v3305_v53  ;;  %v351_v1 = vsel %vm316_vm6, %v348_v61, %v350_v56  ;;  %v499_v19 = vrot.slane %v4265_v16, 6  ;;  %v443_v34 = vpop.permute.xlu1 %442  ;;  %v1230_v25 = vld [vmem:[%s5189_s3 + $0x60] sm:$0xff]  ;;  %v1263_v62 = vld [vmem:[%s5189_s3 + $0x168] sm:$0xff]  ;;  %v1281_v14 = vld [vmem:[%s5189_s3 + $0x1f8] sm:$0xff] }
  0xa7   :  { %766 = vmatprep.mubr.f32.mxu0 %v531_v12  ;;  %2485 = vmatprep.mubr.msk.f32.mxu1 %vm503_vm4, %v492_v49  ;;  %v352_v7 = vrot.slane %v3329_v33, 4  ;;  %v353_v35 = vrot.slane %v4265_v16, 4  ;;  %v3310_v36 = vunpack.i.l.bf16 %v3309_v18  ;;  %v517_v40 = vsel %vm503_vm4, %v3325_v59, %v3301_v30  ;;  %v1231_v49 = vld [vmem:[%s5189_s3 + $0x68] sm:$0xff]  ;;  %v1262_v61 = vld [vmem:[%s5189_s3 + $0x160] sm:$0xff]  ;;  %v1265_v18 = vld [vmem:[%s5189_s3 + $0x178] sm:$0xff] }
  0xa8   :  { %v534_v42 = vsel %vm503_vm4, %v208_v29, %v3306_v54  ;;  %v3315_v46 = vunpack.i.l.bf16 %v3314_v63  ;;  %v549_v50 = vsel %vm503_vm4, %v351_v1, %v3311_v37  ;;  %v210_v51 = vsel %vm170_vm5, %v207_v10, %v209_v23  ;;  %v1280_v10 = vld [vmem:[%s5189_s3 + $0x1f0] sm:$0xff]  ;;  %v1875_v3 = vld [vmem:[%s5191_s5 + $0x80] sm:$0xff]  ;;  %v1876_v56 = vld [vmem:[%s5191_s5 + $0x88] sm:$0xff] }
  0xa9   :  { %v500_v47 = vsel %vm462_vm3, %v498_v24, %v499_v19  ;;  %v354_v26 = vsel %vm316_vm6, %v352_v7, %v353_v35  ;;  %v501_v44 = vrot.slane %v3328_v17, 6  ;;  %v355_v45 = vrot.slane %v3328_v17, 4  ;;  %v445_v57 = vpop.permute.xlu0 %444  ;;  %v1907_v23 = vld [vmem:[%s5191_s5 + $0x180] sm:$0xff] }
  0xaa   :  { %767 = vmatmul.mubr.f32.gmra.mrb[22].mxu0 %v515_v11  ;;  %912 = vmatmul.mubr.f32.gmra.mrb[22].mxu1 %v547_v27  ;;  %v3316_v4 = vunpack.i.h.bf16 %v3314_v63  ;;  %v518_v39 = vsel %vm503_vm4, %v3329_v33, %v3310_v36  ;;  %v535_v6 = vsel %vm503_vm4, %v210_v51, %v3315_v46  ;;  %v550_v41 = vsel %vm503_vm4, %v354_v26, %v443_v34  ;;  %v1248_v11 = vld [vmem:[%s5189_s3 + $0xf0] sm:$0xff]  ;;  %v1908_v33 = vld [vmem:[%s5191_s5 + $0x188] sm:$0xff]  ;;  %v4372_v29 = vld [vmem:[%s5188_s2] ss:$0 sm:$0xff]  ;;  %s3330_s2 = scalar_lea.vmem %s2466_s15, 128 }
  0xab   :  { %771 = vmatprep.mubr.f32.mxu0 %v532_v22  ;;  %2486 = vmatprep.mubr.msk.f32.mxu1 %vm503_vm4, %v495_v55  ;;  %v502_v2 = vsel %vm462_vm3, %v499_v19, %v501_v44  ;;  %v356_v58 = vsel %vm316_vm6, %v353_v35, %v355_v45  ;;  %v3069_v12 = vpack.c.bf16 %v1247_v32, %v1246_v0  ;;  %v1233_v22 = vld [vmem:[%s5189_s3 + $0x78] sm:$0xff]  ;;  %v1264_v55 = vld [vmem:[%s5189_s3 + $0x170] sm:$0xff]  ;;  %v4378_v36 = vld [vmem:[%s5191_s5] sm:$0xff]  ;;  %p3331_p0 = scmp.ne.s32.totalorder %s2466_s15, %s3330_s2  ;;  %p3336_p2 = scmp.lt.s32.totalorder %s3330_s2, %s3330_s2 }
  0xac   :  { %v519_v59 = vsel %vm503_vm4, %v4265_v16, %v3316_v4  ;;  %v551_v48 = vsel %vm503_vm4, %v356_v58, %v445_v57  ;;  %v3071_v8 = vpack.c.bf16 %v1231_v49, %v1230_v25  ;;  %v3101_v9 = vpack.c.bf16 %v1279_v43, %v1278_v60  ;;  %v1249_v16 = vld [vmem:[%s5189_s3 + $0xf8] sm:$0xff]  ;;  %v4393_v46 = vld [vmem:[%s5191_s5 + $0x108] sm:$0xff]  ;;  %v4408_v34 = vld [vmem:[%s5191_s5 + $0x10] sm:$0xff] }
  0xad   :  { %3070 = vmatprep.subr.bf16.mxu0 %v3069_v12  ;;  %v3103_v15 = vpack.c.bf16 %v1263_v62, %v1262_v61  ;;  %v3073_v21 = vpack.c.bf16 %v1249_v16, %v1248_v11  ;;  %v3075_v53 = vpack.c.bf16 %v1233_v22, %v1232_v13  ;;  %v3105_v27 = vpack.c.bf16 %v1281_v14, %v1280_v10  ;;  %v4403_v51 = vld [vmem:[%s5191_s5 + $0x98] sm:$0xff]  ;;  %v4418_v26 = vld [vmem:[%s5191_s5 + $0x190] sm:$0xff]  ;;  %v4439_v58 = vld [vmem:[%s5191_s5 + $0xa0] sm:$0xff]  ;;  %p3337_p3 = por %p3336_p2, %p3335_p1 }
  0xae   :  { %772 = vmatmul.mubr.f32.gmra.mrb[24].mxu0 %v516_v20  ;;  %917 = vmatmul.mubr.f32.gmra.mrb[24].mxu1 %v548_v38  ;;  %v3107_v28 = vpack.c.bf16 %v1265_v18, %v1264_v55  ;;  %v3109_v17 = vpack.c.bf16 %v1876_v56, %v1875_v3  ;;  %v3141_v24 = vpack.c.bf16 %v1908_v33, %v1907_v23  ;;  %v4456_v25 = vld [vmem:[%s5191_s5 + $0x28] sm:$0xff]  ;;  %v4461_v49 = vld [vmem:[%s5191_s5 + $0x1a0] sm:$0xff]  ;;  %v4489_v16 = vld [vmem:[%s5191_s5 + $0xb0] sm:$0xff] }
  0xaf   :  { %776 = vmatprep.mubr.f32.mxu0 %v533_v52  ;;  %2487 = vmatprep.mubr.msk.f32.mxu1 %vm503_vm4, %v497_v31  ;;  %v4466_v43 = vld [vmem:[%s5191_s5 + $0x1a8] sm:$0xff]  ;;  %v4509_v55 = vld [vmem:[%s5191_s5 + $0x38] sm:$0xff]  ;;  %p3338_p4 = pnand %p3337_p3, %p3331_p0 }
  0xb0   :  { %3072 = vmatpush3.bf16.msra.mxu0 %v3071_v8  ;;  %3102 = vmatprep.subr.bf16.mxu1 %v3101_v9  ;;  %v4484_v11 = vld [vmem:[%s5191_s5 + $0x128] sm:$0xff] }
  0xb1   :  { %3104 = vmatpush3.bf16.msra.mxu1 %v3103_v15  ;;  %3074 = vmatprep.subr.bf16.mxu0 %v3073_v21  ;;  %v4479_v15 = vld [vmem:[%s5191_s5 + $0x120] sm:$0xff] }
  0xb2   :  { %777 = vmatmul.mubr.f32.gmra.mrb[26].mxu0 %v517_v40  ;;  %922 = vmatmul.mubr.f32.gmra.mrb[26].mxu1 %v549_v50  ;;  %v4383_v40 = vld [vmem:[%s5191_s5 + $0x8] sm:$0xff]  ;;  %v4398_v50 = vld [vmem:[%s5191_s5 + $0x90] sm:$0xff] }
  0xb3   :  { %781 = vmatprep.mubr.f32.mxu0 %v534_v42  ;;  %2488 = vmatprep.mubr.msk.f32.mxu1 %vm503_vm4, %v500_v47  ;;  %v4388_v42 = vld [vmem:[%s5191_s5 + $0x100] sm:$0xff]  ;;  %v4413_v47 = vld [vmem:[%s5191_s5 + $0x18] sm:$0xff]  ;;  %v3111_v8 = vpack.c.bf16 %v4383_v40, %v4378_v36  ;;  %v3113_v61 = vpack.c.bf16 %v4403_v51, %v4398_v50 }
  0xb4   :  { %3076 = vmatpush3.bf16.msra.mxu0 %v3075_v53  ;;  %3106 = vmatprep.subr.bf16.mxu1 %v3105_v27  ;;  %v3143_v9 = vpack.c.bf16 %v4393_v46, %v4388_v42  ;;  %v3115_v62 = vpack.c.bf16 %v4413_v47, %v4408_v34  ;;  %v4499_v53 = vld [vmem:[%s5191_s5 + $0xb8] sm:$0xff]  ;;  %v4504_v27 = vld [vmem:[%s5191_s5 + $0x30] sm:$0xff] }
  0xb5   :  { %3108 = vmatpush3.bf16.msra.mxu1 %v3107_v28  ;;  %3110 = vmatprep.subr.bf16.mxu0 %v3109_v17 }
  0xb6   :  { %782 = vmatmul.mubr.f32.gmra.mrb[28].mxu0 %v518_v39  ;;  %927 = vmatmul.mubr.f32.gmra.mrb[28].mxu1 %v550_v41  ;;  %v4424_v39 = vld [vmem:[%s5191_s5 + $0x198] sm:$0xff] }
  0xb7   :  { %786 = vmatprep.mubr.f32.mxu0 %v535_v6  ;;  %2489 = vmatprep.mubr.msk.f32.mxu1 %vm503_vm4, %v502_v2  ;;  %v4429_v6 = vld [vmem:[%s5191_s5 + $0x110] sm:$0xff]  ;;  %v4434_v41 = vld [vmem:[%s5191_s5 + $0x118] sm:$0xff]  ;;  %v3145_v14 = vpack.c.bf16 %v4424_v39, %v4418_v26  ;;  %v4645_v26 = vld [vmem:[%s5191_s5 + $0x140] sm:$0xff]  ;;  %vm2457_vm4 = vcmask 64512  }
  0xb8   :  { %3142 = vmatprep.subr.bf16.mxu1 %v3141_v24 }
  0xba   :  { %787 = vmatmul.mubr.f32.gmra.mrb[30].mxu0 %v519_v59  ;;  %932 = vmatmul.mubr.f32.gmra.mrb[30].mxu1 %v551_v48  ;;  %v4444_v59 = vld [vmem:[%s5191_s5 + $0xa8] sm:$0xff]  ;;  %v4449_v48 = vld [vmem:[%s5191_s5 + $0x20] sm:$0xff] }
 0x151   :  { %v2557_v30 = vpop.f32.mrb[0].mxu0  ;;  %v858_v31 = vpop.f32.mrb[0].mxu1 }
 0x152   :  { %v2558_v20 = vpop.f32.mrb[1].mxu0  ;;  %v860_v37 = vpop.f32.mrb[1].mxu1 }
 0x153   :  { %v2559_v54 = vadd.f32 %v2558_v20, %v2557_v30 }
 0x155   :  { %v714_v52 = vadd.f32 %v2559_v54, %v4372_v29  ;;  %v2560_v38 = vpop.f32.mrb[2].mxu0  ;;  %v863_v1 = vpop.f32.mrb[2].mxu1 }
 0x156   :  { %v2561_v63 = vpop.f32.mrb[3].mxu0  ;;  %v865_v35 = vpop.f32.mrb[3].mxu1 }
 0x157   :  { %v859_v19 = vadd.f32 %v858_v31, %v714_v52  ;;  %v2562_v7 = vadd.f32 %v2561_v63, %v2560_v38  ;;  %v4587_v38 = vld [vmem:[%s5191_s5 + $0x48] sm:$0xff] }
 0x159   :  { %v937_v44 = vmax.f32 %v859_v19, 0.0  ;;  %v719_v45 = vadd.f32 %v2562_v7, %v4372_v29  ;;  %v2563_v4 = vpop.f32.mrb[4].mxu0  ;;  %v868_v2 = vpop.f32.mrb[4].mxu1 }
 0x15a   :  { %v2564_v57 = vpop.f32.mrb[5].mxu0  ;;  %v870_v12 = vpop.f32.mrb[5].mxu1 }
 0x15b   :  { %v4451_v0 = vrot.slane %v937_v44, 7  ;;  %v864_v32 = vadd.f32 %v863_v1, %v719_v45  ;;  %v2565_v60 = vadd.f32 %v2564_v57, %v2563_v4 }
 0x15d   :  { %v1018_v10 = vsel %vm969_vm7, 0.0, %v4451_v0  ;;  %v938_v21 = vmax.f32 %v864_v32, 0.0  ;;  %v2566_v13 = vpop.f32.mrb[6].mxu0  ;;  %v724_v22 = vadd.f32 %v2565_v60, %v4372_v29  ;;  %v873_v28 = vpop.f32.mrb[6].mxu1 }
 0x15e   :  { %v2567_v18 = vpop.f32.mrb[7].mxu0  ;;  %v875_v20 = vpop.f32.mrb[7].mxu1  ;;  %v1106_v54 = vrot.slane %v1018_v10, 2  ;;  %v1050_v37 = vrot.slane %v1018_v10, 1 }
 0x15f   :  { %v971_v33 = vrot.slane %v938_v21, 7  ;;  %v869_v24 = vadd.f32 %v868_v2, %v724_v22  ;;  %v2568_v30 = vadd.f32 %v2567_v18, %v2566_v13  ;;  %v1871_v18 = vld [vmem:[%s5191_s5 + $0x60] sm:$0xff] }
 0x161   :  { %v4527_v63 = vsel %vm969_vm7, %v4451_v0, %v971_v33  ;;  %v1026_v1 = vsel %vm969_vm7, %v971_v33, 0.0  ;;  %v939_v19 = vmax.f32 %v869_v24, 0.0  ;;  %v729_v7 = vadd.f32 %v2568_v30, %v4372_v29  ;;  %v2569_v35 = vpop.f32.mrb[8].mxu0  ;;  %v878_v32 = vpop.f32.mrb[8].mxu1  ;;  %v4543_v33 = vld [vmem:[%s5191_s5 + $0x1b0] sm:$0xff]  ;;  %v4548_v24 = vld [vmem:[%s5191_s5 + $0x1b8] sm:$0xff] }
 0x162   :  { %v1053_v44 = vrot.slane %v1026_v1, 1  ;;  %v1107_v45 = vrot.slane %v4527_v63, 2  ;;  %v1109_v4 = vrot.slane %v1026_v1, 2  ;;  %v1165_v57 = vrot.slane %v1026_v1, 3  ;;  %v2570_v2 = vpop.f32.mrb[9].mxu0  ;;  %v880_v22 = vpop.f32.mrb[9].mxu1 }
 0x163   :  { %v4532_v60 = vrot.slane %v939_v19, 7  ;;  %v874_v12 = vadd.f32 %v873_v28, %v729_v7  ;;  %v2571_v21 = vadd.f32 %v2570_v2, %v2569_v35  ;;  %v1051_v13 = vrot.slane %v4527_v63, 1  ;;  %v4556_v19 = vld [vmem:[%s5191_s5 + $0x130] sm:$0xff]  ;;  %v4561_v7 = vld [vmem:[%s5191_s5 + $0x138] sm:$0xff]  ;;  %v4577_v22 = vld [vmem:[%s5191_s5 + $0xc8] sm:$0xff] }
 0x164   :  { %v1162_v28 = vrot.slane %v1018_v10, 3  ;;  %v1163_v30 = vrot.slane %v4527_v63, 3  ;;  %v1108_v20 = vsel %vm170_vm5, %v1106_v54, %v1107_v45  ;;  %v1110_v1 = vsel %vm170_vm5, %v1107_v45, %v1109_v4  ;;  %v4566_v10 = vld [vmem:[%s5191_s5 + $0xc0] sm:$0xff] }
 0x165   :  { %v4570_v54 = vsel %vm969_vm7, 0.0, %v4532_v60  ;;  %v940_v35 = vmax.f32 %v874_v12, 0.0  ;;  %v2572_v45 = vpop.f32.mrb[10].mxu0  ;;  %v734_v4 = vadd.f32 %v2571_v21, %v4372_v29  ;;  %v1052_v2 = vsel %vm81_vm0, %v1050_v37, %v1051_v13  ;;  %v883_v52 = vpop.f32.mrb[10].mxu1 }
 0x166   :  { %1353 = vmatprep.mubr.f32.mxu0 %v1052_v2  ;;  %v1164_v12 = vsel %vm227_vm1, %v1162_v28, %v1163_v30  ;;  %v2573_v21 = vpop.f32.mrb[11].mxu0  ;;  %v1054_v37 = vsel %vm81_vm0, %v1051_v13, %v1053_v44  ;;  %v1166_v31 = vsel %vm227_vm1, %v1163_v30, %v1165_v57  ;;  %v3153_v23 = vpack.c.bf16 %v4548_v24, %v4543_v33  ;;  %v885_v2 = vpop.f32.mrb[11].mxu1 }
 0x167   :  { %v974_v17 = vrot.slane %v940_v35, 7  ;;  %v879_v56 = vadd.f32 %v878_v32, %v734_v4  ;;  %1498 = vmatprep.mubr.f32.mxu1 %v1164_v12  ;;  %v2574_v3 = vadd.f32 %v2573_v21, %v2572_v45  ;;  %2492 = vmatmul.mubr.msk.f32.vlgmr.msra.gmra.mrb[32].mxu0 %vm4536_vm8, %v4451_v0  ;;  %v3155_v28 = vpack.c.bf16 %v4561_v7, %v4556_v19 }
 0x168   :  { %1499 = vmatmul.mubr.f32.vlgmr.msra.gmra.mrb[32].mxu1 %v1108_v20  ;;  %1358 = vmatprep.mubr.f32.mxu0 %v1054_v37  ;;  %v1055_v44 = vrot.slane %v4570_v54, 1  ;;  %v1167_v57 = vrot.slane %v4570_v54, 3  ;;  %v3125_v13 = vpack.c.bf16 %v4577_v22, %v4566_v10  ;;  %v1111_v46 = vrot.slane %v4570_v54, 2  ;;  %v4669_v54 = vld [vmem:[%s5191_s5 + $0xd8] sm:$0xff] }
 0x169   :  { %v4607_v30 = vsel %vm969_vm7, %v4532_v60, %v974_v17  ;;  %v1027_v0 = vsel %vm969_vm7, %v974_v17, 0.0  ;;  %v941_v35 = vmax.f32 %v879_v56, 0.0  ;;  %1503 = vmatprep.mubr.f32.mxu1 %v1166_v31  ;;  %v739_v20 = vadd.f32 %v2574_v3, %v4372_v29  ;;  %v2575_v45 = vpop.f32.mrb[12].mxu0  ;;  %3112 = vmatpush3.bf16.msra.mxu0 %v3111_v8  ;;  %v888_v2 = vpop.f32.mrb[12].mxu1 }
 0x16a   :  { %v1058_v4 = vrot.slane %v1027_v0, 1  ;;  %v1114_v12 = vrot.slane %v1027_v0, 2  ;;  %v1170_v21 = vrot.slane %v1027_v0, 3  ;;  %v2576_v37 = vpop.f32.mrb[13].mxu0  ;;  %v1056_v32 = vrot.slane %v4607_v30, 1  ;;  %3144 = vmatpush3.bf16.msra.mxu1 %v3143_v9  ;;  %3114 = vmatprep.subr.bf16.mxu0 %v3113_v61  ;;  %v890_v8 = vpop.f32.mrb[13].mxu1 }
 0x16b   :  { %v4621_v3 = vrot.slane %v941_v35, 7  ;;  %v884_v56 = vadd.f32 %v883_v52, %v739_v20  ;;  %v2577_v36 = vadd.f32 %v2576_v37, %v2575_v45  ;;  %1359 = vmatmul.mubr.f32.gmra.mrb[34].mxu0 %v4527_v63  ;;  %v1168_v40 = vrot.slane %v4607_v30, 3  ;;  %3146 = vmatprep.subr.bf16.mxu1 %v3145_v14  ;;  %v4635_v9 = vld [vmem:[%s5191_s5 + $0x1c0] sm:$0xff]  ;;  %v4640_v61 = vld [vmem:[%s5191_s5 + $0x1c8] sm:$0xff] }
 0x16c   :  { %1504 = vmatmul.mubr.f32.gmra.mrb[34].mxu1 %v1110_v1  ;;  %v1057_v42 = vsel %vm81_vm0, %v1055_v44, %v1056_v32  ;;  %v1112_v50 = vrot.slane %v4607_v30, 2  ;;  %v1059_v51 = vsel %vm81_vm0, %v1056_v32, %v1058_v4  ;;  %v4659_v63 = vld [vmem:[%s5191_s5 + $0x148] sm:$0xff]  ;;  %v4664_v1 = vld [vmem:[%s5191_s5 + $0xd0] sm:$0xff]  ;;  %v5200_v32 = vpack.c.bf16 %v4434_v41, %v4429_v6 }
 0x16d   :  { %v4649_v39 = vsel %vm969_vm7, 0.0, %v4621_v3  ;;  %v942_v14 = vmax.f32 %v884_v56, 0.0  ;;  %v2578_v17 = vpop.f32.mrb[14].mxu0  ;;  %v744_v31 = vadd.f32 %v2577_v36, %v4372_v29  ;;  %1363 = vmatprep.mubr.f32.mxu0 %v1057_v42  ;;  %v1169_v52 = vsel %vm227_vm1, %v1167_v57, %v1168_v40  ;;  %3116 = vmatpush3.bf16.msra.mxu0 %v3115_v62  ;;  %v893_v62 = vpop.f32.mrb[14].mxu1 }
 0x16e   :  { %1508 = vmatprep.mubr.f32.mxu1 %v1169_v52  ;;  %v2579_v44 = vpop.f32.mrb[15].mxu0  ;;  %v1113_v34 = vsel %vm170_vm5, %v1111_v46, %v1112_v50  ;;  %v1171_v47 = vsel %vm227_vm1, %v1168_v40, %v1170_v21  ;;  %v1115_v57 = vsel %vm170_vm5, %v1112_v50, %v1114_v12  ;;  %3148 = vmatpush3.bf16.msra.mxu1 %v5200_v32  ;;  %v895_v45 = vpop.f32.mrb[15].mxu1  ;;  %v1060_v6 = vrot.slane %v4649_v39, 1  ;;  %v4749_v32 = vld [vmem:[%s5191_s5 + $0x150] sm:$0xff] }
 0x16f   :  { %v977_v0 = vrot.slane %v942_v14, 7  ;;  %v889_v35 = vadd.f32 %v888_v2, %v744_v31  ;;  %v2580_v20 = vadd.f32 %v2579_v44, %v2578_v17  ;;  %2494 = vmatmul.mubr.msk.f32.gmra.mrb[36].mxu0 %vm4536_vm8, %v4532_v60  ;;  %v5201_v4 = vpack.c.bf16 %v4444_v59, %v4439_v58 }
 0x170   :  { %v3157_v21 = vpack.c.bf16 %v4640_v61, %v4635_v9  ;;  %1509 = vmatmul.mubr.f32.gmra.mrb[36].mxu1 %v1113_v34  ;;  %1368 = vmatprep.mubr.f32.mxu0 %v1059_v51  ;;  %v1172_v41 = vrot.slane %v4649_v39, 3  ;;  %v3159_v12 = vpack.c.bf16 %v4659_v63, %v4645_v26  ;;  %v3129_v60 = vpack.c.bf16 %v4669_v54, %v4664_v1 }
 0x171   :  { %3118 = vmatprep.subr.bf16.mxu0 %v5201_v4  ;;  %v4693_v37 = vsel %vm969_vm7, %v4621_v3, %v977_v0  ;;  %v1028_v58 = vsel %vm969_vm7, %v977_v0, 0.0  ;;  %v943_v59 = vmax.f32 %v889_v35, 0.0  ;;  %1513 = vmatprep.mubr.f32.mxu1 %v1171_v47  ;;  %v749_v2 = vadd.f32 %v2580_v20, %v4372_v29  ;;  %v2581_v56 = vpop.f32.mrb[16].mxu0  ;;  %v898_v50 = vpop.f32.mrb[16].mxu1  ;;  %v4754_v0 = vld [vmem:[%s5191_s5 + $0x158] sm:$0xff] }
 0x172   :  { %v5202_v36 = vpack.c.bf16 %v4456_v25, %v4449_v48  ;;  %v1063_v40 = vrot.slane %v1028_v58, 1  ;;  %v1119_v8 = vrot.slane %v1028_v58, 2  ;;  %v1175_v42 = vrot.slane %v1028_v58, 3  ;;  %v2582_v46 = vpop.f32.mrb[17].mxu0  ;;  %v900_v44 = vpop.f32.mrb[17].mxu1 }
 0x173   :  { %v1061_v51 = vrot.slane %v4693_v37, 1  ;;  %v5203_v14 = vpack.c.bf16 %v4466_v43, %v4461_v49  ;;  %v5204_v17 = vpack.c.bf16 %v4499_v53, %v4489_v16  ;;  %v4707_v31 = vrot.slane %v943_v59, 7  ;;  %1369 = vmatmul.mubr.f32.gmra.mrb[38].mxu0 %v4607_v30  ;;  %v4724_v30 = vld [vmem:[%s5191_s5 + $0x50] sm:$0xff] }
 0x174   :  { %3120 = vmatpush3.bf16.msra.mxu0 %v5202_v36  ;;  %v894_v52 = vadd.f32 %v893_v62, %v749_v2  ;;  %v2583_v48 = vadd.f32 %v2582_v46, %v2581_v56  ;;  %v1173_v25 = vrot.slane %v4693_v37, 3  ;;  %v5205_v34 = vpack.c.bf16 %v4484_v11, %v4479_v15  ;;  %1514 = vmatmul.mubr.f32.gmra.mrb[38].mxu1 %v1115_v57  ;;  %v4729_v15 = vld [vmem:[%s5191_s5 + $0x58] sm:$0xff]  ;;  %v1917_v11 = vld [vmem:[%s5191_s5 + $0x1d0] sm:$0xff] }
 0x175   :  { %3150 = vmatprep.subr.bf16.mxu1 %v5203_v14  ;;  %3122 = vmatprep.subr.bf16.mxu0 %v5204_v17  ;;  %v1062_v49 = vsel %vm81_vm0, %v1060_v6, %v1061_v51  ;;  %v1116_v43 = vrot.slane %v4649_v39, 2  ;;  %v1117_v16 = vrot.slane %v4693_v37, 2  ;;  %v1064_v53 = vsel %vm81_vm0, %v1061_v51, %v1063_v40  ;;  %v1918_v57 = vld [vmem:[%s5191_s5 + $0x1d8] sm:$0xff] }
 0x176   :  { %3152 = vmatpush3.bf16.msra.mxu1 %v5205_v34  ;;  %v4736_v39 = vsel %vm969_vm7, 0.0, %v4707_v31  ;;  %v944_v33 = vmax.f32 %v894_v52, 0.0  ;;  %v754_v24 = vadd.f32 %v2583_v48, %v4372_v29  ;;  %1373 = vmatprep.mubr.f32.mxu0 %v1062_v49  ;;  %v1174_v47 = vsel %vm227_vm1, %v1172_v41, %v1173_v25 }
 0x177   :  { %3154 = vmatprep.subr.bf16.mxu1 %v3153_v23  ;;  %v2584_v23 = vpop.f32.mrb[18].mxu0  ;;  %v5206_v62 = vpack.c.bf16 %v4509_v55, %v4504_v27  ;;  %1518 = vmatprep.mubr.f32.mxu1 %v1174_v47  ;;  %v1118_v20 = vsel %vm170_vm5, %v1116_v43, %v1117_v16  ;;  %v1176_v27 = vsel %vm227_vm1, %v1173_v25, %v1175_v42  ;;  %v903_v55 = vpop.f32.mrb[18].mxu1  ;;  %v1065_v10 = vrot.slane %v4736_v39, 1 }
 0x178   :  { %v2585_v35 = vpop.f32.mrb[19].mxu0  ;;  %v1120_v45 = vsel %vm170_vm5, %v1117_v16, %v1119_v8  ;;  %v980_v4 = vrot.slane %v944_v33, 7  ;;  %v899_v6 = vadd.f32 %v898_v50, %v754_v24  ;;  %2496 = vmatmul.mubr.msk.f32.gmra.mrb[40].mxu0 %vm4536_vm8, %v4621_v3  ;;  %v905_v58 = vpop.f32.mrb[19].mxu1  ;;  %v3131_v59 = vpack.c.bf16 %v4729_v15, %v4724_v30  ;;  %1519 = vmatmul.mubr.f32.gmra.mrb[40].mxu1 %v1118_v20 }
 0x179   :  { %3124 = vmatpush3.bf16.msra.mxu0 %v5206_v62  ;;  %v2586_v41 = vadd.f32 %v2585_v35, %v2584_v23  ;;  %1378 = vmatprep.mubr.f32.mxu0 %v1064_v53  ;;  %v1177_v22 = vrot.slane %v4736_v39, 3  ;;  %v3163_v2 = vpack.c.bf16 %v4754_v0, %v4749_v32  ;;  %v2587_v56 = vpop.f32.mrb[20].mxu0  ;;  %v5207_v36 = vpack.c.bf16 %v4587_v38, %v4582_v5  ;;  %v908_v50 = vpop.f32.mrb[20].mxu1 }
 0x17a   :  { %3126 = vmatprep.subr.bf16.mxu0 %v3125_v13  ;;  %3156 = vmatpush3.bf16.msra.mxu1 %v3155_v28  ;;  %v3161_v13 = vpack.c.bf16 %v1918_v57, %v1917_v11  ;;  %v4776_v3 = vsel %vm969_vm7, %v4707_v31, %v980_v4  ;;  %v1029_v19 = vsel %vm969_vm7, %v980_v4, 0.0  ;;  %v945_v7 = vmax.f32 %v899_v6, 0.0  ;;  %v2588_v46 = vpop.f32.mrb[21].mxu0  ;;  %v910_v52 = vpop.f32.mrb[21].mxu1 }
 0x17b   :  { %1523 = vmatprep.mubr.f32.mxu1 %v1176_v27  ;;  %v759_v28 = vadd.f32 %v2586_v41, %v4372_v29  ;;  %v1068_v40 = vrot.slane %v1029_v19, 1  ;;  %v1124_v8 = vrot.slane %v1029_v19, 2  ;;  %v1180_v42 = vrot.slane %v1029_v19, 3  ;;  %3158 = vmatprep.subr.bf16.mxu1 %v3157_v21 }
 0x17c   :  { %v1066_v51 = vrot.slane %v4776_v3, 1  ;;  %v4790_v14 = vrot.slane %v945_v7, 7  ;;  %v2589_v5 = vadd.f32 %v2588_v46, %v2587_v56  ;;  %1379 = vmatmul.mubr.f32.gmra.mrb[42].mxu0 %v4693_v37  ;;  %v1178_v38 = vrot.slane %v4776_v3, 3  ;;  %1524 = vmatmul.mubr.f32.gmra.mrb[42].mxu1 %v1120_v45 }
 0x17d   :  { %3128 = vmatpush3.bf16.msra.mxu0 %v5207_v36  ;;  %v904_v17 = vadd.f32 %v903_v55, %v759_v28  ;;  %v1121_v61 = vrot.slane %v4736_v39, 2  ;;  %v1122_v1 = vrot.slane %v4776_v3, 2  ;;  %v2590_v37 = vpop.f32.mrb[22].mxu0  ;;  %v913_v44 = vpop.f32.mrb[22].mxu1 }
 0x17e   :  { %3130 = vmatprep.subr.bf16.mxu0 %v3129_v60  ;;  %3160 = vmatpush3.bf16.msra.mxu1 %v3159_v12  ;;  %v1067_v9 = vsel %vm81_vm0, %v1065_v10, %v1066_v51  ;;  %v1069_v54 = vsel %vm81_vm0, %v1066_v51, %v1068_v40  ;;  %v1022_v21 = vsel %vm969_vm7, 0.0, %v4790_v14  ;;  %v764_v48 = vadd.f32 %v2589_v5, %v4372_v29  ;;  %v2591_v63 = vpop.f32.mrb[23].mxu0  ;;  %v915_v53 = vpop.f32.mrb[23].mxu1 }
 0x17f   :  { %3162 = vmatprep.subr.bf16.mxu1 %v3161_v13  ;;  %v946_v60 = vmax.f32 %v904_v17, 0.0  ;;  %1383 = vmatprep.mubr.f32.mxu0 %v1067_v9  ;;  %v1179_v26 = vsel %vm227_vm1, %v1177_v22, %v1178_v38  ;;  %v1123_v12 = vsel %vm170_vm5, %v1121_v61, %v1122_v1  ;;  %v1181_v25 = vsel %vm227_vm1, %v1178_v38, %v1180_v42 }
 0x180   :  { %1528 = vmatprep.mubr.f32.mxu1 %v1179_v26  ;;  %v1125_v34 = vsel %vm170_vm5, %v1122_v1, %v1124_v8  ;;  %v909_v43 = vadd.f32 %v908_v50, %v764_v48  ;;  %v2592_v16 = vadd.f32 %v2591_v63, %v2590_v37  ;;  %2498 = vmatmul.mubr.msk.f32.gmra.mrb[44].mxu0 %vm4536_vm8, %v4707_v31  ;;  %v1070_v30 = vrot.slane %v1022_v21, 1 }
 0x181   :  { %3132 = vmatpush3.bf16.msra.mxu0 %v3131_v59  ;;  %v983_v49 = vrot.slane %v946_v60, 7  ;;  %1529 = vmatmul.mubr.f32.gmra.mrb[44].mxu1 %v1123_v12  ;;  %v1182_v15 = vrot.slane %v1022_v21, 3  ;;  %v2593_v24 = vpop.f32.mrb[24].mxu0  ;;  %v918_v32 = vpop.f32.mrb[24].mxu1  ;;  %v1126_v6 = vrot.slane %v1022_v21, 2 }
 0x182   :  { %3164 = vmatpush3.bf16.msra.mxu1 %v3163_v2  ;;  %1388 = vmatprep.mubr.f32.mxu0 %v1069_v54  ;;  %v947_v33 = vmax.f32 %v909_v43, 0.0  ;;  %v769_v23 = vadd.f32 %v2592_v16, %v4372_v29  ;;  %v2594_v31 = vpop.f32.mrb[25].mxu0  ;;  %v920_v45 = vpop.f32.mrb[25].mxu1 }
 0x183   :  { %v984_v11 = vsel %vm969_vm7, %v4790_v14, %v983_v49  ;;  %v1030_v39 = vsel %vm969_vm7, %v983_v49, 0.0  ;;  %1533 = vmatprep.mubr.f32.mxu1 %v1181_v25  ;;  %v2595_v27 = vadd.f32 %v2594_v31, %v2593_v24 }
 0x184   :  { %v1073_v47 = vrot.slane %v1030_v39, 1  ;;  %v1129_v62 = vrot.slane %v1030_v39, 2  ;;  %v1185_v57 = vrot.slane %v1030_v39, 3  ;;  %v1071_v0 = vrot.slane %v984_v11, 1  ;;  %1389 = vmatmul.mubr.f32.gmra.mrb[46].mxu0 %v4776_v3 }
 0x185   :  { %v4815_v35 = vrot.slane %v947_v33, 7  ;;  %v914_v20 = vadd.f32 %v913_v44, %v769_v23  ;;  %v1183_v55 = vrot.slane %v984_v11, 3  ;;  %1534 = vmatmul.mubr.f32.gmra.mrb[46].mxu1 %v1125_v34  ;;  %v1127_v41 = vrot.slane %v984_v11, 2  ;;  %v2596_v22 = vpop.f32.mrb[26].mxu0  ;;  %v923_v28 = vpop.f32.mrb[26].mxu1 }
 0x186   :  { %v1072_v4 = vsel %vm81_vm0, %v1070_v30, %v1071_v0  ;;  %v1074_v58 = vsel %vm81_vm0, %v1071_v0, %v1073_v47  ;;  %v774_v13 = vadd.f32 %v2595_v27, %v4372_v29  ;;  %v2597_v3 = vpop.f32.mrb[27].mxu0  ;;  %v925_v42 = vpop.f32.mrb[27].mxu1 }
 0x187   :  { %v1023_v59 = vsel %vm969_vm7, 0.0, %v4815_v35  ;;  %v948_v10 = vmax.f32 %v914_v20, 0.0  ;;  %1393 = vmatprep.mubr.f32.mxu0 %v1072_v4  ;;  %v1184_v2 = vsel %vm227_vm1, %v1182_v15, %v1183_v55  ;;  %v1128_v19 = vsel %vm170_vm5, %v1126_v6, %v1127_v41 }
 0x188   :  { %1538 = vmatprep.mubr.f32.mxu1 %v1184_v2  ;;  %v1186_v7 = vsel %vm227_vm1, %v1183_v55, %v1185_v57  ;;  %v1130_v56 = vsel %vm170_vm5, %v1127_v41, %v1129_v62  ;;  %v919_v40 = vadd.f32 %v918_v32, %v774_v13  ;;  %v2598_v8 = vadd.f32 %v2597_v3, %v2596_v22 }
 0x189   :  { %v986_v36 = vrot.slane %v948_v10, 7  ;;  %2500 = vmatmul.mubr.msk.f32.gmra.mrb[48].mxu0 %vm4536_vm8, %v4790_v14  ;;  %1539 = vmatmul.mubr.f32.gmra.mrb[48].mxu1 %v1128_v19  ;;  %v1075_v46 = vrot.slane %v1023_v59, 1  ;;  %v1187_v50 = vrot.slane %v1023_v59, 3  ;;  %v2599_v52 = vpop.f32.mrb[28].mxu0  ;;  %v928_v14 = vpop.f32.mrb[28].mxu1  ;;  %v1131_v25 = vrot.slane %v1023_v59, 2 }
 0x18a   :  { %1398 = vmatprep.mubr.f32.mxu0 %v1074_v58  ;;  %v949_v5 = vmax.f32 %v919_v40, 0.0  ;;  %1543 = vmatprep.mubr.f32.mxu1 %v1186_v7  ;;  %v779_v38 = vadd.f32 %v2598_v8, %v4372_v29  ;;  %v2600_v54 = vpop.f32.mrb[29].mxu0  ;;  %v930_v63 = vpop.f32.mrb[29].mxu1 }
 0x18b   :  { %v987_v51 = vsel %vm969_vm7, %v4815_v35, %v986_v36  ;;  %v1031_v17 = vsel %vm969_vm7, %v986_v36, 0.0  ;;  %v2601_v48 = vadd.f32 %v2600_v54, %v2599_v52 }
 0x18c   :  { %v1078_v9 = vrot.slane %v1031_v17, 1  ;;  %v1134_v61 = vrot.slane %v1031_v17, 2  ;;  %v1190_v1 = vrot.slane %v1031_v17, 3  ;;  %v1076_v21 = vrot.slane %v987_v51, 1 }
 0x18d   :  { %v988_v60 = vrot.slane %v949_v5, 7  ;;  %v924_v37 = vadd.f32 %v923_v28, %v779_v38  ;;  %1399 = vmatmul.mubr.f32.gmra.mrb[50].mxu0 %v984_v11  ;;  %v1188_v26 = vrot.slane %v987_v51, 3  ;;  %1544 = vmatmul.mubr.f32.gmra.mrb[50].mxu1 %v1130_v56  ;;  %v1132_v44 = vrot.slane %v987_v51, 2  ;;  %v2602_v16 = vpop.f32.mrb[30].mxu0  ;;  %v933_v33 = vpop.f32.mrb[30].mxu1 }
 0x18e   :  { %v1077_v12 = vsel %vm81_vm0, %v1075_v46, %v1076_v21  ;;  %v1079_v34 = vsel %vm81_vm0, %v1076_v21, %v1078_v9  ;;  %v784_v53 = vadd.f32 %v2601_v48, %v4372_v29  ;;  %v2603_v15 = vpop.f32.mrb[31].mxu0  ;;  %v935_v57 = vpop.f32.mrb[31].mxu1  ;;  %v1888_v48 = vld [vmem:[%s5191_s5 + $0xe8] sm:$0xff] }
 0x18f   :  { %v1024_v49 = vsel %vm969_vm7, 0.0, %v988_v60  ;;  %v950_v43 = vmax.f32 %v924_v37, 0.0  ;;  %1403 = vmatprep.mubr.f32.mxu0 %v1077_v12  ;;  %v1189_v30 = vsel %vm227_vm1, %v1187_v50, %v1188_v26  ;;  %v1133_v11 = vsel %vm170_vm5, %v1131_v25, %v1132_v44  ;;  %v1887_v37 = vld [vmem:[%s5191_s5 + $0xe0] sm:$0xff]  ;;  %v1872_v12 = vld [vmem:[%s5191_s5 + $0x68] sm:$0xff]  ;;  %v1906_v57 = vld [vmem:[%s5191_s5 + $0x178] sm:$0xff] }
 0x190   :  { %1548 = vmatprep.mubr.f32.mxu1 %v1189_v30  ;;  %v1191_v39 = vsel %vm227_vm1, %v1188_v26, %v1190_v1  ;;  %v1135_v23 = vsel %vm170_vm5, %v1132_v44, %v1134_v61  ;;  %v929_v47 = vadd.f32 %v928_v14, %v784_v53  ;;  %v2604_v62 = vadd.f32 %v2603_v15, %v2602_v16  ;;  %v1919_v26 = vld [vmem:[%s5191_s5 + $0x1e0] sm:$0xff]  ;;  %v1920_v25 = vld [vmem:[%s5191_s5 + $0x1e8] sm:$0xff]  ;;  %v1889_v53 = vld [vmem:[%s5191_s5 + $0xf0] sm:$0xff] }
 0x191   :  { %v989_v24 = vrot.slane %v950_v43, 7  ;;  %2502 = vmatmul.mubr.msk.f32.gmra.mrb[52].mxu0 %vm4536_vm8, %v4815_v35  ;;  %1549 = vmatmul.mubr.f32.gmra.mrb[52].mxu1 %v1133_v11  ;;  %v1080_v31 = vrot.slane %v1024_v49, 1  ;;  %v1192_v32 = vrot.slane %v1024_v49, 3  ;;  %v1136_v0 = vrot.slane %v1024_v49, 2  ;;  %v1903_v49 = vld [vmem:[%s5191_s5 + $0x160] sm:$0xff]  ;;  %v1904_v43 = vld [vmem:[%s5191_s5 + $0x168] sm:$0xff] }
 0x192   :  { %1408 = vmatprep.mubr.f32.mxu0 %v1079_v34  ;;  %v951_v55 = vmax.f32 %v929_v47, 0.0  ;;  %1553 = vmatprep.mubr.f32.mxu1 %v1191_v39  ;;  %v789_v45 = vadd.f32 %v2604_v62, %v4372_v29  ;;  %v3133_v63 = vpack.c.bf16 %v1888_v48, %v1887_v37  ;;  %v3135_v44 = vpack.c.bf16 %v1872_v12, %v1871_v18  ;;  %v1890_v30 = vld [vmem:[%s5191_s5 + $0xf8] sm:$0xff]  ;;  %v1921_v15 = vld [vmem:[%s5191_s5 + $0x1f0] sm:$0xff] }
 0x193   :  { %v990_v20 = vsel %vm969_vm7, %v988_v60, %v989_v24  ;;  %v1032_v27 = vsel %vm969_vm7, %v989_v24, 0.0  ;;  %v3165_v34 = vpack.c.bf16 %v1920_v25, %v1919_v26  ;;  %v3167_v16 = vpack.c.bf16 %v1904_v43, %v1903_v49  ;;  %v1873_v39 = vld [vmem:[%s5191_s5 + $0x70] sm:$0xff] }
 0x194   :  { %v1083_v4 = vrot.slane %v1032_v27, 1  ;;  %v1139_v6 = vrot.slane %v1032_v27, 2  ;;  %v1195_v41 = vrot.slane %v1032_v27, 3  ;;  %v1081_v58 = vrot.slane %v990_v20, 1  ;;  %3134 = vmatprep.subr.bf16.mxu0 %v3133_v63  ;;  %v1905_v62 = vld [vmem:[%s5191_s5 + $0x170] sm:$0xff] }
 0x195   :  { %v991_v59 = vrot.slane %v951_v55, 7  ;;  %v934_v35 = vadd.f32 %v933_v33, %v789_v45  ;;  %1409 = vmatmul.mubr.f32.gmra.mrb[54].mxu0 %v987_v51  ;;  %v1193_v10 = vrot.slane %v990_v20, 3  ;;  %v1137_v22 = vrot.slane %v990_v20, 2  ;;  %1554 = vmatmul.mubr.f32.gmra.mrb[54].mxu1 %v1135_v23  ;;  %v1874_v33 = vld [vmem:[%s5191_s5 + $0x78] sm:$0xff]  ;;  %v4919_v27 = vld [vmem:[%s5190_s4] ss:$0 sm:$0xff] }
 0x196   :  { %v1082_v13 = vsel %vm81_vm0, %v1080_v31, %v1081_v58  ;;  %v1084_v2 = vsel %vm81_vm0, %v1081_v58, %v1083_v4  ;;  %3136 = vmatpush3.bf16.msra.mxu0 %v3135_v44  ;;  %3166 = vmatprep.subr.bf16.mxu1 %v3165_v34  ;;  %v3137_v11 = vpack.c.bf16 %v1890_v30, %v1889_v53  ;;  %v1922_v23 = vld [vmem:[%s5191_s5 + $0x1f8] sm:$0xff] }
 0x197   :  { %v952_v3 = vmax.f32 %v934_v35, 0.0  ;;  %1413 = vmatprep.mubr.f32.mxu0 %v1082_v13  ;;  %v1194_v19 = vsel %vm227_vm1, %v1192_v32, %v1193_v10  ;;  %v1138_v29 = vsel %vm170_vm5, %v1136_v0, %v1137_v22  ;;  %v1025_v7 = vsel %vm969_vm7, 0.0, %v991_v59  ;;  %3168 = vmatpush3.bf16.msra.mxu1 %v3167_v16 }
 0x198   :  { %1558 = vmatprep.mubr.f32.mxu1 %v1194_v19  ;;  %v1196_v28 = vsel %vm227_vm1, %v1193_v10, %v1195_v41  ;;  %v1140_v56 = vsel %vm170_vm5, %v1137_v22, %v1139_v6  ;;  %v1085_v42 = vrot.slane %v1025_v7, 1  ;;  %v1197_v5 = vrot.slane %v1025_v7, 3  ;;  %3138 = vmatprep.subr.bf16.mxu0 %v3137_v11  ;;  %v2343_v11 = vld [vmem:[%s5193_s7 + $0x10] sm:$0xff] }
 0x199   :  { %v992_v36 = vrot.slane %v952_v3, 7  ;;  %2504 = vmatmul.mubr.msk.f32.gmra.mrb[56].mxu0 %vm4536_vm8, %v988_v60  ;;  %1559 = vmatmul.mubr.f32.gmra.mrb[56].mxu1 %v1138_v29  ;;  %v1141_v52 = vrot.slane %v1025_v7, 2  ;;  %v3139_v24 = vpack.c.bf16 %v1874_v33, %v1873_v39  ;;  %v3169_v47 = vpack.c.bf16 %v1922_v23, %v1921_v15 }
 0x19a   :  { %1418 = vmatprep.mubr.f32.mxu0 %v1084_v2  ;;  %1563 = vmatprep.mubr.f32.mxu1 %v1196_v28  ;;  %v3171_v31 = vpack.c.bf16 %v1906_v57, %v1905_v62  ;;  %v5208_v32 = vmov 0.0|0.0  }
 0x19b   :  { %v993_v40 = vsel %vm969_vm7, %v991_v59, %v992_v36  ;;  %v1033_v8 = vsel %vm969_vm7, %v992_v36, 0.0  ;;  %3140 = vmatpush3.bf16.msra.mxu0 %v3139_v24  ;;  %3170 = vmatprep.subr.bf16.mxu1 %v3169_v47 }
 0x19c   :  { %v1088_v46 = vrot.slane %v1033_v8, 1  ;;  %v1144_v50 = vrot.slane %v1033_v8, 2  ;;  %v1200_v51 = vrot.slane %v1033_v8, 3  ;;  %v1086_v17 = vrot.slane %v993_v40, 1  ;;  %3172 = vmatpush3.bf16.msra.mxu1 %v3171_v31  ;;  %3173 = vmatprep.subr.bf16.mxu0 %v5208_v32 }
 0x19d   :  { %1419 = vmatmul.mubr.f32.gmra.mrb[58].mxu0 %v990_v20  ;;  %v1198_v38 = vrot.slane %v993_v40, 3  ;;  %v1142_v9 = vrot.slane %v993_v40, 2  ;;  %1564 = vmatmul.mubr.f32.gmra.mrb[58].mxu1 %v1140_v56 }
 0x19e   :  { %v1087_v61 = vsel %vm81_vm0, %v1085_v42, %v1086_v17  ;;  %v1089_v1 = vsel %vm81_vm0, %v1086_v17, %v1088_v46  ;;  %vm2378_vm0 = vcmask 1044484  }
 0x19f   :  { %1423 = vmatprep.mubr.f32.mxu0 %v1087_v61  ;;  %v1199_v54 = vsel %vm227_vm1, %v1197_v5, %v1198_v38  ;;  %v1143_v14 = vsel %vm170_vm5, %v1141_v52, %v1142_v9  ;;  %v1201_v21 = vsel %vm227_vm1, %v1198_v38, %v1200_v51  ;;  %v1145_v60 = vsel %vm170_vm5, %v1142_v9, %v1144_v50 }
 0x1a0   :  { %1568 = vmatprep.mubr.f32.mxu1 %v1199_v54  ;;  %vm2380_vm1 = vcmask 1045509  }
 0x1a1   :  { %2506 = vmatmul.mubr.msk.f32.gmra.mrb[60].mxu0 %vm4536_vm8, %v991_v59  ;;  %1569 = vmatmul.mubr.f32.gmra.mrb[60].mxu1 %v1143_v14 }
 0x1a2   :  { %1428 = vmatprep.mubr.f32.mxu0 %v1089_v1  ;;  %1573 = vmatprep.mubr.f32.mxu1 %v1201_v21 }
 0x1a5   :  { %1429 = vmatmul.mubr.f32.gmra.mrb[62].mxu0 %v993_v40  ;;  %1574 = vmatmul.mubr.f32.gmra.mrb[62].mxu1 %v1145_v60 }
 0x23a   :  { %v2637_v0 = vpop.f32.mrb[32].mxu0 }
 0x23b   :  { %v2717_v20 = vpop.f32.mrb[32].mxu1  ;;  %v2638_v55 = vpop.f32.mrb[33].mxu0 }
 0x23c   :  { %v2639_v45 = vadd.f32 %v2638_v55, %v2637_v0  ;;  %v2718_v4 = vpop.f32.mrb[33].mxu1 }
 0x23d   :  { %v2719_v6 = vadd.f32 %v2718_v4, %v2717_v20 }
 0x23e   :  { %v1356_v41 = vadd.f32 %v2639_v45, %v4919_v27  ;;  %v2640_v58 = vpop.f32.mrb[34].mxu0 }
 0x23f   :  { %v2720_v59 = vpop.f32.mrb[34].mxu1  ;;  %v2641_v35 = vpop.f32.mrb[35].mxu0 }
 0x240   :  { %v1501_v10 = vadd.f32 %v2719_v6, %v1356_v41  ;;  %v2642_v22 = vadd.f32 %v2641_v35, %v2640_v58  ;;  %v2721_v13 = vpop.f32.mrb[35].mxu1 }
 0x241   :  { %v2722_v2 = vadd.f32 %v2721_v13, %v2720_v59 }
 0x242   :  { %v1579_v3 = vmax.f32 %v1501_v10, 0.0  ;;  %v1361_v19 = vadd.f32 %v2642_v22, %v4919_v27  ;;  %v2643_v29 = vpop.f32.mrb[36].mxu0 }
 0x243   :  { %v2723_v7 = vpop.f32.mrb[36].mxu1  ;;  %v2644_v28 = vpop.f32.mrb[37].mxu0 }
 0x244   :  { %v1611_v56 = vrot.slane %v1579_v3, 6  ;;  %v1506_v36 = vadd.f32 %v2722_v2, %v1361_v19  ;;  %v2645_v40 = vadd.f32 %v2644_v28, %v2643_v29  ;;  %v2724_v8 = vpop.f32.mrb[37].mxu1 }
 0x245   :  { %v2725_v42 = vadd.f32 %v2724_v8, %v2723_v7 }
 0x246   :  { %v1659_v46 = vsel %vm462_vm3, 0.0, %v1611_v56  ;;  %v1580_v50 = vmax.f32 %v1506_v36, 0.0  ;;  %v1366_v51 = vadd.f32 %v2645_v40, %v4919_v27  ;;  %v2646_v17 = vpop.f32.mrb[38].mxu0 }
 0x247   :  { %v2726_v5 = vpop.f32.mrb[38].mxu1  ;;  %v2647_v38 = vpop.f32.mrb[39].mxu0  ;;  %v1691_v14 = vrot.slane %v1659_v46, 2  ;;  %v1803_v21 = vrot.slane %v1659_v46, 6  ;;  %v1747_v60 = vrot.slane %v1659_v46, 4 }
 0x248   :  { %v1612_v52 = vrot.slane %v1580_v50, 6  ;;  %v1511_v9 = vadd.f32 %v2725_v42, %v1366_v51  ;;  %v2648_v61 = vadd.f32 %v2647_v38, %v2646_v17  ;;  %v2727_v1 = vpop.f32.mrb[39].mxu1 }
 0x249   :  { %v2728_v54 = vadd.f32 %v2727_v1, %v2726_v5 }
 0x24a   :  { %v1613_v37 = vsel %vm462_vm3, %v1611_v56, %v1612_v52  ;;  %v1667_v48 = vsel %vm462_vm3, %v1612_v52, 0.0  ;;  %v1581_v26 = vmax.f32 %v1511_v9, 0.0  ;;  %v1371_v63 = vadd.f32 %v2648_v61, %v4919_v27 }
 0x24b   :  { %v2649_v18 = vpop.f32.mrb[40].mxu0  ;;  %v2729_v12 = vpop.f32.mrb[40].mxu1  ;;  %v1692_v44 = vrot.slane %v1613_v37, 2  ;;  %v1804_v34 = vrot.slane %v1613_v37, 6  ;;  %v1748_v49 = vrot.slane %v1613_v37, 4  ;;  %v1694_v43 = vrot.slane %v1667_v48, 2 }
 0x24c   :  { %v2650_v25 = vpop.f32.mrb[41].mxu0  ;;  %v4928_v16 = vrot.slane %v1581_v26, 6  ;;  %v1516_v53 = vadd.f32 %v2728_v54, %v1371_v63  ;;  %v2730_v15 = vpop.f32.mrb[41].mxu1  ;;  %v1806_v39 = vrot.slane %v1667_v48, 6  ;;  %v1750_v6 = vrot.slane %v1667_v48, 4 }
 0x24d   :  { %v2651_v30 = vadd.f32 %v2650_v25, %v2649_v18  ;;  %v2731_v33 = vadd.f32 %v2730_v15, %v2729_v12  ;;  %v1693_v23 = vsel %vm170_vm5, %v1691_v14, %v1692_v44  ;;  %v1805_v24 = vsel %vm462_vm3, %v1803_v21, %v1804_v34 }
 0x24e   :  { %v1749_v47 = vsel %vm316_vm6, %v1747_v60, %v1748_v49  ;;  %v1660_v62 = vsel %vm462_vm3, 0.0, %v4928_v16  ;;  %v1582_v57 = vmax.f32 %v1516_v53, 0.0  ;;  %1994 = vmatprep.mubr.f32.mxu0 %v1693_v23  ;;  %2139 = vmatprep.mubr.f32.mxu1 %v1805_v24  ;;  %v1695_v20 = vsel %vm170_vm5, %v1692_v44, %v1694_v43 }
 0x24f   :  { %v1376_v31 = vadd.f32 %v2651_v30, %v4919_v27  ;;  %v2652_v0 = vpop.f32.mrb[42].mxu0  ;;  %v2732_v55 = vpop.f32.mrb[42].mxu1  ;;  %2509 = vmatmul.mubr.msk.f32.vlgmr.msra.gmra.mrb[64].mxu0 %vm4931_vm9, %v1611_v56  ;;  %2140 = vmatmul.mubr.f32.vlgmr.msra.gmra.mrb[64].mxu1 %v1749_v47  ;;  %v1807_v4 = vsel %vm462_vm3, %v1804_v34, %v1806_v39  ;;  %v1696_v10 = vrot.slane %v1660_v62, 2  ;;  %v1751_v13 = vsel %vm316_vm6, %v1748_v49, %v1750_v6 }
 0x250   :  { %v2653_v45 = vpop.f32.mrb[43].mxu0  ;;  %v1615_v41 = vrot.slane %v1582_v57, 6  ;;  %v2733_v35 = vpop.f32.mrb[43].mxu1  ;;  %1999 = vmatprep.mubr.f32.mxu0 %v1695_v20  ;;  %2144 = vmatprep.mubr.f32.mxu1 %v1807_v4  ;;  %v1808_v2 = vrot.slane %v1660_v62, 6  ;;  %v1752_v3 = vrot.slane %v1660_v62, 4 }
 0x251   :  { %v1521_v58 = vadd.f32 %v2731_v33, %v1376_v31  ;;  %v2654_v59 = vadd.f32 %v2653_v45, %v2652_v0  ;;  %v2734_v22 = vadd.f32 %v2733_v35, %v2732_v55 }
 0x252   :  { %v1616_v19 = vsel %vm462_vm3, %v4928_v16, %v1615_v41  ;;  %v1668_v29 = vsel %vm462_vm3, %v1615_v41, 0.0 }
 0x253   :  { %v1583_v7 = vmax.f32 %v1521_v58, 0.0  ;;  %v1381_v28 = vadd.f32 %v2654_v59, %v4919_v27  ;;  %v2655_v56 = vpop.f32.mrb[44].mxu0  ;;  %2000 = vmatmul.mubr.f32.gmra.mrb[66].mxu0 %v1613_v37  ;;  %2145 = vmatmul.mubr.f32.gmra.mrb[66].mxu1 %v1751_v13  ;;  %v1697_v8 = vrot.slane %v1616_v19, 2  ;;  %v1809_v42 = vrot.slane %v1616_v19, 6 }
 0x254   :  { %v2735_v36 = vpop.f32.mrb[44].mxu1  ;;  %v2656_v40 = vpop.f32.mrb[45].mxu0  ;;  %v1753_v46 = vrot.slane %v1616_v19, 4  ;;  %v1699_v50 = vrot.slane %v1668_v29, 2  ;;  %v1811_v52 = vrot.slane %v1668_v29, 6  ;;  %v1755_v12 = vrot.slane %v1668_v29, 4 }
 0x255   :  { %v4950_v51 = vrot.slane %v1583_v7, 6  ;;  %v1526_v17 = vadd.f32 %v2734_v22, %v1381_v28  ;;  %v2657_v5 = vadd.f32 %v2656_v40, %v2655_v56  ;;  %v2736_v38 = vpop.f32.mrb[45].mxu1  ;;  %v1698_v61 = vsel %vm170_vm5, %v1696_v10, %v1697_v8 }
 0x256   :  { %v2737_v9 = vadd.f32 %v2736_v38, %v2735_v36  ;;  %v1810_v1 = vsel %vm462_vm3, %v1808_v2, %v1809_v42  ;;  %v1754_v54 = vsel %vm316_vm6, %v1752_v3, %v1753_v46  ;;  %2004 = vmatprep.mubr.f32.mxu0 %v1698_v61  ;;  %v1700_v48 = vsel %vm170_vm5, %v1697_v8, %v1699_v50 }
 0x257   :  { %v1661_v14 = vsel %vm462_vm3, 0.0, %v4950_v51  ;;  %v1584_v21 = vmax.f32 %v1526_v17, 0.0  ;;  %v1386_v60 = vadd.f32 %v2657_v5, %v4919_v27  ;;  %v2658_v37 = vpop.f32.mrb[46].mxu0  ;;  %2149 = vmatprep.mubr.f32.mxu1 %v1810_v1  ;;  %2511 = vmatmul.mubr.msk.f32.gmra.mrb[68].mxu0 %vm4931_vm9, %v4928_v16  ;;  %v1812_v18 = vsel %vm462_vm3, %v1809_v42, %v1811_v52 }
 0x258   :  { %v2738_v26 = vpop.f32.mrb[46].mxu1  ;;  %v2659_v63 = vpop.f32.mrb[47].mxu0  ;;  %2150 = vmatmul.mubr.f32.gmra.mrb[68].mxu1 %v1754_v54  ;;  %2009 = vmatprep.mubr.f32.mxu0 %v1700_v48  ;;  %v1701_v43 = vrot.slane %v1661_v14, 2  ;;  %v1756_v30 = vsel %vm316_vm6, %v1753_v46, %v1755_v12  ;;  %v1813_v15 = vrot.slane %v1661_v14, 6  ;;  %v1757_v39 = vrot.slane %v1661_v14, 4 }
 0x259   :  { %v1618_v25 = vrot.slane %v1584_v21, 6  ;;  %v1531_v44 = vadd.f32 %v2737_v9, %v1386_v60  ;;  %v2660_v34 = vadd.f32 %v2659_v63, %v2658_v37  ;;  %v2739_v49 = vpop.f32.mrb[47].mxu1  ;;  %2154 = vmatprep.mubr.f32.mxu1 %v1812_v18 }
 0x25a   :  { %v2740_v53 = vadd.f32 %v2739_v49, %v2738_v26 }
 0x25b   :  { %v1619_v33 = vsel %vm462_vm3, %v4950_v51, %v1618_v25  ;;  %v1669_v16 = vsel %vm462_vm3, %v1618_v25, 0.0  ;;  %v1585_v23 = vmax.f32 %v1531_v44, 0.0  ;;  %v1391_v24 = vadd.f32 %v2660_v34, %v4919_v27  ;;  %2010 = vmatmul.mubr.f32.gmra.mrb[70].mxu0 %v1616_v19 }
 0x25c   :  { %v2661_v47 = vpop.f32.mrb[48].mxu0  ;;  %v2741_v62 = vpop.f32.mrb[48].mxu1  ;;  %2155 = vmatmul.mubr.f32.gmra.mrb[70].mxu1 %v1756_v30  ;;  %v1702_v31 = vrot.slane %v1619_v33, 2  ;;  %v1814_v0 = vrot.slane %v1619_v33, 6  ;;  %v1758_v20 = vrot.slane %v1619_v33, 4  ;;  %v1704_v55 = vrot.slane %v1669_v16, 2 }
 0x25d   :  { %v2662_v57 = vpop.f32.mrb[49].mxu0  ;;  %v4968_v45 = vrot.slane %v1585_v23, 6  ;;  %v1536_v4 = vadd.f32 %v2740_v53, %v1391_v24  ;;  %v2742_v41 = vpop.f32.mrb[49].mxu1  ;;  %v1816_v58 = vrot.slane %v1669_v16, 6  ;;  %v1760_v36 = vrot.slane %v1669_v16, 4 }
 0x25e   :  { %v2663_v6 = vadd.f32 %v2662_v57, %v2661_v47  ;;  %v2743_v59 = vadd.f32 %v2742_v41, %v2741_v62  ;;  %v1703_v35 = vsel %vm170_vm5, %v1701_v43, %v1702_v31  ;;  %v1815_v10 = vsel %vm462_vm3, %v1813_v15, %v1814_v0 }
 0x25f   :  { %v1759_v22 = vsel %vm316_vm6, %v1757_v39, %v1758_v20  ;;  %v1662_v13 = vsel %vm462_vm3, 0.0, %v4968_v45  ;;  %v1586_v2 = vmax.f32 %v1536_v4, 0.0  ;;  %2014 = vmatprep.mubr.f32.mxu0 %v1703_v35  ;;  %2159 = vmatprep.mubr.f32.mxu1 %v1815_v10  ;;  %v1705_v29 = vsel %vm170_vm5, %v1702_v31, %v1704_v55 }
 0x260   :  { %v1396_v3 = vadd.f32 %v2663_v6, %v4919_v27  ;;  %v2664_v19 = vpop.f32.mrb[50].mxu0  ;;  %v2744_v7 = vpop.f32.mrb[50].mxu1  ;;  %2513 = vmatmul.mubr.msk.f32.gmra.mrb[72].mxu0 %vm4931_vm9, %v4950_v51  ;;  %2160 = vmatmul.mubr.f32.gmra.mrb[72].mxu1 %v1759_v22  ;;  %v1817_v56 = vsel %vm462_vm3, %v1814_v0, %v1816_v58  ;;  %v1706_v50 = vrot.slane %v1662_v13, 2  ;;  %v1761_v5 = vsel %vm316_vm6, %v1758_v20, %v1760_v36 }
 0x261   :  { %v2665_v28 = vpop.f32.mrb[51].mxu0  ;;  %v1621_v40 = vrot.slane %v1586_v2, 6  ;;  %v2745_v46 = vpop.f32.mrb[51].mxu1  ;;  %2019 = vmatprep.mubr.f32.mxu0 %v1705_v29  ;;  %2164 = vmatprep.mubr.f32.mxu1 %v1817_v56  ;;  %v1818_v38 = vrot.slane %v1662_v13, 6  ;;  %v1762_v52 = vrot.slane %v1662_v13, 4 }
 0x262   :  { %v1541_v8 = vadd.f32 %v2743_v59, %v1396_v3  ;;  %v2666_v42 = vadd.f32 %v2665_v28, %v2664_v19  ;;  %v2746_v17 = vadd.f32 %v2745_v46, %v2744_v7 }
 0x263   :  { %v1622_v9 = vsel %vm462_vm3, %v4968_v45, %v1621_v40  ;;  %v1670_v51 = vsel %vm462_vm3, %v1621_v40, 0.0 }
 0x264   :  { %v1587_v61 = vmax.f32 %v1541_v8, 0.0  ;;  %v1401_v1 = vadd.f32 %v2666_v42, %v4919_v27  ;;  %v2667_v54 = vpop.f32.mrb[52].mxu0  ;;  %v2747_v14 = vpop.f32.mrb[52].mxu1  ;;  %2020 = vmatmul.mubr.f32.gmra.mrb[74].mxu0 %v1619_v33  ;;  %2165 = vmatmul.mubr.f32.gmra.mrb[74].mxu1 %v1761_v5  ;;  %v1707_v60 = vrot.slane %v1622_v9, 2  ;;  %v1819_v37 = vrot.slane %v1622_v9, 6 }
 0x265   :  { %v2668_v21 = vpop.f32.mrb[53].mxu0  ;;  %v1763_v48 = vrot.slane %v1622_v9, 4  ;;  %v1709_v26 = vrot.slane %v1670_v51, 2  ;;  %v2748_v25 = vpop.f32.mrb[53].mxu1  ;;  %v1821_v44 = vrot.slane %v1670_v51, 6  ;;  %v1765_v62 = vrot.slane %v1670_v51, 4 }
 0x266   :  { %v4986_v63 = vrot.slane %v1587_v61, 6  ;;  %v1546_v18 = vadd.f32 %v2746_v17, %v1401_v1  ;;  %v2669_v12 = vadd.f32 %v2668_v21, %v2667_v54  ;;  %v2749_v34 = vadd.f32 %v2748_v25, %v2747_v14 }
 0x267   :  { %v1708_v49 = vsel %vm170_vm5, %v1706_v50, %v1707_v60  ;;  %v1820_v43 = vsel %vm462_vm3, %v1818_v38, %v1819_v37  ;;  %v1764_v53 = vsel %vm316_vm6, %v1762_v52, %v1763_v48  ;;  %v1710_v16 = vsel %vm170_vm5, %v1707_v60, %v1709_v26 }
 0x268   :  { %v1663_v30 = vsel %vm462_vm3, 0.0, %v4986_v63  ;;  %v1588_v15 = vmax.f32 %v1546_v18, 0.0  ;;  %v1406_v39 = vadd.f32 %v2669_v12, %v4919_v27  ;;  %v2670_v33 = vpop.f32.mrb[54].mxu0  ;;  %2024 = vmatprep.mubr.f32.mxu0 %v1708_v49  ;;  %2169 = vmatprep.mubr.f32.mxu1 %v1820_v43  ;;  %v2750_v23 = vpop.f32.mrb[54].mxu1  ;;  %v1822_v47 = vsel %vm462_vm3, %v1819_v37, %v1821_v44 }
 0x269   :  { %v2671_v24 = vpop.f32.mrb[55].mxu0  ;;  %2515 = vmatmul.mubr.msk.f32.gmra.mrb[76].mxu0 %vm4931_vm9, %v4968_v45  ;;  %2170 = vmatmul.mubr.f32.gmra.mrb[76].mxu1 %v1764_v53  ;;  %v2751_v20 = vpop.f32.mrb[55].mxu1  ;;  %v1711_v55 = vrot.slane %v1663_v30, 2  ;;  %v1766_v6 = vsel %vm316_vm6, %v1763_v48, %v1765_v62  ;;  %v1823_v41 = vrot.slane %v1663_v30, 6  ;;  %v1767_v58 = vrot.slane %v1663_v30, 4 }
 0x26a   :  { %v1624_v57 = vrot.slane %v1588_v15, 6  ;;  %v1551_v31 = vadd.f32 %v2749_v34, %v1406_v39  ;;  %v2672_v0 = vadd.f32 %v2671_v24, %v2670_v33  ;;  %2029 = vmatprep.mubr.f32.mxu0 %v1710_v16  ;;  %2174 = vmatprep.mubr.f32.mxu1 %v1822_v47  ;;  %v2752_v4 = vadd.f32 %v2751_v20, %v2750_v23 }
 0x26c   :  { %v1625_v59 = vsel %vm462_vm3, %v4986_v63, %v1624_v57  ;;  %v1671_v45 = vsel %vm462_vm3, %v1624_v57, 0.0  ;;  %v1589_v35 = vmax.f32 %v1551_v31, 0.0  ;;  %v1411_v10 = vadd.f32 %v2672_v0, %v4919_v27  ;;  %v2673_v22 = vpop.f32.mrb[56].mxu0  ;;  %v2753_v13 = vpop.f32.mrb[56].mxu1 }
 0x26d   :  { %v2674_v2 = vpop.f32.mrb[57].mxu0  ;;  %2030 = vmatmul.mubr.f32.gmra.mrb[78].mxu0 %v1622_v9  ;;  %2175 = vmatmul.mubr.f32.gmra.mrb[78].mxu1 %v1766_v6  ;;  %v1712_v3 = vrot.slane %v1625_v59, 2  ;;  %v1824_v19 = vrot.slane %v1625_v59, 6  ;;  %v1768_v29 = vrot.slane %v1625_v59, 4  ;;  %v1714_v7 = vrot.slane %v1671_v45, 2  ;;  %v2754_v40 = vpop.f32.mrb[57].mxu1 }
 0x26e   :  { %v5004_v28 = vrot.slane %v1589_v35, 6  ;;  %v1556_v56 = vadd.f32 %v2752_v4, %v1411_v10  ;;  %v2675_v36 = vadd.f32 %v2674_v2, %v2673_v22  ;;  %v1826_v8 = vrot.slane %v1671_v45, 6 }
 0x26f   :  { %v2755_v42 = vadd.f32 %v2754_v40, %v2753_v13  ;;  %v1713_v46 = vsel %vm170_vm5, %v1711_v55, %v1712_v3  ;;  %v1825_v50 = vsel %vm462_vm3, %v1823_v41, %v1824_v19  ;;  %v1769_v17 = vsel %vm316_vm6, %v1767_v58, %v1768_v29 }
 0x270   :  { %v1664_v5 = vsel %vm462_vm3, 0.0, %v5004_v28  ;;  %v1590_v38 = vmax.f32 %v1556_v56, 0.0  ;;  %v1416_v52 = vadd.f32 %v2675_v36, %v4919_v27  ;;  %v2676_v9 = vpop.f32.mrb[58].mxu0  ;;  %2034 = vmatprep.mubr.f32.mxu0 %v1713_v46  ;;  %2179 = vmatprep.mubr.f32.mxu1 %v1825_v50  ;;  %v1715_v51 = vsel %vm170_vm5, %v1712_v3, %v1714_v7  ;;  %v2756_v61 = vpop.f32.mrb[58].mxu1 }
 0x271   :  { %v2677_v1 = vpop.f32.mrb[59].mxu0  ;;  %2517 = vmatmul.mubr.msk.f32.gmra.mrb[80].mxu0 %vm4931_vm9, %v4986_v63  ;;  %2180 = vmatmul.mubr.f32.gmra.mrb[80].mxu1 %v1769_v17  ;;  %v1827_v54 = vsel %vm462_vm3, %v1824_v19, %v1826_v8  ;;  %v1770_v14 = vrot.slane %v1671_v45, 4  ;;  %v2757_v48 = vpop.f32.mrb[59].mxu1  ;;  %v1716_v26 = vrot.slane %v1664_v5, 2  ;;  %v1828_v25 = vrot.slane %v1664_v5, 6 }
 0x272   :  { %v1627_v21 = vrot.slane %v1590_v38, 6  ;;  %v1561_v60 = vadd.f32 %v2755_v42, %v1416_v52  ;;  %v2678_v37 = vadd.f32 %v2677_v1, %v2676_v9  ;;  %2039 = vmatprep.mubr.f32.mxu0 %v1715_v51  ;;  %2184 = vmatprep.mubr.f32.mxu1 %v1827_v54  ;;  %v2758_v18 = vadd.f32 %v2757_v48, %v2756_v61 }
 0x273   :  { %v1771_v12 = vsel %vm316_vm6, %v1768_v29, %v1770_v14  ;;  %v1772_v44 = vrot.slane %v1664_v5, 4 }
 0x274   :  { %v1628_v34 = vsel %vm462_vm3, %v5004_v28, %v1627_v21  ;;  %v1672_v63 = vsel %vm462_vm3, %v1627_v21, 0.0  ;;  %v1591_v49 = vmax.f32 %v1561_v60, 0.0  ;;  %v1421_v43 = vadd.f32 %v2678_v37, %v4919_v27  ;;  %v2679_v53 = vpop.f32.mrb[60].mxu0  ;;  %v2759_v30 = vpop.f32.mrb[60].mxu1 }
 0x275   :  { %v2680_v15 = vpop.f32.mrb[61].mxu0  ;;  %2040 = vmatmul.mubr.f32.gmra.mrb[82].mxu0 %v1625_v59  ;;  %2185 = vmatmul.mubr.f32.gmra.mrb[82].mxu1 %v1771_v12  ;;  %v1717_v39 = vrot.slane %v1628_v34, 2  ;;  %v1829_v33 = vrot.slane %v1628_v34, 6  ;;  %v1773_v16 = vrot.slane %v1628_v34, 4  ;;  %v1719_v23 = vrot.slane %v1672_v63, 2  ;;  %v2760_v57 = vpop.f32.mrb[61].mxu1 }
 0x276   :  { %v1629_v24 = vrot.slane %v1591_v49, 6  ;;  %v1566_v47 = vadd.f32 %v2758_v18, %v1421_v43  ;;  %v2681_v62 = vadd.f32 %v2680_v15, %v2679_v53  ;;  %v1831_v31 = vrot.slane %v1672_v63, 6 }
 0x277   :  { %v2761_v0 = vadd.f32 %v2760_v57, %v2759_v30  ;;  %v1718_v20 = vsel %vm170_vm5, %v1716_v26, %v1717_v39  ;;  %v1830_v55 = vsel %vm462_vm3, %v1828_v25, %v1829_v33  ;;  %v1774_v4 = vsel %vm316_vm6, %v1772_v44, %v1773_v16  ;;  %v2341_v57 = vld [vmem:[%s5193_s7] sm:$0xff] }
 0x278   :  { %v1665_v6 = vsel %vm462_vm3, 0.0, %v1629_v24  ;;  %v1592_v41 = vmax.f32 %v1566_v47, 0.0  ;;  %v1426_v58 = vadd.f32 %v2681_v62, %v4919_v27  ;;  %v2682_v59 = vpop.f32.mrb[62].mxu0  ;;  %2044 = vmatprep.mubr.f32.mxu0 %v1718_v20  ;;  %2189 = vmatprep.mubr.f32.mxu1 %v1830_v55  ;;  %v1720_v45 = vsel %vm170_vm5, %v1717_v39, %v1719_v23  ;;  %v2762_v35 = vpop.f32.mrb[62].mxu1  ;;  %v2344_v20 = vld [vmem:[%s5193_s7 + $0x18] sm:$0xff] }
 0x279   :  { %v2683_v10 = vpop.f32.mrb[63].mxu0  ;;  %2519 = vmatmul.mubr.msk.f32.gmra.mrb[84].mxu0 %vm4931_vm9, %v5004_v28  ;;  %2190 = vmatmul.mubr.f32.gmra.mrb[84].mxu1 %v1774_v4  ;;  %v1832_v22 = vsel %vm462_vm3, %v1829_v33, %v1831_v31  ;;  %v1775_v13 = vrot.slane %v1672_v63, 4  ;;  %v2763_v29 = vpop.f32.mrb[63].mxu1  ;;  %v1721_v7 = vrot.slane %v1665_v6, 2  ;;  %v1833_v40 = vrot.slane %v1665_v6, 6  ;;  %v2342_v31 = vld [vmem:[%s5193_s7 + $0x8] sm:$0xff] }
 0x27a   :  { %v1630_v2 = vrot.slane %v1592_v41, 6  ;;  %v1571_v3 = vadd.f32 %v2761_v0, %v1426_v58  ;;  %v2684_v19 = vadd.f32 %v2683_v10, %v2682_v59  ;;  %2049 = vmatprep.mubr.f32.mxu0 %v1720_v45  ;;  %2194 = vmatprep.mubr.f32.mxu1 %v1832_v22  ;;  %v2764_v56 = vadd.f32 %v2763_v29, %v2762_v35  ;;  %v2345_v4 = vld [vmem:[%s5193_s7 + $0x20] sm:$0xff]  ;;  %v2347_v58 = vld [vmem:[%s5193_s7 + $0x30] sm:$0xff]  ;;  %v2348_v59 = vld [vmem:[%s5193_s7 + $0x38] sm:$0xff] }
 0x27b   :  { %v1776_v36 = vsel %vm316_vm6, %v1773_v16, %v1775_v13  ;;  %v1777_v8 = vrot.slane %v1665_v6, 4  ;;  %v3174_v0 = vpack.c.bf16 %v2342_v31, %v2341_v57  ;;  %v3177_v55 = vpack.c.bf16 %v2344_v20, %v2343_v11  ;;  %v2346_v6 = vld [vmem:[%s5193_s7 + $0x28] sm:$0xff]  ;;  %v2349_v35 = vld [vmem:[%s5193_s7 + $0x40] sm:$0xff]  ;;  %v2351_v13 = vld [vmem:[%s5193_s7 + $0x50] sm:$0xff] }
 0x27c   :  { %v1631_v42 = vsel %vm462_vm3, %v1629_v24, %v1630_v2  ;;  %v1673_v28 = vsel %vm462_vm3, %v1630_v2, 0.0  ;;  %v1593_v46 = vmax.f32 %v1571_v3, 0.0  ;;  %v1431_v50 = vadd.f32 %v2684_v19, %v4919_v27  ;;  %v2350_v10 = vld [vmem:[%s5193_s7 + $0x48] sm:$0xff]  ;;  %v2352_v2 = vld [vmem:[%s5193_s7 + $0x58] sm:$0xff]  ;;  %v2353_v19 = vld [vmem:[%s5193_s7 + $0x60] sm:$0xff] }
 0x27d   :  { %2050 = vmatmul.mubr.f32.gmra.mrb[86].mxu0 %v1628_v34  ;;  %2195 = vmatmul.mubr.f32.gmra.mrb[86].mxu1 %v1776_v36  ;;  %v1722_v17 = vrot.slane %v1631_v42, 2  ;;  %v1834_v5 = vrot.slane %v1631_v42, 6  ;;  %v1778_v38 = vrot.slane %v1631_v42, 4  ;;  %v1724_v52 = vrot.slane %v1673_v28, 2  ;;  %v2354_v29 = vld [vmem:[%s5193_s7 + $0x68] sm:$0xff]  ;;  %v2356_v36 = vld [vmem:[%s5193_s7 + $0x78] sm:$0xff] }
 0x27e   :  { %v1632_v9 = vrot.slane %v1593_v46, 6  ;;  %v1576_v51 = vadd.f32 %v2764_v56, %v1431_v50  ;;  %v1836_v61 = vrot.slane %v1673_v28, 6  ;;  %v1780_v1 = vrot.slane %v1673_v28, 4  ;;  %3175 = vmatpush3.bf16.msra.mxu0 %v3174_v0  ;;  %v2355_v56 = vld [vmem:[%s5193_s7 + $0x70] sm:$0xff]  ;;  %v5113_v50 = vld [vmem:[%s5192_s6] ss:$0 sm:$0xff] }
 0x27f   :  { %v1723_v54 = vsel %vm170_vm5, %v1721_v7, %v1722_v17  ;;  %v1835_v14 = vsel %vm462_vm3, %v1833_v40, %v1834_v5  ;;  %v1779_v21 = vsel %vm316_vm6, %v1777_v8, %v1778_v38  ;;  %v1725_v60 = vsel %vm170_vm5, %v1722_v17, %v1724_v52  ;;  %3176 = vmatprep.subr.bf16.mxu0 %v5208_v32 }
 0x280   :  { %v1666_v27 = vsel %vm462_vm3, 0.0, %v1632_v9  ;;  %v1594_v37 = vmax.f32 %v1576_v51, 0.0  ;;  %2054 = vmatprep.mubr.f32.mxu0 %v1723_v54  ;;  %2199 = vmatprep.mubr.f32.mxu1 %v1835_v14  ;;  %v1837_v48 = vsel %vm462_vm3, %v1834_v5, %v1836_v61  ;;  %v1781_v26 = vsel %vm316_vm6, %v1778_v38, %v1780_v1 }
 0x281   :  { %2521 = vmatmul.mubr.msk.f32.gmra.mrb[88].mxu0 %vm4931_vm9, %v1629_v24  ;;  %2200 = vmatmul.mubr.f32.gmra.mrb[88].mxu1 %v1779_v21  ;;  %v1726_v12 = vrot.slane %v1666_v27, 2  ;;  %v1838_v34 = vrot.slane %v1666_v27, 6  ;;  %v1782_v63 = vrot.slane %v1666_v27, 4  ;;  %v3180_v41 = vpack.c.bf16 %v2346_v6, %v2345_v4 }
 0x282   :  { %v1633_v18 = vrot.slane %v1594_v37, 6  ;;  %2059 = vmatprep.mubr.f32.mxu0 %v1725_v60  ;;  %2204 = vmatprep.mubr.f32.mxu1 %v1837_v48  ;;  %v3183_v45 = vpack.c.bf16 %v2348_v59, %v2347_v58  ;;  %v3186_v22 = vpack.c.bf16 %v2350_v10, %v2349_v35  ;;  %v3189_v3 = vpack.c.bf16 %v2352_v2, %v2351_v13 }
 0x283   :  { %3178 = vmatpush3.bf16.msra.mxu0 %v3177_v55  ;;  %v3192_v7 = vpack.c.bf16 %v2354_v29, %v2353_v19  ;;  %v3357_v40 = vmov 0.0   ;;  %v3195_v8 = vpack.c.bf16 %v2356_v36, %v2355_v56 }
 0x284   :  { %v1634_v25 = vsel %vm462_vm3, %v1632_v9, %v1633_v18  ;;  %v1674_v44 = vsel %vm462_vm3, %v1633_v18, 0.0  ;;  %3179 = vmatprep.subr.bf16.mxu0 %v5208_v32 }
 0x285   :  { %2060 = vmatmul.mubr.f32.gmra.mrb[90].mxu0 %v1631_v42  ;;  %2205 = vmatmul.mubr.f32.gmra.mrb[90].mxu1 %v1781_v26  ;;  %v1727_v49 = vrot.slane %v1634_v25, 2  ;;  %v1839_v43 = vrot.slane %v1634_v25, 6  ;;  %v1783_v53 = vrot.slane %v1634_v25, 4  ;;  %v1729_v30 = vrot.slane %v1674_v44, 2 }
 0x286   :  { %v1841_v15 = vrot.slane %v1674_v44, 6  ;;  %v1785_v39 = vrot.slane %v1674_v44, 4  ;;  %v2236_v42 = vlaneseq }
 0x287   :  { %v1728_v33 = vsel %vm170_vm5, %v1726_v12, %v1727_v49  ;;  %v1840_v16 = vsel %vm462_vm3, %v1838_v34, %v1839_v43  ;;  %v1784_v23 = vsel %vm316_vm6, %v1782_v63, %v1783_v53  ;;  %v1730_v24 = vsel %vm170_vm5, %v1727_v49, %v1729_v30  ;;  %3181 = vmatpush3.bf16.msra.mxu0 %v3180_v41  ;;  %v2524_v63 = vld [vmem:[%s5194_s8] ss:$0 sm:$0xff] }
 0x288   :  { %2064 = vmatprep.mubr.f32.mxu0 %v1728_v33  ;;  %2209 = vmatprep.mubr.f32.mxu1 %v1840_v16  ;;  %v1842_v47 = vsel %vm462_vm3, %v1839_v43, %v1841_v15  ;;  %v1786_v62 = vsel %vm316_vm6, %v1783_v53, %v1785_v39  ;;  %v2237_v38 = vshrl.u32 %v2236_v42, 7  ;;  %vm2384_vm3 = vcmask 1047559  }
 0x289   :  { %2523 = vmatmul.mubr.msk.f32.gmra.mrb[92].mxu0 %vm4931_vm9, %v1632_v9  ;;  %2210 = vmatmul.mubr.f32.gmra.mrb[92].mxu1 %v1784_v23 }
 0x28a   :  { %2069 = vmatprep.mubr.f32.mxu0 %v1730_v24  ;;  %2214 = vmatprep.mubr.f32.mxu1 %v1842_v47  ;;  %v2238_v51 = vadd.s32 8, %v2237_v38  ;;  %v2243_v60 = vand.u32 3, %v2237_v38 }
 0x28b   :  { %3182 = vmatprep.subr.bf16.mxu0 %v5208_v32 }
 0x28c   :  { %3184 = vmatpush3.bf16.msra.mxu0 %v3183_v45  ;;  %v2250_v48 = vand.u32 3, %v2238_v51  ;;  %vm5117_vm11 = vcmp.eq.s32.totalorder %v2243_v60, 0 }
 0x28d   :  { %2070 = vmatmul.mubr.f32.gmra.mrb[94].mxu0 %v1634_v25  ;;  %2215 = vmatmul.mubr.f32.gmra.mrb[94].mxu1 %v1786_v62 }
 0x28e   :  { %3185 = vmatprep.subr.bf16.mxu0 %v5208_v32  ;;  %2974 = vmatprep.mubr.msk.f32.mxu0 %vm3356_vm10, %v3357_v40  ;;  %vm5121_vm12 = vcmp.eq.s32.totalorder %v2250_v48, 0 }
 0x290   :  { %3187 = vmatpush3.bf16.msra.mxu0 %v3186_v22 }
 0x291   :  { %3188 = vmatprep.subr.bf16.mxu0 %v5208_v32 }
 0x294   :  { %3190 = vmatpush3.bf16.msra.mxu0 %v3189_v3 }
 0x295   :  { %3191 = vmatprep.subr.bf16.mxu0 %v5208_v32 }
 0x298   :  { %3193 = vmatpush3.bf16.msra.mxu0 %v3192_v7 }
 0x299   :  { %3194 = vmatprep.subr.bf16.mxu0 %v5208_v32 }
 0x29c   :  { %3196 = vmatpush3.bf16.msra.mxu0 %v3195_v8 }
 0x322   :  { %v2797_v28 = vpop.f32.mrb[64].mxu0  ;;  %v2877_v46 = vpop.f32.mrb[64].mxu1 }
 0x323   :  { %v2798_v17 = vpop.f32.mrb[65].mxu0  ;;  %v2878_v5 = vpop.f32.mrb[65].mxu1 }
 0x324   :  { %v2799_v52 = vadd.f32 %v2798_v17, %v2797_v28  ;;  %v2879_v9 = vadd.f32 %v2878_v5, %v2877_v46 }
 0x326   :  { %v1997_v61 = vadd.f32 %v2799_v52, %v5113_v50  ;;  %v2800_v1 = vpop.f32.mrb[66].mxu0  ;;  %v2880_v54 = vpop.f32.mrb[66].mxu1 }
 0x327   :  { %v2801_v32 = vpop.f32.mrb[67].mxu0  ;;  %v2881_v14 = vpop.f32.mrb[67].mxu1 }
 0x328   :  { %v2142_v21 = vadd.f32 %v2879_v9, %v1997_v61  ;;  %v2802_v27 = vadd.f32 %v2801_v32, %v2800_v1  ;;  %v2882_v37 = vadd.f32 %v2881_v14, %v2880_v54 }
 0x32a   :  { %v2002_v26 = vadd.f32 %v2802_v27, %v5113_v50  ;;  %v2803_v18 = vpop.f32.mrb[68].mxu0  ;;  %v2220_v25 = vmax.f32 %v2142_v21, 0.0 }
 0x32b   :  { %v2883_v12 = vpop.f32.mrb[68].mxu1  ;;  %v2804_v44 = vpop.f32.mrb[69].mxu0 }
 0x32c   :  { %v2884_v34 = vpop.f32.mrb[69].mxu1  ;;  %v2147_v49 = vadd.f32 %v2882_v37, %v2002_v26  ;;  %v2805_v43 = vadd.f32 %v2804_v44, %v2803_v18  ;;  %v2269_v23 = vsel %vm5117_vm11, %v2220_v25, 0.0 }
 0x32d   :  { %v2885_v53 = vadd.f32 %v2884_v34, %v2883_v12 }
 0x32e   :  { %v2221_v15 = vmax.f32 %v2147_v49, 0.0  ;;  %v2007_v39 = vadd.f32 %v2805_v43, %v5113_v50  ;;  %v2806_v33 = vpop.f32.mrb[70].mxu0 }
 0x32f   :  { %v2886_v16 = vpop.f32.mrb[70].mxu1  ;;  %v2807_v24 = vpop.f32.mrb[71].mxu0 }
 0x330   :  { %v2887_v47 = vpop.f32.mrb[71].mxu1  ;;  %v2270_v62 = vsel %vm5121_vm12, %v2221_v15, 0.0  ;;  %v2152_v57 = vadd.f32 %v2885_v53, %v2007_v39  ;;  %v2808_v31 = vadd.f32 %v2807_v24, %v2806_v33 }
 0x331   :  { %v2888_v0 = vadd.f32 %v2887_v47, %v2886_v16  ;;  %v2285_v11 = vadd.f32 %v2270_v62, %v2269_v23 }
 0x332   :  { %v2012_v20 = vadd.f32 %v2808_v31, %v5113_v50  ;;  %v2222_v41 = vmax.f32 %v2152_v57, 0.0 }
 0x333   :  { %v2809_v55 = vpop.f32.mrb[72].mxu0  ;;  %v2889_v4 = vpop.f32.mrb[72].mxu1  ;;  %v2286_v6 = vrot.slane %v2285_v11, 4 }
 0x334   :  { %v2810_v58 = vpop.f32.mrb[73].mxu0  ;;  %v2890_v59 = vpop.f32.mrb[73].mxu1  ;;  %v2157_v45 = vadd.f32 %v2888_v0, %v2012_v20  ;;  %v2271_v29 = vsel %vm5117_vm11, %v2222_v41, 0.0 }
 0x335   :  { %v2811_v35 = vadd.f32 %v2810_v58, %v2809_v55  ;;  %v2891_v10 = vadd.f32 %v2890_v59, %v2889_v4  ;;  %v2287_v22 = vadd.f32 %v2286_v6, %v2285_v11 }
 0x336   :  { %v2223_v13 = vmax.f32 %v2157_v45, 0.0 }
 0x337   :  { %v2017_v2 = vadd.f32 %v2811_v35, %v5113_v50  ;;  %v2812_v3 = vpop.f32.mrb[74].mxu0  ;;  %v2892_v19 = vpop.f32.mrb[74].mxu1  ;;  %v2288_v28 = vrot.slane %v2287_v22, 2 }
 0x338   :  { %v2813_v7 = vpop.f32.mrb[75].mxu0  ;;  %v2893_v56 = vpop.f32.mrb[75].mxu1  ;;  %v2272_v36 = vsel %vm5121_vm12, %v2223_v13, 0.0 }
 0x339   :  { %v2162_v40 = vadd.f32 %v2891_v10, %v2017_v2  ;;  %v2814_v8 = vadd.f32 %v2813_v7, %v2812_v3  ;;  %v2894_v42 = vadd.f32 %v2893_v56, %v2892_v19  ;;  %v2292_v46 = vadd.f32 %v2272_v36, %v2271_v29 }
 0x33a   :  { %v2289_v14 = vadd.f32 %v2288_v28, %v2287_v22 }
 0x33b   :  { %v2022_v17 = vadd.f32 %v2814_v8, %v5113_v50  ;;  %v2293_v52 = vrot.slane %v2292_v46, 4  ;;  %v2224_v9 = vmax.f32 %v2162_v40, 0.0 }
 0x33c   :  { %v2815_v5 = vpop.f32.mrb[76].mxu0  ;;  %v2895_v38 = vpop.f32.mrb[76].mxu1  ;;  %v2290_v53 = vrot.slane %v2289_v14, 1 }
 0x33d   :  { %v2816_v51 = vpop.f32.mrb[77].mxu0  ;;  %v2896_v61 = vpop.f32.mrb[77].mxu1  ;;  %v2167_v1 = vadd.f32 %v2894_v42, %v2022_v17  ;;  %v2294_v21 = vadd.f32 %v2293_v52, %v2292_v46  ;;  %v2273_v18 = vsel %vm5117_vm11, %v2224_v9, 0.0 }
 0x33e   :  { %v2817_v54 = vadd.f32 %v2816_v51, %v2815_v5  ;;  %v2897_v32 = vadd.f32 %v2896_v61, %v2895_v38  ;;  %v2291_v55 = vadd.f32 %v2290_v53, %v2289_v14 }
 0x33f   :  { %v2225_v60 = vmax.f32 %v2167_v1, 0.0  ;;  %v2295_v26 = vrot.slane %v2294_v21, 2 }
 0x340   :  { %v2027_v27 = vadd.f32 %v2817_v54, %v5113_v50  ;;  %v2818_v37 = vpop.f32.mrb[78].mxu0  ;;  %v2898_v48 = vpop.f32.mrb[78].mxu1 }
 0x341   :  { %v2819_v12 = vpop.f32.mrb[79].mxu0  ;;  %v2899_v25 = vpop.f32.mrb[79].mxu1  ;;  %v2274_v44 = vsel %vm5121_vm12, %v2225_v60, 0.0  ;;  %v2296_v15 = vadd.f32 %v2295_v26, %v2294_v21 }
 0x342   :  { %v2172_v34 = vadd.f32 %v2897_v32, %v2027_v27  ;;  %v2820_v49 = vadd.f32 %v2819_v12, %v2818_v37  ;;  %v2900_v43 = vadd.f32 %v2899_v25, %v2898_v48  ;;  %v2299_v39 = vadd.f32 %v2274_v44, %v2273_v18 }
 0x343   :  { %v2297_v24 = vrot.slane %v2296_v15, 1 }
 0x344   :  { %v2032_v33 = vadd.f32 %v2820_v49, %v5113_v50  ;;  %v2821_v16 = vpop.f32.mrb[80].mxu0  ;;  %v2901_v23 = vpop.f32.mrb[80].mxu1  ;;  %v2300_v47 = vrot.slane %v2299_v39, 4  ;;  %v2226_v62 = vmax.f32 %v2172_v34, 0.0 }
 0x345   :  { %v2822_v57 = vpop.f32.mrb[81].mxu0  ;;  %v2902_v31 = vpop.f32.mrb[81].mxu1  ;;  %v2298_v4 = vadd.f32 %v2297_v24, %v2296_v15 }
 0x346   :  { %v2177_v0 = vadd.f32 %v2900_v43, %v2032_v33  ;;  %v2823_v11 = vadd.f32 %v2822_v57, %v2821_v16  ;;  %v2903_v20 = vadd.f32 %v2902_v31, %v2901_v23  ;;  %v2301_v6 = vadd.f32 %v2300_v47, %v2299_v39 }
 0x347   :  { %v2373_v35 = vsel %vm2372_vm13, %v2298_v4, %v2291_v55  ;;  %v2275_v22 = vsel %vm5117_vm11, %v2226_v62, 0.0 }
 0x348   :  { %v2227_v41 = vmax.f32 %v2177_v0, 0.0  ;;  %v2037_v58 = vadd.f32 %v2823_v11, %v5113_v50  ;;  %v2824_v59 = vpop.f32.mrb[82].mxu0  ;;  %v2904_v45 = vpop.f32.mrb[82].mxu1  ;;  %v2302_v10 = vrot.slane %v2301_v6, 2 }
 0x349   :  { %v2825_v13 = vpop.f32.mrb[83].mxu0  ;;  %v2905_v2 = vpop.f32.mrb[83].mxu1 }
 0x34a   :  { %v2276_v3 = vsel %vm5121_vm12, %v2227_v41, 0.0  ;;  %v2182_v19 = vadd.f32 %v2903_v20, %v2037_v58  ;;  %v2826_v29 = vadd.f32 %v2825_v13, %v2824_v59  ;;  %v2906_v7 = vadd.f32 %v2905_v2, %v2904_v45 }
 0x34b   :  { %v2303_v56 = vadd.f32 %v2302_v10, %v2301_v6  ;;  %v2306_v36 = vadd.f32 %v2276_v3, %v2275_v22 }
 0x34c   :  { %v2042_v40 = vadd.f32 %v2826_v29, %v5113_v50  ;;  %v2827_v8 = vpop.f32.mrb[84].mxu0  ;;  %v2907_v42 = vpop.f32.mrb[84].mxu1  ;;  %v2228_v17 = vmax.f32 %v2182_v19, 0.0 }
 0x34d   :  { %v2304_v28 = vrot.slane %v2303_v56, 1  ;;  %v2307_v46 = vrot.slane %v2306_v36, 4  ;;  %v2828_v5 = vpop.f32.mrb[85].mxu0  ;;  %v2908_v38 = vpop.f32.mrb[85].mxu1 }
 0x34e   :  { %v2187_v52 = vadd.f32 %v2906_v7, %v2042_v40  ;;  %v2829_v9 = vadd.f32 %v2828_v5, %v2827_v8  ;;  %v2909_v51 = vadd.f32 %v2908_v38, %v2907_v42  ;;  %v2277_v37 = vsel %vm5117_vm11, %v2228_v17, 0.0 }
 0x34f   :  { %v2305_v61 = vadd.f32 %v2304_v28, %v2303_v56  ;;  %v2308_v1 = vadd.f32 %v2307_v46, %v2306_v36 }
 0x350   :  { %v2229_v54 = vmax.f32 %v2187_v52, 0.0  ;;  %v2047_v32 = vadd.f32 %v2829_v9, %v5113_v50  ;;  %v2830_v14 = vpop.f32.mrb[86].mxu0  ;;  %v2910_v21 = vpop.f32.mrb[86].mxu1 }
 0x351   :  { %v2375_v60 = vsel %vm2374_vm14, %v2305_v61, %v2373_v35  ;;  %v2309_v27 = vrot.slane %v2308_v1, 2  ;;  %v2831_v48 = vpop.f32.mrb[87].mxu0  ;;  %v2911_v26 = vpop.f32.mrb[87].mxu1 }
 0x352   :  { %v2278_v18 = vsel %vm5121_vm12, %v2229_v54, 0.0  ;;  %v2192_v12 = vadd.f32 %v2909_v51, %v2047_v32  ;;  %v2832_v25 = vadd.f32 %v2831_v48, %v2830_v14  ;;  %v2912_v44 = vadd.f32 %v2911_v26, %v2910_v21 }
 0x353   :  { %v2310_v34 = vadd.f32 %v2309_v27, %v2308_v1  ;;  %v2313_v49 = vadd.f32 %v2278_v18, %v2277_v37 }
 0x354   :  { %v2052_v43 = vadd.f32 %v2832_v25, %v5113_v50  ;;  %v2833_v53 = vpop.f32.mrb[88].mxu0  ;;  %v2913_v15 = vpop.f32.mrb[88].mxu1  ;;  %v2230_v16 = vmax.f32 %v2192_v12, 0.0 }
 0x355   :  { %v2311_v39 = vrot.slane %v2310_v34, 1  ;;  %v2314_v33 = vrot.slane %v2313_v49, 4  ;;  %v2834_v23 = vpop.f32.mrb[89].mxu0  ;;  %v2914_v24 = vpop.f32.mrb[89].mxu1 }
 0x356   :  { %v2197_v47 = vadd.f32 %v2912_v44, %v2052_v43  ;;  %v2835_v62 = vadd.f32 %v2834_v23, %v2833_v53  ;;  %v2915_v57 = vadd.f32 %v2914_v24, %v2913_v15  ;;  %v2279_v41 = vsel %vm5117_vm11, %v2230_v16, 0.0 }
 0x357   :  { %v2312_v31 = vadd.f32 %v2311_v39, %v2310_v34  ;;  %v2315_v0 = vadd.f32 %v2314_v33, %v2313_v49 }
 0x358   :  { %v2231_v11 = vmax.f32 %v2197_v47, 0.0  ;;  %v2057_v20 = vadd.f32 %v2835_v62, %v5113_v50  ;;  %v2836_v55 = vpop.f32.mrb[90].mxu0  ;;  %v2916_v4 = vpop.f32.mrb[90].mxu1 }
 0x359   :  { %v2316_v6 = vrot.slane %v2315_v0, 2  ;;  %v2837_v58 = vpop.f32.mrb[91].mxu0  ;;  %v2917_v59 = vpop.f32.mrb[91].mxu1  ;;  %v2377_v45 = vsel %vm2376_vm15, %v2312_v31, %v2375_v60 }
 0x35a   :  { %v2280_v35 = vsel %vm5121_vm12, %v2231_v11, 0.0  ;;  %v2202_v10 = vadd.f32 %v2915_v57, %v2057_v20  ;;  %v2838_v22 = vadd.f32 %v2837_v58, %v2836_v55  ;;  %v2918_v13 = vadd.f32 %v2917_v59, %v2916_v4 }
 0x35b   :  { %v2317_v2 = vadd.f32 %v2316_v6, %v2315_v0  ;;  %v2320_v3 = vadd.f32 %v2280_v35, %v2279_v41 }
 0x35c   :  { %v2062_v19 = vadd.f32 %v2838_v22, %v5113_v50  ;;  %v2839_v29 = vpop.f32.mrb[92].mxu0  ;;  %v2919_v7 = vpop.f32.mrb[92].mxu1  ;;  %v2232_v40 = vmax.f32 %v2202_v10, 0.0 }
 0x35d   :  { %v2318_v56 = vrot.slane %v2317_v2, 1  ;;  %v2321_v36 = vrot.slane %v2320_v3, 4  ;;  %v2840_v8 = vpop.f32.mrb[93].mxu0  ;;  %v2920_v42 = vpop.f32.mrb[93].mxu1 }
 0x35e   :  { %v2207_v28 = vadd.f32 %v2918_v13, %v2062_v19  ;;  %v2841_v46 = vadd.f32 %v2840_v8, %v2839_v29  ;;  %v2921_v17 = vadd.f32 %v2920_v42, %v2919_v7  ;;  %v2281_v54 = vsel %vm5117_vm11, %v2232_v40, 0.0 }
 0x35f   :  { %v2319_v5 = vadd.f32 %v2318_v56, %v2317_v2  ;;  %v2322_v38 = vadd.f32 %v2321_v36, %v2320_v3 }
 0x360   :  { %v2233_v52 = vmax.f32 %v2207_v28, 0.0  ;;  %v2067_v9 = vadd.f32 %v2841_v46, %v5113_v50  ;;  %v2842_v51 = vpop.f32.mrb[94].mxu0  ;;  %v2922_v61 = vpop.f32.mrb[94].mxu1 }
 0x361   :  { %v2323_v1 = vrot.slane %v2322_v38, 2  ;;  %v2843_v32 = vpop.f32.mrb[95].mxu0  ;;  %v2923_v14 = vpop.f32.mrb[95].mxu1  ;;  %v2379_v21 = vsel %vm2378_vm0, %v2319_v5, %v2377_v45 }
 0x362   :  { %v2282_v60 = vsel %vm5121_vm12, %v2233_v52, 0.0  ;;  %v2212_v27 = vadd.f32 %v2921_v17, %v2067_v9  ;;  %v2844_v37 = vadd.f32 %v2843_v32, %v2842_v51  ;;  %v2924_v48 = vadd.f32 %v2923_v14, %v2922_v61 }
 0x363   :  { %v2324_v26 = vadd.f32 %v2323_v1, %v2322_v38  ;;  %v2327_v18 = vadd.f32 %v2282_v60, %v2281_v54 }
 0x364   :  { %v2072_v12 = vadd.f32 %v2844_v37, %v5113_v50  ;;  %v2234_v34 = vmax.f32 %v2212_v27, 0.0 }
 0x365   :  { %v2325_v25 = vrot.slane %v2324_v26, 1  ;;  %v2328_v44 = vrot.slane %v2327_v18, 4 }
 0x366   :  { %v2217_v49 = vadd.f32 %v2924_v48, %v2072_v12  ;;  %v2283_v16 = vsel %vm5117_vm11, %v2234_v34, 0.0 }
 0x367   :  { %v2326_v43 = vadd.f32 %v2325_v25, %v2324_v26  ;;  %v2329_v53 = vadd.f32 %v2328_v44, %v2327_v18 }
 0x368   :  { %v2235_v15 = vmax.f32 %v2217_v49, 0.0 }
 0x369   :  { %v2330_v39 = vrot.slane %v2329_v53, 2  ;;  %v2381_v33 = vsel %vm2380_vm1, %v2326_v43, %v2379_v21 }
 0x36a   :  { %v2284_v23 = vsel %vm5121_vm12, %v2235_v15, 0.0 }
 0x36b   :  { %v2331_v24 = vadd.f32 %v2330_v39, %v2329_v53  ;;  %v2334_v47 = vadd.f32 %v2284_v23, %v2283_v16 }
 0x36d   :  { %v2332_v62 = vrot.slane %v2331_v24, 1  ;;  %v2335_v50 = vrot.slane %v2334_v47, 4 }
 0x36f   :  { %v2333_v57 = vadd.f32 %v2332_v62, %v2331_v24  ;;  %v2336_v31 = vadd.f32 %v2335_v50, %v2334_v47 }
 0x371   :  { %v2337_v0 = vrot.slane %v2336_v31, 2  ;;  %v2383_v11 = vsel %vm2382_vm2, %v2333_v57, %v2381_v33 }
 0x373   :  { %v2338_v20 = vadd.f32 %v2337_v0, %v2336_v31 }
 0x375   :  { %v2339_v55 = vrot.slane %v2338_v20, 1 }
 0x377   :  { %v2340_v4 = vadd.f32 %v2339_v55, %v2338_v20 }
 0x379   :  { %v2385_v6 = vsel %vm2384_vm3, %v2340_v4, %v2383_v11 }
 0x37a   :  { %2975 = vmatmul.mubr.f32.vlgmr.msra.gmra.mrb[96].mxu0 %v2385_v6 }
 0x44d   :  { %v2453_v30 = vpop.f32.mrb[96].mxu0 }
 0x44e   :  { %v2454_v41 = vadd.f32 %v2524_v63, %v2453_v30  ;;  %v2976_v58 = vpop.f32.mrb[97].mxu0 }
 0x450   :  { %2458 = vst.msk [vmem:[#allocation2] sm:$0xff] %vm2457_vm4, %v2454_v41 }
 0x451   :  { %3341 = shalt.err (!%p3338_p4)
}
 0x452   :  { %s3342_s17 = scalar_lea.hbm %s5195_s9, 128 }
 0x453   :  { %p3343_p5 = scmp.ne.s32.totalorder %s5195_s9, %s3342_s17  ;;  %p3346_p6 = scmp.lt.u32.totalorder %s3342_s17, %s5195_s9 }
 0x455   :  { %p3348_p7 = pnand %p3346_p6, %p3343_p5 }
 0x457   :  { %3351 = shalt.err (!%p3348_p7)
}
 0x458   :  { %2468 = dma.vmem_to_hbm [thread:$0]  %s2466_s15, 128, %s5195_s9, [#allocation3]  }
 0x459   :  { %3352 = dma.done.wait [#allocation3], 128  }
 0x45a   :  { %3353 = vsyncadd [#allocation3], 4294967168 }
 0x45b   :  { %2472 = vsyncpa [#allocation3], 1 }

</bundles_post_ra>
